<compile_context>
chip_gen: v7x
topology: tpu7x:2x2x1
jax: 0.10.0
libtpu: 0.0.40
codegen_flags: <defaults>
</compile_context>

<pallas_src>
import jax
import jax.numpy as jnp
from jax.experimental import pallas as pl
from jax.experimental.pallas import tpu as pltpu

_EPS = 1e-5
_OUT_COLS = 128  # 4 branches x 32 channels -> lane-dense output width


# --------------------------------------------------------------------------
# Pallas kernel: o = relu(sum_i a_i @ w_i + shift); lanes < res_cols are
# copied from a residual ref (carries already-computed branch channels).
# --------------------------------------------------------------------------
def _make_fused_kernel(n_mm: int, res_cols: int):
    def kernel(*refs):
        a_refs = refs[0:n_mm]
        w_refs = refs[n_mm:2 * n_mm]
        shift_ref = refs[2 * n_mm]
        res_ref = refs[2 * n_mm + 1] if res_cols > 0 else None
        o_ref = refs[-1]

        acc = jnp.dot(a_refs[0][...], w_refs[0][...],
                      preferred_element_type=jnp.float32)
        for i in range(1, n_mm):
            acc = acc + jnp.dot(a_refs[i][...], w_refs[i][...],
                                preferred_element_type=jnp.float32)
        y = jnp.maximum(acc + shift_ref[...], 0.0)
        if res_cols > 0:
            lane = jax.lax.broadcasted_iota(jnp.int32, y.shape, 1)
            y = jnp.where(lane < res_cols, res_ref[...].astype(jnp.float32), y)
        o_ref[...] = y.astype(o_ref.dtype)

    return kernel


def _fused_matmul_relu(a_list, w_list, shift, *, res=None, res_cols=0,
                       tm, out_dtype=jnp.float32):
    m = a_list[0].shape[0]
    c_out = w_list[0].shape[1]
    n_mm = len(a_list)
    assert m % tm == 0

    in_specs = [pl.BlockSpec((tm, int(a.shape[1])), lambda i: (i, 0))
                for a in a_list]
    in_specs += [pl.BlockSpec((int(w.shape[0]), c_out), lambda i: (0, 0))
                 for w in w_list]
    in_specs += [pl.BlockSpec((1, c_out), lambda i: (0, 0))]
    operands = list(a_list) + list(w_list) + [shift.reshape(1, c_out)]
    if res_cols > 0:
        in_specs += [pl.BlockSpec((tm, c_out), lambda i: (i, 0))]
        operands += [res]

    return pl.pallas_call(
        _make_fused_kernel(n_mm, res_cols),
        out_shape=jax.ShapeDtypeStruct((m, c_out), out_dtype),
        grid_spec=pltpu.PrefetchScalarGridSpec(
            num_scalar_prefetch=0,
            grid=(m // tm,),
            in_specs=in_specs,
            out_specs=pl.BlockSpec((tm, c_out), lambda i: (i, 0)),
        ),
        compiler_params=pltpu.CompilerParams(
            dimension_semantics=("parallel",)),
    )(*operands)


# --------------------------------------------------------------------------
# XLA glue: im2col, BN folding, padding helpers
# --------------------------------------------------------------------------
def _im2col_3x3(x_nhwc):
    """[N,H,W,C] -> [N*H*W, 9*C], patch order (ki, kj, c), zero pad=1."""
    n, h, w, c = x_nhwc.shape
    xp = jnp.pad(x_nhwc, ((0, 0), (1, 1), (1, 1), (0, 0)))
    cols = [xp[:, i:i + h, j:j + w, :] for i in range(3) for j in range(3)]
    return jnp.concatenate(cols, axis=-1).reshape(n * h * w, 9 * c)


def _fold_bn(w, gamma, beta, mean, var, eps=_EPS):
    """Fold eval-mode BN into the conv weight: returns ([K, Cout], [Cout])."""
    c_out = w.shape[0]
    scale = gamma / jnp.sqrt(var + eps)
    w_mat = jnp.transpose(w, (2, 3, 1, 0)).reshape(-1, c_out) * scale[None, :]
    shift = beta - mean * scale
    return w_mat, shift


def _round_up(v, mult):
    return ((v + mult - 1) // mult) * mult


def _pad_rows(a, m_pad):
    m = a.shape[0]
    return a if m == m_pad else jnp.pad(a, ((0, m_pad - m), (0, 0)))


# --------------------------------------------------------------------------
# Forward pass
# --------------------------------------------------------------------------
@jax.jit
def inception_forward(x, params):
    """x: [N, 128, H, W] NCHW.  params: dict name -> (w, gamma, beta, mean, var).
    Returns [N, 128, H, W] = cat([b1x1, b1x1_2, b3x3, b3x3_3], channel)."""
    n, c_in, h, w = x.shape
    m = n * h * w
    dt = x.dtype

    # Big row tile when there is enough work; otherwise a single padded tile.
    tm = 1024 if m >= 1024 else max(8, _round_up(m, 8))
    m_pad = _round_up(m, tm)

    x_nhwc = jnp.transpose(x, (0, 2, 3, 1))                    # [N,H,W,128]
    # avg_pool2d(3, stride=1, pad=1, count_include_pad=True) == window-sum / 9
    pooled = jax.lax.reduce_window(
        x_nhwc, jnp.zeros((), x_nhwc.dtype), jax.lax.add,
        (1, 3, 3, 1), (1, 1, 1, 1),
        ((0, 0), (1, 1), (1, 1), (0, 0))) * (1.0 / 9.0)

    # Fold BN into conv weights.
    w_b1, s_b1 = _fold_bn(*params["branch1x1"])            # [128, 32]
    w_b1p, s_b1p = _fold_bn(*params["branch1x1_2"])        # [128, 32]
    w_r1, s_r1 = _fold_bn(*params["branch3x3_reduce"])     # [128, 24]
    w_r2, s_r2 = _fold_bn(*params["branch3x3_reduce_2"])   # [128, 24]
    w_33, s_33 = _fold_bn(*params["branch3x3"])            # [216, 32]
    w_33b, s_33b = _fold_bn(*params["branch3x3_2"])        # [216, 32]
    w_333, s_333 = _fold_bn(*params["branch3x3_3"])        # [288, 32]

    f32 = jnp.float32

    # ---- Stage 1: all 1x1 convs (x and pooled branches), one Pallas call ----
    # column layout: [0:32) b1 | [32:64) b1_2 | [64:88) r1 | [88:112) r2 | pad
    w_x = jnp.zeros((c_in, _OUT_COLS), f32)
    w_x = w_x.at[:, 0:32].set(w_b1).at[:, 64:88].set(w_r1).at[:, 88:112].set(w_r2)
    w_p = jnp.zeros((c_in, _OUT_COLS), f32).at[:, 32:64].set(w_b1p)
    sh1 = jnp.zeros((_OUT_COLS,), f32)
    sh1 = sh1.at[0:32].set(s_b1).at[32:64].set(s_b1p)
    sh1 = sh1.at[64:88].set(s_r1).at[88:112].set(s_r2)

    a_x = _pad_rows(x_nhwc.reshape(m, c_in), m_pad)
    a_p = _pad_rows(pooled.reshape(m, c_in), m_pad)
    s1 = _fused_matmul_relu([a_x, a_p], [w_x, w_p], sh1, tm=tm, out_dtype=f32)

    # ---- Stage 2: 3x3 convs on both reduce branches, one Pallas call -------
    # columns: [0:64) carried from s1 | [64:96) branch3x3 | [96:128) branch3x3_2
    red1 = s1[:m, 64:88].reshape(n, h, w, 24)
    red2 = s1[:m, 88:112].reshape(n, h, w, 24)
    a_r1 = _pad_rows(_im2col_3x3(red1), m_pad)               # [m_pad, 216]
    a_r2 = _pad_rows(_im2col_3x3(red2), m_pad)
    w2a = jnp.zeros((9 * 24, _OUT_COLS), f32).at[:, 64:96].set(w_33)
    w2b = jnp.zeros((9 * 24, _OUT_COLS), f32).at[:, 96:128].set(w_33b)
    sh2 = jnp.zeros((_OUT_COLS,), f32).at[64:96].set(s_33).at[96:128].set(s_33b)
    s2 = _fused_matmul_relu([a_r1, a_r2], [w2a, w2b], sh2,
                            res=s1, res_cols=64, tm=tm, out_dtype=f32)

    # ---- Stage 3: branch3x3_3; writes the final 128-channel slab -----------
    b332 = s2[:m, 96:128].reshape(n, h, w, 32)
    a_3 = _pad_rows(_im2col_3x3(b332), m_pad)                # [m_pad, 288]
    w3 = jnp.zeros((9 * 32, _OUT_COLS), f32).at[:, 96:128].set(w_333)
    sh3 = jnp.zeros((_OUT_COLS,), f32).at[96:128].set(s_333)
    s3 = _fused_matmul_relu([a_3], [w3], sh3,
                            res=s2, res_cols=96, tm=tm, out_dtype=dt)

    out = s3[:m].reshape(n, h, w, _OUT_COLS)
    return jnp.transpose(out, (0, 3, 1, 2))                  # back to NCHW


# --------------------------------------------------------------------------
# Pure-JAX reference (NCHW, eval-mode BN)
# --------------------------------------------------------------------------
def _basic_conv_ref(x, w, gamma, beta, mean, var, pad=0, eps=_EPS):
    y = jax.lax.conv_general_dilated(
        x, w, (1, 1), ((pad, pad), (pad, pad)),
        dimension_numbers=("NCHW", "OIHW", "NCHW"),
        precision=jax.lax.Precision.HIGHEST)
    scale = (gamma / jnp.sqrt(var + eps)).reshape(1, -1, 1, 1)
    shift = (beta - mean * gamma / jnp.sqrt(var + eps)).reshape(1, -1, 1, 1)
    return jnp.maximum(y * scale + shift, 0.0)


def _inception_reference(x, params):
    b1 = _basic_conv_ref(x, *params["branch1x1"])
    xp = jax.lax.reduce_window(
        x, jnp.zeros((), x.dtype), jax.lax.add,
        (1, 1, 3, 3), (1, 1, 1, 1),
        ((0, 0), (0, 0), (1, 1), (1, 1))) / 9.0
    b1p = _basic_conv_ref(xp, *params["branch1x1_2"])
    r1 = _basic_conv_ref(x, *params["branch3x3_reduce"])
    b33 = _basic_conv_ref(r1, *params["branch3x3"], pad=1)
    r2 = _basic_conv_ref(x, *params["branch3x3_reduce_2"])
    b332 = _basic_conv_ref(r2, *params["branch3x3_2"], pad=1)
    b333 = _basic_conv_ref(b332, *params["branch3x3_3"], pad=1)
    return jnp.concatenate([b1, b1p, b33, b333], axis=1)


if __name__ == "__main__":
    key = jax.random.PRNGKey(0)

    N, C_IN, H, W = 2, 128, 16, 16   # Inception requires 128 input channels

    def make_bn_conv(k, c_out, c_in, ksize):
        kw_, kg, kb, km, kv = jax.random.split(k, 5)
        wgt = jax.random.normal(kw_, (c_out, c_in, ksize, ksize), jnp.float32) * 0.1
        gamma = jax.random.uniform(kg, (c_out,), minval=0.5, maxval=1.5)
        beta = jax.random.normal(kb, (c_out,)) * 0.1
        mean = jax.random.normal(km, (c_out,)) * 0.1
        var = jax.random.uniform(kv, (c_out,), minval=0.5, maxval=1.5)
        return (wgt, gamma, beta, mean, var)

    keys = jax.random.split(key, 8)
    x = jax.random.normal(keys[0], (N, C_IN, H, W), jnp.float32)
    params = {
        "branch1x1":          make_bn_conv(keys[1], 32, 128, 1),
        "branch1x1_2":        make_bn_conv(keys[2], 32, 128, 1),
        "branch3x3_reduce":   make_bn_conv(keys[3], 24, 128, 1),
        "branch3x3":          make_bn_conv(keys[4], 32, 24, 3),
        "branch3x3_reduce_2": make_bn_conv(keys[5], 24, 128, 1),
        "branch3x3_2":        make_bn_conv(keys[6], 32, 24, 3),
        "branch3x3_3":        make_bn_conv(keys[7], 32, 32, 3),
    }

    out = inception_forward(x, params)
    out = jax.block_until_ready(out)

    ref = _inception_reference(x, params)
    assert out.shape == (N, 128, H, W), out.shape
    max_err = float(jnp.max(jnp.abs(out - ref)))
    assert jnp.allclose(out, ref, atol=2e-3, rtol=2e-3), f"mismatch: {max_err}"

    print("KERNEL_OK")
</pallas_src>

<mosaic_0001>
module attributes {stable_mosaic.version = 11 : i64} {
  func.func @kernel(%arg0: i32, %arg1: memref<512x128xf32, #tpu.memory_space<vmem>>, %arg2: memref<512x128xf32, #tpu.memory_space<vmem>>, %arg3: memref<128x128xf32, #tpu.memory_space<vmem>>, %arg4: memref<128x128xf32, #tpu.memory_space<vmem>>, %arg5: memref<1x128xf32, #tpu.memory_space<vmem>>, %arg6: memref<512x128xf32, #tpu.memory_space<vmem>>) attributes {dimension_semantics = [#tpu.dimension_semantics<parallel>], iteration_bounds = array<i64: 1>, scalar_prefetch = 0 : i64, scratch_operands = 0 : i64, tpu.core_type = #tpu.core_type<tc>, window_params = [{transform_indices = @transform_0, window_bounds = array<i64: 512, 128>}, {transform_indices = @transform_1, window_bounds = array<i64: 512, 128>}, {pipeline_mode = #tpu.pipeline_mode<synchronous>, transform_indices = @transform_2, window_bounds = array<i64: 128, 128>}, {pipeline_mode = #tpu.pipeline_mode<synchronous>, transform_indices = @transform_3, window_bounds = array<i64: 128, 128>}, {pipeline_mode = #tpu.pipeline_mode<synchronous>, transform_indices = @transform_4, window_bounds = array<i64: 1, 128>}, {transform_indices = @transform_5, window_bounds = array<i64: 512, 128>}]} {
    %c0 = arith.constant 0 : index
    %c0_0 = arith.constant 0 : index
    %0 = vector.load %arg1[%c0, %c0_0] : memref<512x128xf32, #tpu.memory_space<vmem>>, vector<512x128xf32>
    %c0_1 = arith.constant 0 : index
    %c0_2 = arith.constant 0 : index
    %1 = vector.load %arg3[%c0_1, %c0_2] : memref<128x128xf32, #tpu.memory_space<vmem>>, vector<128x128xf32>
    %cst = arith.constant dense<0.000000e+00> : vector<512x128xf32>
    %2 = tpu.matmul %0, %1, %cst {dimension_numbers = #tpu.dot_dimension_numbers<[1], [0], [0], [1], [0, 0, 1, 1], [], []>} : vector<512x128xf32>, vector<128x128xf32>, vector<512x128xf32> -> vector<512x128xf32>
    %c0_3 = arith.constant 0 : index
    %c0_4 = arith.constant 0 : index
    %3 = vector.load %arg2[%c0_3, %c0_4] : memref<512x128xf32, #tpu.memory_space<vmem>>, vector<512x128xf32>
    %c0_5 = arith.constant 0 : index
    %c0_6 = arith.constant 0 : index
    %4 = vector.load %arg4[%c0_5, %c0_6] : memref<128x128xf32, #tpu.memory_space<vmem>>, vector<128x128xf32>
    %cst_7 = arith.constant dense<0.000000e+00> : vector<512x128xf32>
    %5 = tpu.matmul %3, %4, %cst_7 {dimension_numbers = #tpu.dot_dimension_numbers<[1], [0], [0], [1], [0, 0, 1, 1], [], []>} : vector<512x128xf32>, vector<128x128xf32>, vector<512x128xf32> -> vector<512x128xf32>
    %6 = arith.addf %2, %5 : vector<512x128xf32>
    %c0_8 = arith.constant 0 : index
    %c0_9 = arith.constant 0 : index
    %7 = vector.load %arg5[%c0_8, %c0_9] : memref<1x128xf32, #tpu.memory_space<vmem>>, vector<1x128xf32>
    %8 = vector.broadcast %7 : vector<1x128xf32> to vector<512x128xf32>
    %9 = arith.addf %6, %8 : vector<512x128xf32>
    %cst_10 = arith.constant 0.000000e+00 : f32
    %10 = vector.broadcast %cst_10 : f32 to vector<512x128xf32>
    %11 = arith.maximumf %9, %10 : vector<512x128xf32>
    %c0_11 = arith.constant 0 : index
    %c0_12 = arith.constant 0 : index
    %12 = vector.load %arg6[%c0_11, %c0_12] : memref<512x128xf32, #tpu.memory_space<vmem>>, vector<512x128xf32>
    tpu.vector_store %arg6[%c0_11, %c0_12], %11 {strides = array<i32>} : memref<512x128xf32, #tpu.memory_space<vmem>>, vector<512x128xf32>,
    return
  }
  func.func @transform_0(%arg0: i32) -> (i32, i32) {
    %c0_i32 = arith.constant 0 : i32
    %c0_i32_0 = arith.constant 0 : i32
    return %arg0, %c0_i32 : i32, i32
  }
  func.func @transform_1(%arg0: i32) -> (i32, i32) {
    %c0_i32 = arith.constant 0 : i32
    %c0_i32_0 = arith.constant 0 : i32
    return %arg0, %c0_i32 : i32, i32
  }
  func.func @transform_2(%arg0: i32) -> (i32, i32) {
    %c0_i32 = arith.constant 0 : i32
    %c0_i32_0 = arith.constant 0 : i32
    %c0_i32_1 = arith.constant 0 : i32
    return %c0_i32, %c0_i32_0 : i32, i32
  }
  func.func @transform_3(%arg0: i32) -> (i32, i32) {
    %c0_i32 = arith.constant 0 : i32
    %c0_i32_0 = arith.constant 0 : i32
    %c0_i32_1 = arith.constant 0 : i32
    return %c0_i32, %c0_i32_0 : i32, i32
  }
  func.func @transform_4(%arg0: i32) -> (i32, i32) {
    %c0_i32 = arith.constant 0 : i32
    %c0_i32_0 = arith.constant 0 : i32
    %c0_i32_1 = arith.constant 0 : i32
    return %c0_i32, %c0_i32_0 : i32, i32
  }
  func.func @transform_5(%arg0: i32) -> (i32, i32) {
    %c0_i32 = arith.constant 0 : i32
    %c0_i32_0 = arith.constant 0 : i32
    return %arg0, %c0_i32 : i32, i32
  }
}

module attributes {stable_mosaic.version = 11 : i64} {
  func.func @kernel(%arg0: i32, %arg1: memref<512x216xf32, #tpu.memory_space<vmem>>, %arg2: memref<512x216xf32, #tpu.memory_space<vmem>>, %arg3: memref<216x128xf32, #tpu.memory_space<vmem>>, %arg4: memref<216x128xf32, #tpu.memory_space<vmem>>, %arg5: memref<1x128xf32, #tpu.memory_space<vmem>>, %arg6: memref<512x128xf32, #tpu.memory_space<vmem>>, %arg7: memref<512x128xf32, #tpu.memory_space<vmem>>) attributes {dimension_semantics = [#tpu.dimension_semantics<parallel>], iteration_bounds = array<i64: 1>, scalar_prefetch = 0 : i64, scratch_operands = 0 : i64, tpu.core_type = #tpu.core_type<tc>, window_params = [{transform_indices = @transform_0, window_bounds = array<i64: 512, 216>}, {transform_indices = @transform_1, window_bounds = array<i64: 512, 216>}, {pipeline_mode = #tpu.pipeline_mode<synchronous>, transform_indices = @transform_2, window_bounds = array<i64: 216, 128>}, {pipeline_mode = #tpu.pipeline_mode<synchronous>, transform_indices = @transform_3, window_bounds = array<i64: 216, 128>}, {pipeline_mode = #tpu.pipeline_mode<synchronous>, transform_indices = @transform_4, window_bounds = array<i64: 1, 128>}, {transform_indices = @transform_5, window_bounds = array<i64: 512, 128>}, {transform_indices = @transform_6, window_bounds = array<i64: 512, 128>}]} {
    %c0 = arith.constant 0 : index
    %c0_0 = arith.constant 0 : index
    %0 = vector.load %arg1[%c0, %c0_0] : memref<512x216xf32, #tpu.memory_space<vmem>>, vector<512x216xf32>
    %c0_1 = arith.constant 0 : index
    %c0_2 = arith.constant 0 : index
    %1 = vector.load %arg3[%c0_1, %c0_2] : memref<216x128xf32, #tpu.memory_space<vmem>>, vector<216x128xf32>
    %cst = arith.constant dense<0.000000e+00> : vector<512x128xf32>
    %2 = tpu.matmul %0, %1, %cst {dimension_numbers = #tpu.dot_dimension_numbers<[1], [0], [0], [1], [0, 0, 1, 1], [], []>} : vector<512x216xf32>, vector<216x128xf32>, vector<512x128xf32> -> vector<512x128xf32>
    %c0_3 = arith.constant 0 : index
    %c0_4 = arith.constant 0 : index
    %3 = vector.load %arg2[%c0_3, %c0_4] : memref<512x216xf32, #tpu.memory_space<vmem>>, vector<512x216xf32>
    %c0_5 = arith.constant 0 : index
    %c0_6 = arith.constant 0 : index
    %4 = vector.load %arg4[%c0_5, %c0_6] : memref<216x128xf32, #tpu.memory_space<vmem>>, vector<216x128xf32>
    %cst_7 = arith.constant dense<0.000000e+00> : vector<512x128xf32>
    %5 = tpu.matmul %3, %4, %cst_7 {dimension_numbers = #tpu.dot_dimension_numbers<[1], [0], [0], [1], [0, 0, 1, 1], [], []>} : vector<512x216xf32>, vector<216x128xf32>, vector<512x128xf32> -> vector<512x128xf32>
    %6 = arith.addf %2, %5 : vector<512x128xf32>
    %c0_8 = arith.constant 0 : index
    %c0_9 = arith.constant 0 : index
    %7 = vector.load %arg5[%c0_8, %c0_9] : memref<1x128xf32, #tpu.memory_space<vmem>>, vector<1x128xf32>
    %8 = vector.broadcast %7 : vector<1x128xf32> to vector<512x128xf32>
    %9 = arith.addf %6, %8 : vector<512x128xf32>
    %cst_10 = arith.constant 0.000000e+00 : f32
    %10 = vector.broadcast %cst_10 : f32 to vector<512x128xf32>
    %11 = arith.maximumf %9, %10 : vector<512x128xf32>
    %12 = tpu.iota {dimensions = array<i32: 1>} : vector<512x128xi32>
    %c64_i32 = arith.constant 64 : i32
    %13 = vector.broadcast %c64_i32 : i32 to vector<512x128xi32>
    %14 = arith.cmpi slt, %12, %13 : vector<512x128xi32>
    %c0_11 = arith.constant 0 : index
    %c0_12 = arith.constant 0 : index
    %15 = vector.load %arg6[%c0_11, %c0_12] : memref<512x128xf32, #tpu.memory_space<vmem>>, vector<512x128xf32>
    %16 = arith.select %14, %15, %11 : vector<512x128xi1>, vector<512x128xf32>
    %c0_13 = arith.constant 0 : index
    %c0_14 = arith.constant 0 : index
    %17 = vector.load %arg7[%c0_13, %c0_14] : memref<512x128xf32, #tpu.memory_space<vmem>>, vector<512x128xf32>
    tpu.vector_store %arg7[%c0_13, %c0_14], %16 {strides = array<i32>} : memref<512x128xf32, #tpu.memory_space<vmem>>, vector<512x128xf32>,
    return
  }
  func.func @transform_0(%arg0: i32) -> (i32, i32) {
    %c0_i32 = arith.constant 0 : i32
    %c0_i32_0 = arith.constant 0 : i32
    return %arg0, %c0_i32 : i32, i32
  }
  func.func @transform_1(%arg0: i32) -> (i32, i32) {
    %c0_i32 = arith.constant 0 : i32
    %c0_i32_0 = arith.constant 0 : i32
    return %arg0, %c0_i32 : i32, i32
  }
  func.func @transform_2(%arg0: i32) -> (i32, i32) {
    %c0_i32 = arith.constant 0 : i32
    %c0_i32_0 = arith.constant 0 : i32
    %c0_i32_1 = arith.constant 0 : i32
    return %c0_i32, %c0_i32_0 : i32, i32
  }
  func.func @transform_3(%arg0: i32) -> (i32, i32) {
    %c0_i32 = arith.constant 0 : i32
    %c0_i32_0 = arith.constant 0 : i32
    %c0_i32_1 = arith.constant 0 : i32
    return %c0_i32, %c0_i32_0 : i32, i32
  }
  func.func @transform_4(%arg0: i32) -> (i32, i32) {
    %c0_i32 = arith.constant 0 : i32
    %c0_i32_0 = arith.constant 0 : i32
    %c0_i32_1 = arith.constant 0 : i32
    return %c0_i32, %c0_i32_0 : i32, i32
  }
  func.func @transform_5(%arg0: i32) -> (i32, i32) {
    %c0_i32 = arith.constant 0 : i32
    %c0_i32_0 = arith.constant 0 : i32
    return %arg0, %c0_i32 : i32, i32
  }
  func.func @transform_6(%arg0: i32) -> (i32, i32) {
    %c0_i32 = arith.constant 0 : i32
    %c0_i32_0 = arith.constant 0 : i32
    return %arg0, %c0_i32 : i32, i32
  }
}

module attributes {stable_mosaic.version = 11 : i64} {
  func.func @kernel(%arg0: i32, %arg1: memref<512x288xf32, #tpu.memory_space<vmem>>, %arg2: memref<288x128xf32, #tpu.memory_space<vmem>>, %arg3: memref<1x128xf32, #tpu.memory_space<vmem>>, %arg4: memref<512x128xf32, #tpu.memory_space<vmem>>, %arg5: memref<512x128xf32, #tpu.memory_space<vmem>>) attributes {dimension_semantics = [#tpu.dimension_semantics<parallel>], iteration_bounds = array<i64: 1>, scalar_prefetch = 0 : i64, scratch_operands = 0 : i64, tpu.core_type = #tpu.core_type<tc>, window_params = [{transform_indices = @transform_0, window_bounds = array<i64: 512, 288>}, {pipeline_mode = #tpu.pipeline_mode<synchronous>, transform_indices = @transform_1, window_bounds = array<i64: 288, 128>}, {pipeline_mode = #tpu.pipeline_mode<synchronous>, transform_indices = @transform_2, window_bounds = array<i64: 1, 128>}, {transform_indices = @transform_3, window_bounds = array<i64: 512, 128>}, {transform_indices = @transform_4, window_bounds = array<i64: 512, 128>}]} {
    %c0 = arith.constant 0 : index
    %c0_0 = arith.constant 0 : index
    %0 = vector.load %arg1[%c0, %c0_0] : memref<512x288xf32, #tpu.memory_space<vmem>>, vector<512x288xf32>
    %c0_1 = arith.constant 0 : index
    %c0_2 = arith.constant 0 : index
    %1 = vector.load %arg2[%c0_1, %c0_2] : memref<288x128xf32, #tpu.memory_space<vmem>>, vector<288x128xf32>
    %cst = arith.constant dense<0.000000e+00> : vector<512x128xf32>
    %2 = tpu.matmul %0, %1, %cst {dimension_numbers = #tpu.dot_dimension_numbers<[1], [0], [0], [1], [0, 0, 1, 1], [], []>} : vector<512x288xf32>, vector<288x128xf32>, vector<512x128xf32> -> vector<512x128xf32>
    %c0_3 = arith.constant 0 : index
    %c0_4 = arith.constant 0 : index
    %3 = vector.load %arg3[%c0_3, %c0_4] : memref<1x128xf32, #tpu.memory_space<vmem>>, vector<1x128xf32>
    %4 = vector.broadcast %3 : vector<1x128xf32> to vector<512x128xf32>
    %5 = arith.addf %2, %4 : vector<512x128xf32>
    %cst_5 = arith.constant 0.000000e+00 : f32
    %6 = vector.broadcast %cst_5 : f32 to vector<512x128xf32>
    %7 = arith.maximumf %5, %6 : vector<512x128xf32>
    %8 = tpu.iota {dimensions = array<i32: 1>} : vector<512x128xi32>
    %c96_i32 = arith.constant 96 : i32
    %9 = vector.broadcast %c96_i32 : i32 to vector<512x128xi32>
    %10 = arith.cmpi slt, %8, %9 : vector<512x128xi32>
    %c0_6 = arith.constant 0 : index
    %c0_7 = arith.constant 0 : index
    %11 = vector.load %arg4[%c0_6, %c0_7] : memref<512x128xf32, #tpu.memory_space<vmem>>, vector<512x128xf32>
    %12 = arith.select %10, %11, %7 : vector<512x128xi1>, vector<512x128xf32>
    %c0_8 = arith.constant 0 : index
    %c0_9 = arith.constant 0 : index
    %13 = vector.load %arg5[%c0_8, %c0_9] : memref<512x128xf32, #tpu.memory_space<vmem>>, vector<512x128xf32>
    tpu.vector_store %arg5[%c0_8, %c0_9], %12 {strides = array<i32>} : memref<512x128xf32, #tpu.memory_space<vmem>>, vector<512x128xf32>,
    return
  }
  func.func @transform_0(%arg0: i32) -> (i32, i32) {
    %c0_i32 = arith.constant 0 : i32
    %c0_i32_0 = arith.constant 0 : i32
    return %arg0, %c0_i32 : i32, i32
  }
  func.func @transform_1(%arg0: i32) -> (i32, i32) {
    %c0_i32 = arith.constant 0 : i32
    %c0_i32_0 = arith.constant 0 : i32
    %c0_i32_1 = arith.constant 0 : i32
    return %c0_i32, %c0_i32_0 : i32, i32
  }
  func.func @transform_2(%arg0: i32) -> (i32, i32) {
    %c0_i32 = arith.constant 0 : i32
    %c0_i32_0 = arith.constant 0 : i32
    %c0_i32_1 = arith.constant 0 : i32
    return %c0_i32, %c0_i32_0 : i32, i32
  }
  func.func @transform_3(%arg0: i32) -> (i32, i32) {
    %c0_i32 = arith.constant 0 : i32
    %c0_i32_0 = arith.constant 0 : i32
    return %arg0, %c0_i32 : i32, i32
  }
  func.func @transform_4(%arg0: i32) -> (i32, i32) {
    %c0_i32 = arith.constant 0 : i32
    %c0_i32_0 = arith.constant 0 : i32
    return %arg0, %c0_i32 : i32, i32
  }
}

</mosaic_0001>

<bundles_post_ra>
// kernel: inception_forward.3
= control target key start
LH: loop header
LB: loop body
LE: loop exit
PB: predicated region body
PF: predicated region fallthrough
CT: control target
= control target key end

     0   :  { %s2469_s3 = inlined_call_operand.vmem [shape: f32[128,128], index: 3, kind: input, shape index: {}]   ;;  %s2470_s2 = inlined_call_operand.vmem [shape: f32[128,128], index: 2, kind: input, shape index: {}]   ;;  %s2471_s1 = inlined_call_operand.vmem [shape: f32[512,128], index: 1, kind: input, shape index: {}]   ;;  %s2472_s0 = inlined_call_operand.vmem [shape: f32[512,128], index: 0, kind: input, shape index: {}]   ;;  %s2473_s4 = inlined_call_operand.vmem [shape: f32[1,128], index: 4, kind: input, shape index: {}]   ;;  %s2474_s5 = inlined_call_operand.vmem [shape: f32[512,128], index: 5, kind: output, shape index: {}]  }
   0x1   :  { %v164_v0 = vld [vmem:[%s2469_s3] sm:$0xff]  ;;  %v165_v1 = vld [vmem:[%s2469_s3 + $0x8] sm:$0xff]  ;;  %v166_v5 = vld [vmem:[%s2469_s3 + $0x10] sm:$0xff] }
   0x2   :  { %v84_v2 = vld [vmem:[%s2470_s2] sm:$0xff]  ;;  %v1570_v3 = vpack.c.bf16 %v165_v1, %v164_v0  ;;  %v85_v4 = vld [vmem:[%s2470_s2 + $0x8] sm:$0xff]  ;;  %v167_v6 = vld [vmem:[%s2469_s3 + $0x18] sm:$0xff] }
   0x3   :  { %v1602_v7 = vpack.c.bf16 %v85_v4, %v84_v2  ;;  %v1574_v8 = vpack.c.bf16 %v167_v6, %v166_v5  ;;  %v86_v9 = vld [vmem:[%s2470_s2 + $0x10] sm:$0xff]  ;;  %v87_v10 = vld [vmem:[%s2470_s2 + $0x18] sm:$0xff]  ;;  %v168_v11 = vld [vmem:[%s2469_s3 + $0x20] sm:$0xff] }
   0x4   :  { %1571 = vmatprep.subr.bf16.mxu1 %v1570_v3  ;;  %v1606_v12 = vpack.c.bf16 %v87_v10, %v86_v9  ;;  %v169_v13 = vld [vmem:[%s2469_s3 + $0x28] sm:$0xff]  ;;  %v88_v14 = vld [vmem:[%s2470_s2 + $0x20] sm:$0xff]  ;;  %v170_v18 = vld [vmem:[%s2469_s3 + $0x30] sm:$0xff] }
   0x5   :  { %v89_v15 = vld [vmem:[%s2470_s2 + $0x28] sm:$0xff]  ;;  %1603 = vmatprep.subr.bf16.mxu0 %v1602_v7  ;;  %1573 = vmatpush3.bf16.msra.mxu1 %v1570_v3  ;;  %v1578_v16 = vpack.c.bf16 %v169_v13, %v168_v11  ;;  %v171_v19 = vld [vmem:[%s2469_s3 + $0x38] sm:$0xff]  ;;  %v90_v20 = vld [vmem:[%s2470_s2 + $0x30] sm:$0xff] }
   0x6   :  { %1605 = vmatpush3.bf16.msra.mxu0 %v1602_v7  ;;  %1575 = vmatprep.subr.bf16.mxu1 %v1574_v8  ;;  %v1610_v17 = vpack.c.bf16 %v89_v15, %v88_v14  ;;  %v91_v21 = vld [vmem:[%s2470_s2 + $0x38] sm:$0xff]  ;;  %v1582_v22 = vpack.c.bf16 %v171_v19, %v170_v18  ;;  %v172_v24 = vld [vmem:[%s2469_s3 + $0x40] sm:$0xff]  ;;  %v173_v25 = vld [vmem:[%s2469_s3 + $0x48] sm:$0xff] }
   0x7   :  { %1607 = vmatprep.subr.bf16.mxu0 %v1606_v12  ;;  %v1614_v23 = vpack.c.bf16 %v91_v21, %v90_v20  ;;  %v100_v26 = vld [vmem:[%s2471_s1] sm:$0xff]  ;;  %v93_v28 = vld [vmem:[%s2470_s2 + $0x48] sm:$0xff]  ;;  %v1586_v30 = vpack.c.bf16 %v173_v25, %v172_v24  ;;  %v174_v32 = vld [vmem:[%s2469_s3 + $0x50] sm:$0xff] }
   0x8   :  { %v92_v27 = vld [vmem:[%s2470_s2 + $0x40] sm:$0xff]  ;;  %1346 = vmatprep.mubr.f32.mxu1 %v100_v26  ;;  %v175_v33 = vld [vmem:[%s2469_s3 + $0x58] sm:$0xff]  ;;  %v94_v34 = vld [vmem:[%s2470_s2 + $0x50] sm:$0xff] }
   0x9   :  { %1577 = vmatpush3.bf16.msra.mxu1 %v1574_v8  ;;  %v20_v29 = vld [vmem:[%s2472_s0] sm:$0xff]  ;;  %v1618_v31 = vpack.c.bf16 %v93_v28, %v92_v27  ;;  %v95_v35 = vld [vmem:[%s2470_s2 + $0x58] sm:$0xff]  ;;  %v1590_v36 = vpack.c.bf16 %v175_v33, %v174_v32  ;;  %v177_v39 = vld [vmem:[%s2469_s3 + $0x68] sm:$0xff] }
   0xa   :  { %1609 = vmatpush3.bf16.msra.mxu0 %v1606_v12  ;;  %1579 = vmatprep.subr.bf16.mxu1 %v1578_v16  ;;  %v1622_v37 = vpack.c.bf16 %v95_v35, %v94_v34  ;;  %v176_v38 = vld [vmem:[%s2469_s3 + $0x60] sm:$0xff]  ;;  %v97_v41 = vld [vmem:[%s2470_s2 + $0x68] sm:$0xff]  ;;  %v178_v44 = vld [vmem:[%s2469_s3 + $0x70] sm:$0xff] }
   0xb   :  { %1611 = vmatprep.subr.bf16.mxu0 %v1610_v17  ;;  %1474 = vmatprep.mubr.f32.mxu0 %v20_v29  ;;  %v96_v40 = vld [vmem:[%s2470_s2 + $0x60] sm:$0xff]  ;;  %v1594_v42 = vpack.c.bf16 %v177_v39, %v176_v38  ;;  %v179_v45 = vld [vmem:[%s2469_s3 + $0x78] sm:$0xff]  ;;  %v98_v46 = vld [vmem:[%s2470_s2 + $0x70] sm:$0xff] }
   0xc   :  { %v1626_v43 = vpack.c.bf16 %v97_v41, %v96_v40  ;;  %v99_v47 = vld [vmem:[%s2470_s2 + $0x78] sm:$0xff]  ;;  %v1598_v48 = vpack.c.bf16 %v179_v45, %v178_v44  ;;  %v101_v50 = vld [vmem:[%s2471_s1 + $0x8] sm:$0xff]  ;;  %v102_v52 = vld [vmem:[%s2471_s1 + $0x10] sm:$0xff] }
   0xd   :  { %1581 = vmatpush3.bf16.msra.mxu1 %v1578_v16  ;;  %v1630_v49 = vpack.c.bf16 %v99_v47, %v98_v46  ;;  %v21_v51 = vld [vmem:[%s2472_s0 + $0x8] sm:$0xff]  ;;  %v22_v53 = vld [vmem:[%s2472_s0 + $0x10] sm:$0xff]  ;;  %v103_v54 = vld [vmem:[%s2471_s1 + $0x18] sm:$0xff] }
   0xe   :  { %1613 = vmatpush3.bf16.msra.mxu0 %v1610_v17  ;;  %1583 = vmatprep.subr.bf16.mxu1 %v1582_v22  ;;  %v23_v55 = vld [vmem:[%s2472_s0 + $0x18] sm:$0xff]  ;;  %v104_v56 = vld [vmem:[%s2471_s1 + $0x20] sm:$0xff]  ;;  %v105_v58 = vld [vmem:[%s2471_s1 + $0x28] sm:$0xff] }
   0xf   :  { %1615 = vmatprep.subr.bf16.mxu0 %v1614_v23  ;;  %v24_v57 = vld [vmem:[%s2472_s0 + $0x20] sm:$0xff]  ;;  %v25_v59 = vld [vmem:[%s2472_s0 + $0x28] sm:$0xff]  ;;  %v106_v60 = vld [vmem:[%s2471_s1 + $0x30] sm:$0xff] }
  0x10   :  { %v26_v61 = vld [vmem:[%s2472_s0 + $0x30] sm:$0xff]  ;;  %v107_v62 = vld [vmem:[%s2471_s1 + $0x38] sm:$0xff]  ;;  %v108_v0 = vld [vmem:[%s2471_s1 + $0x40] sm:$0xff] }
  0x11   :  { %1585 = vmatpush3.bf16.msra.mxu1 %v1582_v22  ;;  %v27_v63 = vld [vmem:[%s2472_s0 + $0x38] sm:$0xff]  ;;  %v28_v1 = vld [vmem:[%s2472_s0 + $0x40] sm:$0xff]  ;;  %v109_v2 = vld [vmem:[%s2471_s1 + $0x48] sm:$0xff] }
  0x12   :  { %1617 = vmatpush3.bf16.msra.mxu0 %v1614_v23  ;;  %1587 = vmatprep.subr.bf16.mxu1 %v1586_v30  ;;  %v29_v3 = vld [vmem:[%s2472_s0 + $0x48] sm:$0xff]  ;;  %v110_v4 = vld [vmem:[%s2471_s1 + $0x50] sm:$0xff]  ;;  %v111_v6 = vld [vmem:[%s2471_s1 + $0x58] sm:$0xff] }
  0x13   :  { %1619 = vmatprep.subr.bf16.mxu0 %v1618_v31  ;;  %v30_v5 = vld [vmem:[%s2472_s0 + $0x50] sm:$0xff]  ;;  %v31_v7 = vld [vmem:[%s2472_s0 + $0x58] sm:$0xff]  ;;  %v112_v8 = vld [vmem:[%s2471_s1 + $0x60] sm:$0xff] }
  0x14   :  { %v32_v9 = vld [vmem:[%s2472_s0 + $0x60] sm:$0xff]  ;;  %v113_v10 = vld [vmem:[%s2471_s1 + $0x68] sm:$0xff]  ;;  %v114_v12 = vld [vmem:[%s2471_s1 + $0x70] sm:$0xff] }
  0x15   :  { %1589 = vmatpush3.bf16.msra.mxu1 %v1586_v30  ;;  %v33_v11 = vld [vmem:[%s2472_s0 + $0x68] sm:$0xff]  ;;  %v34_v13 = vld [vmem:[%s2472_s0 + $0x70] sm:$0xff]  ;;  %v115_v14 = vld [vmem:[%s2471_s1 + $0x78] sm:$0xff] }
  0x16   :  { %1621 = vmatpush3.bf16.msra.mxu0 %v1618_v31  ;;  %1591 = vmatprep.subr.bf16.mxu1 %v1590_v36  ;;  %v35_v15 = vld [vmem:[%s2472_s0 + $0x78] sm:$0xff]  ;;  %v116_v16 = vld [vmem:[%s2471_s1 + $0x80] sm:$0xff]  ;;  %v117_v18 = vld [vmem:[%s2471_s1 + $0x88] sm:$0xff] }
  0x17   :  { %1623 = vmatprep.subr.bf16.mxu0 %v1622_v37  ;;  %v36_v17 = vld [vmem:[%s2472_s0 + $0x80] sm:$0xff]  ;;  %v37_v19 = vld [vmem:[%s2472_s0 + $0x88] sm:$0xff]  ;;  %v118_v20 = vld [vmem:[%s2471_s1 + $0x90] sm:$0xff] }
  0x18   :  { %v38_v21 = vld [vmem:[%s2472_s0 + $0x90] sm:$0xff]  ;;  %v119_v22 = vld [vmem:[%s2471_s1 + $0x98] sm:$0xff]  ;;  %v120_v24 = vld [vmem:[%s2471_s1 + $0xa0] sm:$0xff] }
  0x19   :  { %1593 = vmatpush3.bf16.msra.mxu1 %v1590_v36  ;;  %v39_v23 = vld [vmem:[%s2472_s0 + $0x98] sm:$0xff]  ;;  %v40_v25 = vld [vmem:[%s2472_s0 + $0xa0] sm:$0xff]  ;;  %v121_v26 = vld [vmem:[%s2471_s1 + $0xa8] sm:$0xff] }
  0x1a   :  { %1625 = vmatpush3.bf16.msra.mxu0 %v1622_v37  ;;  %1595 = vmatprep.subr.bf16.mxu1 %v1594_v42  ;;  %v41_v27 = vld [vmem:[%s2472_s0 + $0xa8] sm:$0xff]  ;;  %v122_v28 = vld [vmem:[%s2471_s1 + $0xb0] sm:$0xff]  ;;  %v123_v30 = vld [vmem:[%s2471_s1 + $0xb8] sm:$0xff] }
  0x1b   :  { %1627 = vmatprep.subr.bf16.mxu0 %v1626_v43  ;;  %v42_v29 = vld [vmem:[%s2472_s0 + $0xb0] sm:$0xff]  ;;  %v43_v31 = vld [vmem:[%s2472_s0 + $0xb8] sm:$0xff]  ;;  %v124_v32 = vld [vmem:[%s2471_s1 + $0xc0] sm:$0xff] }
  0x1c   :  { %v44_v33 = vld [vmem:[%s2472_s0 + $0xc0] sm:$0xff]  ;;  %v125_v34 = vld [vmem:[%s2471_s1 + $0xc8] sm:$0xff]  ;;  %v126_v36 = vld [vmem:[%s2471_s1 + $0xd0] sm:$0xff] }
  0x1d   :  { %1597 = vmatpush3.bf16.msra.mxu1 %v1594_v42  ;;  %v45_v35 = vld [vmem:[%s2472_s0 + $0xc8] sm:$0xff]  ;;  %v46_v37 = vld [vmem:[%s2472_s0 + $0xd0] sm:$0xff]  ;;  %v127_v38 = vld [vmem:[%s2471_s1 + $0xd8] sm:$0xff] }
  0x1e   :  { %1629 = vmatpush3.bf16.msra.mxu0 %v1626_v43  ;;  %1599 = vmatprep.subr.bf16.mxu1 %v1598_v48  ;;  %v47_v39 = vld [vmem:[%s2472_s0 + $0xd8] sm:$0xff]  ;;  %v128_v40 = vld [vmem:[%s2471_s1 + $0xe0] sm:$0xff]  ;;  %v129_v42 = vld [vmem:[%s2471_s1 + $0xe8] sm:$0xff] }
  0x1f   :  { %1631 = vmatprep.subr.bf16.mxu0 %v1630_v49  ;;  %v48_v41 = vld [vmem:[%s2472_s0 + $0xe0] sm:$0xff]  ;;  %v49_v43 = vld [vmem:[%s2472_s0 + $0xe8] sm:$0xff]  ;;  %v130_v44 = vld [vmem:[%s2471_s1 + $0xf0] sm:$0xff] }
  0x20   :  { %v50_v45 = vld [vmem:[%s2472_s0 + $0xf0] sm:$0xff]  ;;  %v131_v46 = vld [vmem:[%s2471_s1 + $0xf8] sm:$0xff] }
  0x21   :  { %1601 = vmatpush3.bf16.msra.mxu1 %v1598_v48  ;;  %v51_v47 = vld [vmem:[%s2472_s0 + $0xf8] sm:$0xff]  ;;  %v132_v48 = vld [vmem:[%s2471_s1 + $0x100] sm:$0xff] }
  0x22   :  { %1633 = vmatpush3.bf16.msra.mxu0 %v1630_v49  ;;  %v52_v49 = vld [vmem:[%s2472_s0 + $0x100] sm:$0xff] }
  0x24   :  { %1347 = vmatmul.mubr.f32.vlgmr.msra.gmra.mrb[0].mxu1 %v101_v50  ;;  %v133_v50 = vld [vmem:[%s2471_s1 + $0x108] sm:$0xff] }
  0x25   :  { %1475 = vmatmul.mubr.f32.vlgmr.msra.gmra.mrb[0].mxu0 %v21_v51  ;;  %1349 = vmatprep.mubr.f32.mxu1 %v102_v52  ;;  %v53_v51 = vld [vmem:[%s2472_s0 + $0x108] sm:$0xff]  ;;  %v134_v52 = vld [vmem:[%s2471_s1 + $0x110] sm:$0xff] }
  0x26   :  { %1477 = vmatprep.mubr.f32.mxu0 %v22_v53  ;;  %v54_v53 = vld [vmem:[%s2472_s0 + $0x110] sm:$0xff] }
  0x28   :  { %1350 = vmatmul.mubr.f32.gmra.mrb[2].mxu1 %v103_v54  ;;  %v135_v54 = vld [vmem:[%s2471_s1 + $0x118] sm:$0xff] }
  0x29   :  { %1478 = vmatmul.mubr.f32.gmra.mrb[2].mxu0 %v23_v55  ;;  %1352 = vmatprep.mubr.f32.mxu1 %v104_v56  ;;  %v55_v55 = vld [vmem:[%s2472_s0 + $0x118] sm:$0xff]  ;;  %v136_v56 = vld [vmem:[%s2471_s1 + $0x120] sm:$0xff] }
  0x2a   :  { %1480 = vmatprep.mubr.f32.mxu0 %v24_v57  ;;  %v56_v57 = vld [vmem:[%s2472_s0 + $0x120] sm:$0xff] }
  0x2c   :  { %1353 = vmatmul.mubr.f32.gmra.mrb[4].mxu1 %v105_v58  ;;  %v137_v58 = vld [vmem:[%s2471_s1 + $0x128] sm:$0xff] }
  0x2d   :  { %1481 = vmatmul.mubr.f32.gmra.mrb[4].mxu0 %v25_v59  ;;  %1355 = vmatprep.mubr.f32.mxu1 %v106_v60  ;;  %v57_v59 = vld [vmem:[%s2472_s0 + $0x128] sm:$0xff]  ;;  %v138_v60 = vld [vmem:[%s2471_s1 + $0x130] sm:$0xff] }
  0x2e   :  { %1483 = vmatprep.mubr.f32.mxu0 %v26_v61  ;;  %v58_v61 = vld [vmem:[%s2472_s0 + $0x130] sm:$0xff] }
  0x30   :  { %1356 = vmatmul.mubr.f32.gmra.mrb[6].mxu1 %v107_v62  ;;  %v139_v62 = vld [vmem:[%s2471_s1 + $0x138] sm:$0xff] }
  0x31   :  { %1484 = vmatmul.mubr.f32.gmra.mrb[6].mxu0 %v27_v63  ;;  %1358 = vmatprep.mubr.f32.mxu1 %v108_v0  ;;  %v59_v63 = vld [vmem:[%s2472_s0 + $0x138] sm:$0xff]  ;;  %v140_v0 = vld [vmem:[%s2471_s1 + $0x140] sm:$0xff] }
  0x32   :  { %1486 = vmatprep.mubr.f32.mxu0 %v28_v1  ;;  %v60_v1 = vld [vmem:[%s2472_s0 + $0x140] sm:$0xff] }
  0x34   :  { %1359 = vmatmul.mubr.f32.gmra.mrb[8].mxu1 %v109_v2  ;;  %v141_v2 = vld [vmem:[%s2471_s1 + $0x148] sm:$0xff] }
  0x35   :  { %1487 = vmatmul.mubr.f32.gmra.mrb[8].mxu0 %v29_v3  ;;  %1361 = vmatprep.mubr.f32.mxu1 %v110_v4  ;;  %v61_v3 = vld [vmem:[%s2472_s0 + $0x148] sm:$0xff]  ;;  %v142_v4 = vld [vmem:[%s2471_s1 + $0x150] sm:$0xff] }
  0x36   :  { %1489 = vmatprep.mubr.f32.mxu0 %v30_v5  ;;  %v62_v5 = vld [vmem:[%s2472_s0 + $0x150] sm:$0xff] }
  0x38   :  { %1362 = vmatmul.mubr.f32.gmra.mrb[10].mxu1 %v111_v6  ;;  %v143_v6 = vld [vmem:[%s2471_s1 + $0x158] sm:$0xff] }
  0x39   :  { %1490 = vmatmul.mubr.f32.gmra.mrb[10].mxu0 %v31_v7  ;;  %1364 = vmatprep.mubr.f32.mxu1 %v112_v8  ;;  %v63_v7 = vld [vmem:[%s2472_s0 + $0x158] sm:$0xff]  ;;  %v144_v8 = vld [vmem:[%s2471_s1 + $0x160] sm:$0xff] }
  0x3a   :  { %1492 = vmatprep.mubr.f32.mxu0 %v32_v9  ;;  %v64_v9 = vld [vmem:[%s2472_s0 + $0x160] sm:$0xff] }
  0x3c   :  { %1365 = vmatmul.mubr.f32.gmra.mrb[12].mxu1 %v113_v10  ;;  %v145_v10 = vld [vmem:[%s2471_s1 + $0x168] sm:$0xff] }
  0x3d   :  { %1493 = vmatmul.mubr.f32.gmra.mrb[12].mxu0 %v33_v11  ;;  %1367 = vmatprep.mubr.f32.mxu1 %v114_v12  ;;  %v65_v11 = vld [vmem:[%s2472_s0 + $0x168] sm:$0xff]  ;;  %v146_v12 = vld [vmem:[%s2471_s1 + $0x170] sm:$0xff] }
  0x3e   :  { %1495 = vmatprep.mubr.f32.mxu0 %v34_v13  ;;  %v66_v13 = vld [vmem:[%s2472_s0 + $0x170] sm:$0xff] }
  0x40   :  { %1368 = vmatmul.mubr.f32.gmra.mrb[14].mxu1 %v115_v14  ;;  %v147_v14 = vld [vmem:[%s2471_s1 + $0x178] sm:$0xff] }
  0x41   :  { %1496 = vmatmul.mubr.f32.gmra.mrb[14].mxu0 %v35_v15  ;;  %1370 = vmatprep.mubr.f32.mxu1 %v116_v16  ;;  %v67_v15 = vld [vmem:[%s2472_s0 + $0x178] sm:$0xff]  ;;  %v148_v16 = vld [vmem:[%s2471_s1 + $0x180] sm:$0xff] }
  0x42   :  { %1498 = vmatprep.mubr.f32.mxu0 %v36_v17  ;;  %v68_v17 = vld [vmem:[%s2472_s0 + $0x180] sm:$0xff] }
  0x44   :  { %1371 = vmatmul.mubr.f32.gmra.mrb[16].mxu1 %v117_v18  ;;  %v149_v18 = vld [vmem:[%s2471_s1 + $0x188] sm:$0xff] }
  0x45   :  { %1499 = vmatmul.mubr.f32.gmra.mrb[16].mxu0 %v37_v19  ;;  %1373 = vmatprep.mubr.f32.mxu1 %v118_v20  ;;  %v69_v19 = vld [vmem:[%s2472_s0 + $0x188] sm:$0xff]  ;;  %v150_v20 = vld [vmem:[%s2471_s1 + $0x190] sm:$0xff] }
  0x46   :  { %1501 = vmatprep.mubr.f32.mxu0 %v38_v21  ;;  %v70_v21 = vld [vmem:[%s2472_s0 + $0x190] sm:$0xff] }
  0x48   :  { %1374 = vmatmul.mubr.f32.gmra.mrb[18].mxu1 %v119_v22  ;;  %v151_v22 = vld [vmem:[%s2471_s1 + $0x198] sm:$0xff] }
  0x49   :  { %1502 = vmatmul.mubr.f32.gmra.mrb[18].mxu0 %v39_v23  ;;  %1376 = vmatprep.mubr.f32.mxu1 %v120_v24  ;;  %v71_v23 = vld [vmem:[%s2472_s0 + $0x198] sm:$0xff]  ;;  %v152_v24 = vld [vmem:[%s2471_s1 + $0x1a0] sm:$0xff] }
  0x4a   :  { %1504 = vmatprep.mubr.f32.mxu0 %v40_v25  ;;  %v72_v25 = vld [vmem:[%s2472_s0 + $0x1a0] sm:$0xff] }
  0x4c   :  { %1377 = vmatmul.mubr.f32.gmra.mrb[20].mxu1 %v121_v26  ;;  %v153_v26 = vld [vmem:[%s2471_s1 + $0x1a8] sm:$0xff] }
  0x4d   :  { %1505 = vmatmul.mubr.f32.gmra.mrb[20].mxu0 %v41_v27  ;;  %1379 = vmatprep.mubr.f32.mxu1 %v122_v28  ;;  %v73_v27 = vld [vmem:[%s2472_s0 + $0x1a8] sm:$0xff]  ;;  %v154_v28 = vld [vmem:[%s2471_s1 + $0x1b0] sm:$0xff] }
  0x4e   :  { %1507 = vmatprep.mubr.f32.mxu0 %v42_v29  ;;  %v74_v29 = vld [vmem:[%s2472_s0 + $0x1b0] sm:$0xff] }
  0x50   :  { %1380 = vmatmul.mubr.f32.gmra.mrb[22].mxu1 %v123_v30  ;;  %v155_v30 = vld [vmem:[%s2471_s1 + $0x1b8] sm:$0xff] }
  0x51   :  { %1508 = vmatmul.mubr.f32.gmra.mrb[22].mxu0 %v43_v31  ;;  %1382 = vmatprep.mubr.f32.mxu1 %v124_v32  ;;  %v75_v31 = vld [vmem:[%s2472_s0 + $0x1b8] sm:$0xff]  ;;  %v156_v32 = vld [vmem:[%s2471_s1 + $0x1c0] sm:$0xff] }
  0x52   :  { %1510 = vmatprep.mubr.f32.mxu0 %v44_v33  ;;  %v76_v33 = vld [vmem:[%s2472_s0 + $0x1c0] sm:$0xff] }
  0x54   :  { %1383 = vmatmul.mubr.f32.gmra.mrb[24].mxu1 %v125_v34  ;;  %v157_v34 = vld [vmem:[%s2471_s1 + $0x1c8] sm:$0xff] }
  0x55   :  { %1511 = vmatmul.mubr.f32.gmra.mrb[24].mxu0 %v45_v35  ;;  %1385 = vmatprep.mubr.f32.mxu1 %v126_v36  ;;  %v77_v35 = vld [vmem:[%s2472_s0 + $0x1c8] sm:$0xff]  ;;  %v158_v36 = vld [vmem:[%s2471_s1 + $0x1d0] sm:$0xff] }
  0x56   :  { %1513 = vmatprep.mubr.f32.mxu0 %v46_v37  ;;  %v78_v37 = vld [vmem:[%s2472_s0 + $0x1d0] sm:$0xff] }
  0x58   :  { %1386 = vmatmul.mubr.f32.gmra.mrb[26].mxu1 %v127_v38  ;;  %v159_v38 = vld [vmem:[%s2471_s1 + $0x1d8] sm:$0xff] }
  0x59   :  { %1514 = vmatmul.mubr.f32.gmra.mrb[26].mxu0 %v47_v39  ;;  %1388 = vmatprep.mubr.f32.mxu1 %v128_v40  ;;  %v79_v39 = vld [vmem:[%s2472_s0 + $0x1d8] sm:$0xff]  ;;  %v160_v40 = vld [vmem:[%s2471_s1 + $0x1e0] sm:$0xff] }
  0x5a   :  { %1516 = vmatprep.mubr.f32.mxu0 %v48_v41  ;;  %v80_v41 = vld [vmem:[%s2472_s0 + $0x1e0] sm:$0xff] }
  0x5c   :  { %1389 = vmatmul.mubr.f32.gmra.mrb[28].mxu1 %v129_v42  ;;  %v161_v42 = vld [vmem:[%s2471_s1 + $0x1e8] sm:$0xff] }
  0x5d   :  { %1517 = vmatmul.mubr.f32.gmra.mrb[28].mxu0 %v49_v43  ;;  %1391 = vmatprep.mubr.f32.mxu1 %v130_v44  ;;  %v81_v43 = vld [vmem:[%s2472_s0 + $0x1e8] sm:$0xff]  ;;  %v162_v44 = vld [vmem:[%s2471_s1 + $0x1f0] sm:$0xff] }
  0x5e   :  { %1519 = vmatprep.mubr.f32.mxu0 %v50_v45  ;;  %v82_v45 = vld [vmem:[%s2472_s0 + $0x1f0] sm:$0xff] }
  0x60   :  { %1392 = vmatmul.mubr.f32.gmra.mrb[30].mxu1 %v131_v46  ;;  %v163_v46 = vld [vmem:[%s2471_s1 + $0x1f8] sm:$0xff] }
  0x61   :  { %1520 = vmatmul.mubr.f32.gmra.mrb[30].mxu0 %v51_v47  ;;  %1394 = vmatprep.mubr.f32.mxu1 %v132_v48  ;;  %v83_v47 = vld [vmem:[%s2472_s0 + $0x1f8] sm:$0xff] }
  0x62   :  { %1522 = vmatprep.mubr.f32.mxu0 %v52_v49 }
  0x64   :  { %1395 = vmatmul.mubr.f32.gmra.mrb[32].mxu1 %v133_v50  ;;  %v2211_v50 = vld [vmem:[%s2473_s4] ss:$0 sm:$0xff] }
  0x65   :  { %1523 = vmatmul.mubr.f32.gmra.mrb[32].mxu0 %v53_v51  ;;  %1397 = vmatprep.mubr.f32.mxu1 %v134_v52 }
  0x66   :  { %1525 = vmatprep.mubr.f32.mxu0 %v54_v53 }
  0x68   :  { %1398 = vmatmul.mubr.f32.gmra.mrb[34].mxu1 %v135_v54 }
  0x69   :  { %1526 = vmatmul.mubr.f32.gmra.mrb[34].mxu0 %v55_v55  ;;  %1400 = vmatprep.mubr.f32.mxu1 %v136_v56 }
  0x6a   :  { %1528 = vmatprep.mubr.f32.mxu0 %v56_v57 }
  0x6c   :  { %1401 = vmatmul.mubr.f32.gmra.mrb[36].mxu1 %v137_v58 }
  0x6d   :  { %1529 = vmatmul.mubr.f32.gmra.mrb[36].mxu0 %v57_v59  ;;  %1403 = vmatprep.mubr.f32.mxu1 %v138_v60 }
  0x6e   :  { %1531 = vmatprep.mubr.f32.mxu0 %v58_v61 }
  0x70   :  { %1404 = vmatmul.mubr.f32.gmra.mrb[38].mxu1 %v139_v62 }
  0x71   :  { %1532 = vmatmul.mubr.f32.gmra.mrb[38].mxu0 %v59_v63  ;;  %1406 = vmatprep.mubr.f32.mxu1 %v140_v0 }
  0x72   :  { %1534 = vmatprep.mubr.f32.mxu0 %v60_v1 }
  0x74   :  { %1407 = vmatmul.mubr.f32.gmra.mrb[40].mxu1 %v141_v2 }
  0x75   :  { %1535 = vmatmul.mubr.f32.gmra.mrb[40].mxu0 %v61_v3  ;;  %1409 = vmatprep.mubr.f32.mxu1 %v142_v4 }
  0x76   :  { %1537 = vmatprep.mubr.f32.mxu0 %v62_v5 }
  0x78   :  { %1410 = vmatmul.mubr.f32.gmra.mrb[42].mxu1 %v143_v6 }
  0x79   :  { %1538 = vmatmul.mubr.f32.gmra.mrb[42].mxu0 %v63_v7  ;;  %1412 = vmatprep.mubr.f32.mxu1 %v144_v8 }
  0x7a   :  { %1540 = vmatprep.mubr.f32.mxu0 %v64_v9 }
  0x7c   :  { %1413 = vmatmul.mubr.f32.gmra.mrb[44].mxu1 %v145_v10 }
  0x7d   :  { %1541 = vmatmul.mubr.f32.gmra.mrb[44].mxu0 %v65_v11  ;;  %1415 = vmatprep.mubr.f32.mxu1 %v146_v12 }
  0x7e   :  { %1543 = vmatprep.mubr.f32.mxu0 %v66_v13 }
  0x80   :  { %1416 = vmatmul.mubr.f32.gmra.mrb[46].mxu1 %v147_v14 }
  0x81   :  { %1544 = vmatmul.mubr.f32.gmra.mrb[46].mxu0 %v67_v15  ;;  %1418 = vmatprep.mubr.f32.mxu1 %v148_v16 }
  0x82   :  { %1546 = vmatprep.mubr.f32.mxu0 %v68_v17 }
  0x84   :  { %1419 = vmatmul.mubr.f32.gmra.mrb[48].mxu1 %v149_v18 }
  0x85   :  { %1547 = vmatmul.mubr.f32.gmra.mrb[48].mxu0 %v69_v19  ;;  %1421 = vmatprep.mubr.f32.mxu1 %v150_v20 }
  0x86   :  { %1549 = vmatprep.mubr.f32.mxu0 %v70_v21 }
  0x88   :  { %1422 = vmatmul.mubr.f32.gmra.mrb[50].mxu1 %v151_v22 }
  0x89   :  { %1550 = vmatmul.mubr.f32.gmra.mrb[50].mxu0 %v71_v23  ;;  %1424 = vmatprep.mubr.f32.mxu1 %v152_v24 }
  0x8a   :  { %1552 = vmatprep.mubr.f32.mxu0 %v72_v25 }
  0x8c   :  { %1425 = vmatmul.mubr.f32.gmra.mrb[52].mxu1 %v153_v26 }
  0x8d   :  { %1553 = vmatmul.mubr.f32.gmra.mrb[52].mxu0 %v73_v27  ;;  %1427 = vmatprep.mubr.f32.mxu1 %v154_v28 }
  0x8e   :  { %1555 = vmatprep.mubr.f32.mxu0 %v74_v29 }
  0x90   :  { %1428 = vmatmul.mubr.f32.gmra.mrb[54].mxu1 %v155_v30 }
  0x91   :  { %1556 = vmatmul.mubr.f32.gmra.mrb[54].mxu0 %v75_v31  ;;  %1430 = vmatprep.mubr.f32.mxu1 %v156_v32 }
  0x92   :  { %1558 = vmatprep.mubr.f32.mxu0 %v76_v33 }
  0x94   :  { %1431 = vmatmul.mubr.f32.gmra.mrb[56].mxu1 %v157_v34 }
  0x95   :  { %1559 = vmatmul.mubr.f32.gmra.mrb[56].mxu0 %v77_v35  ;;  %1433 = vmatprep.mubr.f32.mxu1 %v158_v36 }
  0x96   :  { %1561 = vmatprep.mubr.f32.mxu0 %v78_v37 }
  0x98   :  { %1434 = vmatmul.mubr.f32.gmra.mrb[58].mxu1 %v159_v38 }
  0x99   :  { %1562 = vmatmul.mubr.f32.gmra.mrb[58].mxu0 %v79_v39  ;;  %1436 = vmatprep.mubr.f32.mxu1 %v160_v40 }
  0x9a   :  { %1564 = vmatprep.mubr.f32.mxu0 %v80_v41 }
  0x9c   :  { %1437 = vmatmul.mubr.f32.gmra.mrb[60].mxu1 %v161_v42 }
  0x9d   :  { %1565 = vmatmul.mubr.f32.gmra.mrb[60].mxu0 %v81_v43  ;;  %1439 = vmatprep.mubr.f32.mxu1 %v162_v44 }
  0x9e   :  { %1567 = vmatprep.mubr.f32.mxu0 %v82_v45 }
  0xa0   :  { %1440 = vmatmul.mubr.f32.gmra.mrb[62].mxu1 %v163_v46 }
  0xa1   :  { %1568 = vmatmul.mubr.f32.gmra.mrb[62].mxu0 %v83_v47 }
  0xf7   :  { %v1348_v48 = vpop.f32.mrb[0].mxu1 }
  0xf8   :  { %v1476_v49 = vpop.f32.mrb[0].mxu0  ;;  %v246_v51 = vpop.f32.mrb[1].mxu1 }
  0xf9   :  { %v637_v52 = vadd.f32 %v1476_v49, %v1348_v48  ;;  %v631_v53 = vpop.f32.mrb[1].mxu0 }
  0xfa   :  { %v632_v54 = vadd.f32 %v631_v53, %v246_v51 }
  0xfb   :  { %v958_v55 = vadd.f32 %v2211_v50, %v637_v52  ;;  %v1351_v56 = vpop.f32.mrb[2].mxu1 }
  0xfc   :  { %v957_v57 = vadd.f32 %v2211_v50, %v632_v54  ;;  %v1479_v58 = vpop.f32.mrb[2].mxu0  ;;  %v256_v59 = vpop.f32.mrb[3].mxu1 }
  0xfd   :  { %v1022_v60 = vmax.f32 %v958_v55, 0.0  ;;  %v647_v61 = vadd.f32 %v1479_v58, %v1351_v56  ;;  %v641_v62 = vpop.f32.mrb[3].mxu0 }
  0xfe   :  { %v1021_v63 = vmax.f32 %v957_v57, 0.0  ;;  %v642_v0 = vadd.f32 %v641_v62, %v256_v59 }
  0xff   :  { %1086 = vst [vmem:[%s2474_s5 + $0x8] sm:$0xff] %v1022_v60  ;;  %v960_v1 = vadd.f32 %v2211_v50, %v647_v61  ;;  %v1354_v2 = vpop.f32.mrb[4].mxu1 }
 0x100   :  { %1085 = vst [vmem:[%s2474_s5] sm:$0xff] %v1021_v63  ;;  %v959_v3 = vadd.f32 %v2211_v50, %v642_v0  ;;  %v1482_v4 = vpop.f32.mrb[4].mxu0  ;;  %v266_v5 = vpop.f32.mrb[5].mxu1 }
 0x101   :  { %v1024_v6 = vmax.f32 %v960_v1, 0.0  ;;  %v657_v7 = vadd.f32 %v1482_v4, %v1354_v2  ;;  %v651_v8 = vpop.f32.mrb[5].mxu0 }
 0x102   :  { %v1023_v9 = vmax.f32 %v959_v3, 0.0  ;;  %v652_v10 = vadd.f32 %v651_v8, %v266_v5 }
 0x103   :  { %1088 = vst [vmem:[%s2474_s5 + $0x18] sm:$0xff] %v1024_v6  ;;  %v962_v11 = vadd.f32 %v2211_v50, %v657_v7  ;;  %v1357_v12 = vpop.f32.mrb[6].mxu1 }
 0x104   :  { %1087 = vst [vmem:[%s2474_s5 + $0x10] sm:$0xff] %v1023_v9  ;;  %v961_v13 = vadd.f32 %v2211_v50, %v652_v10  ;;  %v1485_v14 = vpop.f32.mrb[6].mxu0  ;;  %v276_v15 = vpop.f32.mrb[7].mxu1 }
 0x105   :  { %v1026_v16 = vmax.f32 %v962_v11, 0.0  ;;  %v667_v17 = vadd.f32 %v1485_v14, %v1357_v12  ;;  %v661_v18 = vpop.f32.mrb[7].mxu0 }
 0x106   :  { %v1025_v19 = vmax.f32 %v961_v13, 0.0  ;;  %v662_v20 = vadd.f32 %v661_v18, %v276_v15 }
 0x107   :  { %1090 = vst [vmem:[%s2474_s5 + $0x28] sm:$0xff] %v1026_v16  ;;  %v964_v21 = vadd.f32 %v2211_v50, %v667_v17  ;;  %v1360_v22 = vpop.f32.mrb[8].mxu1 }
 0x108   :  { %1089 = vst [vmem:[%s2474_s5 + $0x20] sm:$0xff] %v1025_v19  ;;  %v963_v23 = vadd.f32 %v2211_v50, %v662_v20  ;;  %v1488_v24 = vpop.f32.mrb[8].mxu0  ;;  %v286_v25 = vpop.f32.mrb[9].mxu1 }
 0x109   :  { %v1028_v26 = vmax.f32 %v964_v21, 0.0  ;;  %v677_v27 = vadd.f32 %v1488_v24, %v1360_v22  ;;  %v671_v28 = vpop.f32.mrb[9].mxu0 }
 0x10a   :  { %v1027_v29 = vmax.f32 %v963_v23, 0.0  ;;  %v672_v30 = vadd.f32 %v671_v28, %v286_v25 }
 0x10b   :  { %1092 = vst [vmem:[%s2474_s5 + $0x38] sm:$0xff] %v1028_v26  ;;  %v966_v31 = vadd.f32 %v2211_v50, %v677_v27  ;;  %v1363_v32 = vpop.f32.mrb[10].mxu1 }
 0x10c   :  { %1091 = vst [vmem:[%s2474_s5 + $0x30] sm:$0xff] %v1027_v29  ;;  %v965_v33 = vadd.f32 %v2211_v50, %v672_v30  ;;  %v1491_v34 = vpop.f32.mrb[10].mxu0  ;;  %v296_v35 = vpop.f32.mrb[11].mxu1 }
 0x10d   :  { %v1030_v36 = vmax.f32 %v966_v31, 0.0  ;;  %v687_v37 = vadd.f32 %v1491_v34, %v1363_v32  ;;  %v681_v38 = vpop.f32.mrb[11].mxu0 }
 0x10e   :  { %v1029_v39 = vmax.f32 %v965_v33, 0.0  ;;  %v682_v40 = vadd.f32 %v681_v38, %v296_v35 }
 0x10f   :  { %1094 = vst [vmem:[%s2474_s5 + $0x48] sm:$0xff] %v1030_v36  ;;  %v968_v41 = vadd.f32 %v2211_v50, %v687_v37  ;;  %v1366_v42 = vpop.f32.mrb[12].mxu1 }
 0x110   :  { %1093 = vst [vmem:[%s2474_s5 + $0x40] sm:$0xff] %v1029_v39  ;;  %v967_v43 = vadd.f32 %v2211_v50, %v682_v40  ;;  %v1494_v44 = vpop.f32.mrb[12].mxu0  ;;  %v306_v45 = vpop.f32.mrb[13].mxu1 }
 0x111   :  { %v1032_v46 = vmax.f32 %v968_v41, 0.0  ;;  %v697_v47 = vadd.f32 %v1494_v44, %v1366_v42  ;;  %v691_v48 = vpop.f32.mrb[13].mxu0 }
 0x112   :  { %v1031_v49 = vmax.f32 %v967_v43, 0.0  ;;  %v692_v51 = vadd.f32 %v691_v48, %v306_v45 }
 0x113   :  { %1096 = vst [vmem:[%s2474_s5 + $0x58] sm:$0xff] %v1032_v46  ;;  %v970_v52 = vadd.f32 %v2211_v50, %v697_v47  ;;  %v1369_v53 = vpop.f32.mrb[14].mxu1 }
 0x114   :  { %1095 = vst [vmem:[%s2474_s5 + $0x50] sm:$0xff] %v1031_v49  ;;  %v969_v54 = vadd.f32 %v2211_v50, %v692_v51  ;;  %v1497_v55 = vpop.f32.mrb[14].mxu0  ;;  %v316_v56 = vpop.f32.mrb[15].mxu1 }
 0x115   :  { %v1034_v57 = vmax.f32 %v970_v52, 0.0  ;;  %v707_v58 = vadd.f32 %v1497_v55, %v1369_v53  ;;  %v701_v59 = vpop.f32.mrb[15].mxu0 }
 0x116   :  { %v1033_v60 = vmax.f32 %v969_v54, 0.0  ;;  %v702_v61 = vadd.f32 %v701_v59, %v316_v56 }
 0x117   :  { %1098 = vst [vmem:[%s2474_s5 + $0x68] sm:$0xff] %v1034_v57  ;;  %v972_v62 = vadd.f32 %v2211_v50, %v707_v58  ;;  %v1372_v63 = vpop.f32.mrb[16].mxu1 }
 0x118   :  { %1097 = vst [vmem:[%s2474_s5 + $0x60] sm:$0xff] %v1033_v60  ;;  %v971_v0 = vadd.f32 %v2211_v50, %v702_v61  ;;  %v1500_v1 = vpop.f32.mrb[16].mxu0  ;;  %v326_v2 = vpop.f32.mrb[17].mxu1 }
 0x119   :  { %v1036_v3 = vmax.f32 %v972_v62, 0.0  ;;  %v717_v4 = vadd.f32 %v1500_v1, %v1372_v63  ;;  %v711_v5 = vpop.f32.mrb[17].mxu0 }
 0x11a   :  { %v1035_v6 = vmax.f32 %v971_v0, 0.0  ;;  %v712_v7 = vadd.f32 %v711_v5, %v326_v2 }
 0x11b   :  { %1100 = vst [vmem:[%s2474_s5 + $0x78] sm:$0xff] %v1036_v3  ;;  %v974_v8 = vadd.f32 %v2211_v50, %v717_v4  ;;  %v1375_v9 = vpop.f32.mrb[18].mxu1 }
 0x11c   :  { %1099 = vst [vmem:[%s2474_s5 + $0x70] sm:$0xff] %v1035_v6  ;;  %v973_v10 = vadd.f32 %v2211_v50, %v712_v7  ;;  %v1503_v11 = vpop.f32.mrb[18].mxu0  ;;  %v336_v12 = vpop.f32.mrb[19].mxu1 }
 0x11d   :  { %v1038_v13 = vmax.f32 %v974_v8, 0.0  ;;  %v727_v14 = vadd.f32 %v1503_v11, %v1375_v9  ;;  %v721_v15 = vpop.f32.mrb[19].mxu0 }
 0x11e   :  { %v1037_v16 = vmax.f32 %v973_v10, 0.0  ;;  %v722_v17 = vadd.f32 %v721_v15, %v336_v12 }
 0x11f   :  { %1102 = vst [vmem:[%s2474_s5 + $0x88] sm:$0xff] %v1038_v13  ;;  %v976_v18 = vadd.f32 %v2211_v50, %v727_v14  ;;  %v1378_v19 = vpop.f32.mrb[20].mxu1 }
 0x120   :  { %1101 = vst [vmem:[%s2474_s5 + $0x80] sm:$0xff] %v1037_v16  ;;  %v975_v20 = vadd.f32 %v2211_v50, %v722_v17  ;;  %v1506_v21 = vpop.f32.mrb[20].mxu0  ;;  %v346_v22 = vpop.f32.mrb[21].mxu1 }
 0x121   :  { %v1040_v23 = vmax.f32 %v976_v18, 0.0  ;;  %v737_v24 = vadd.f32 %v1506_v21, %v1378_v19  ;;  %v731_v25 = vpop.f32.mrb[21].mxu0 }
 0x122   :  { %v1039_v26 = vmax.f32 %v975_v20, 0.0  ;;  %v732_v27 = vadd.f32 %v731_v25, %v346_v22 }
 0x123   :  { %1104 = vst [vmem:[%s2474_s5 + $0x98] sm:$0xff] %v1040_v23  ;;  %v978_v28 = vadd.f32 %v2211_v50, %v737_v24  ;;  %v1381_v29 = vpop.f32.mrb[22].mxu1 }
 0x124   :  { %1103 = vst [vmem:[%s2474_s5 + $0x90] sm:$0xff] %v1039_v26  ;;  %v977_v30 = vadd.f32 %v2211_v50, %v732_v27  ;;  %v1509_v31 = vpop.f32.mrb[22].mxu0  ;;  %v356_v32 = vpop.f32.mrb[23].mxu1 }
 0x125   :  { %v1042_v33 = vmax.f32 %v978_v28, 0.0  ;;  %v747_v34 = vadd.f32 %v1509_v31, %v1381_v29  ;;  %v741_v35 = vpop.f32.mrb[23].mxu0 }
 0x126   :  { %v1041_v36 = vmax.f32 %v977_v30, 0.0  ;;  %v742_v37 = vadd.f32 %v741_v35, %v356_v32 }
 0x127   :  { %1106 = vst [vmem:[%s2474_s5 + $0xa8] sm:$0xff] %v1042_v33  ;;  %v980_v38 = vadd.f32 %v2211_v50, %v747_v34  ;;  %v1384_v39 = vpop.f32.mrb[24].mxu1 }
 0x128   :  { %1105 = vst [vmem:[%s2474_s5 + $0xa0] sm:$0xff] %v1041_v36  ;;  %v979_v40 = vadd.f32 %v2211_v50, %v742_v37  ;;  %v1512_v41 = vpop.f32.mrb[24].mxu0  ;;  %v366_v42 = vpop.f32.mrb[25].mxu1 }
 0x129   :  { %v1044_v43 = vmax.f32 %v980_v38, 0.0  ;;  %v757_v44 = vadd.f32 %v1512_v41, %v1384_v39  ;;  %v751_v45 = vpop.f32.mrb[25].mxu0 }
 0x12a   :  { %v1043_v46 = vmax.f32 %v979_v40, 0.0  ;;  %v752_v47 = vadd.f32 %v751_v45, %v366_v42 }
 0x12b   :  { %1108 = vst [vmem:[%s2474_s5 + $0xb8] sm:$0xff] %v1044_v43  ;;  %v982_v48 = vadd.f32 %v2211_v50, %v757_v44  ;;  %v1387_v49 = vpop.f32.mrb[26].mxu1 }
 0x12c   :  { %1107 = vst [vmem:[%s2474_s5 + $0xb0] sm:$0xff] %v1043_v46  ;;  %v981_v51 = vadd.f32 %v2211_v50, %v752_v47  ;;  %v1515_v52 = vpop.f32.mrb[26].mxu0  ;;  %v376_v53 = vpop.f32.mrb[27].mxu1 }
 0x12d   :  { %v1046_v54 = vmax.f32 %v982_v48, 0.0  ;;  %v767_v55 = vadd.f32 %v1515_v52, %v1387_v49  ;;  %v761_v56 = vpop.f32.mrb[27].mxu0 }
 0x12e   :  { %v1045_v57 = vmax.f32 %v981_v51, 0.0  ;;  %v762_v58 = vadd.f32 %v761_v56, %v376_v53 }
 0x12f   :  { %1110 = vst [vmem:[%s2474_s5 + $0xc8] sm:$0xff] %v1046_v54  ;;  %v984_v59 = vadd.f32 %v2211_v50, %v767_v55  ;;  %v1390_v60 = vpop.f32.mrb[28].mxu1 }
 0x130   :  { %1109 = vst [vmem:[%s2474_s5 + $0xc0] sm:$0xff] %v1045_v57  ;;  %v983_v61 = vadd.f32 %v2211_v50, %v762_v58  ;;  %v1518_v62 = vpop.f32.mrb[28].mxu0  ;;  %v386_v63 = vpop.f32.mrb[29].mxu1 }
 0x131   :  { %v1048_v0 = vmax.f32 %v984_v59, 0.0  ;;  %v777_v1 = vadd.f32 %v1518_v62, %v1390_v60  ;;  %v771_v2 = vpop.f32.mrb[29].mxu0 }
 0x132   :  { %v1047_v3 = vmax.f32 %v983_v61, 0.0  ;;  %v772_v4 = vadd.f32 %v771_v2, %v386_v63 }
 0x133   :  { %1112 = vst [vmem:[%s2474_s5 + $0xd8] sm:$0xff] %v1048_v0  ;;  %v986_v5 = vadd.f32 %v2211_v50, %v777_v1  ;;  %v1393_v6 = vpop.f32.mrb[30].mxu1 }
 0x134   :  { %1111 = vst [vmem:[%s2474_s5 + $0xd0] sm:$0xff] %v1047_v3  ;;  %v985_v7 = vadd.f32 %v2211_v50, %v772_v4  ;;  %v1521_v8 = vpop.f32.mrb[30].mxu0  ;;  %v396_v9 = vpop.f32.mrb[31].mxu1 }
 0x135   :  { %v1050_v10 = vmax.f32 %v986_v5, 0.0  ;;  %v787_v11 = vadd.f32 %v1521_v8, %v1393_v6  ;;  %v781_v12 = vpop.f32.mrb[31].mxu0 }
 0x136   :  { %v1049_v13 = vmax.f32 %v985_v7, 0.0  ;;  %v782_v14 = vadd.f32 %v781_v12, %v396_v9 }
 0x137   :  { %1114 = vst [vmem:[%s2474_s5 + $0xe8] sm:$0xff] %v1050_v10  ;;  %v988_v15 = vadd.f32 %v2211_v50, %v787_v11  ;;  %v1396_v16 = vpop.f32.mrb[32].mxu1 }
 0x138   :  { %1113 = vst [vmem:[%s2474_s5 + $0xe0] sm:$0xff] %v1049_v13  ;;  %v987_v17 = vadd.f32 %v2211_v50, %v782_v14  ;;  %v1524_v18 = vpop.f32.mrb[32].mxu0  ;;  %v406_v19 = vpop.f32.mrb[33].mxu1 }
 0x139   :  { %v1052_v20 = vmax.f32 %v988_v15, 0.0  ;;  %v797_v21 = vadd.f32 %v1524_v18, %v1396_v16  ;;  %v791_v22 = vpop.f32.mrb[33].mxu0 }
 0x13a   :  { %v1051_v23 = vmax.f32 %v987_v17, 0.0  ;;  %v792_v24 = vadd.f32 %v791_v22, %v406_v19 }
 0x13b   :  { %1116 = vst [vmem:[%s2474_s5 + $0xf8] sm:$0xff] %v1052_v20  ;;  %v990_v25 = vadd.f32 %v2211_v50, %v797_v21  ;;  %v1399_v26 = vpop.f32.mrb[34].mxu1 }
 0x13c   :  { %1115 = vst [vmem:[%s2474_s5 + $0xf0] sm:$0xff] %v1051_v23  ;;  %v989_v27 = vadd.f32 %v2211_v50, %v792_v24  ;;  %v1527_v28 = vpop.f32.mrb[34].mxu0  ;;  %v416_v29 = vpop.f32.mrb[35].mxu1 }
 0x13d   :  { %v1054_v30 = vmax.f32 %v990_v25, 0.0  ;;  %v807_v31 = vadd.f32 %v1527_v28, %v1399_v26  ;;  %v801_v32 = vpop.f32.mrb[35].mxu0 }
 0x13e   :  { %v1053_v33 = vmax.f32 %v989_v27, 0.0  ;;  %v802_v34 = vadd.f32 %v801_v32, %v416_v29 }
 0x13f   :  { %1118 = vst [vmem:[%s2474_s5 + $0x108] sm:$0xff] %v1054_v30  ;;  %v992_v35 = vadd.f32 %v2211_v50, %v807_v31  ;;  %v1402_v36 = vpop.f32.mrb[36].mxu1 }
 0x140   :  { %1117 = vst [vmem:[%s2474_s5 + $0x100] sm:$0xff] %v1053_v33  ;;  %v991_v37 = vadd.f32 %v2211_v50, %v802_v34  ;;  %v1530_v38 = vpop.f32.mrb[36].mxu0  ;;  %v426_v39 = vpop.f32.mrb[37].mxu1 }
 0x141   :  { %v1056_v40 = vmax.f32 %v992_v35, 0.0  ;;  %v817_v41 = vadd.f32 %v1530_v38, %v1402_v36  ;;  %v811_v42 = vpop.f32.mrb[37].mxu0 }
 0x142   :  { %v1055_v43 = vmax.f32 %v991_v37, 0.0  ;;  %v812_v44 = vadd.f32 %v811_v42, %v426_v39 }
 0x143   :  { %1120 = vst [vmem:[%s2474_s5 + $0x118] sm:$0xff] %v1056_v40  ;;  %v994_v45 = vadd.f32 %v2211_v50, %v817_v41  ;;  %v1405_v46 = vpop.f32.mrb[38].mxu1 }
 0x144   :  { %1119 = vst [vmem:[%s2474_s5 + $0x110] sm:$0xff] %v1055_v43  ;;  %v993_v47 = vadd.f32 %v2211_v50, %v812_v44  ;;  %v1533_v48 = vpop.f32.mrb[38].mxu0  ;;  %v436_v49 = vpop.f32.mrb[39].mxu1 }
 0x145   :  { %v1058_v51 = vmax.f32 %v994_v45, 0.0  ;;  %v827_v52 = vadd.f32 %v1533_v48, %v1405_v46  ;;  %v821_v53 = vpop.f32.mrb[39].mxu0 }
 0x146   :  { %v1057_v54 = vmax.f32 %v993_v47, 0.0  ;;  %v822_v55 = vadd.f32 %v821_v53, %v436_v49 }
 0x147   :  { %1122 = vst [vmem:[%s2474_s5 + $0x128] sm:$0xff] %v1058_v51  ;;  %v996_v56 = vadd.f32 %v2211_v50, %v827_v52  ;;  %v1408_v57 = vpop.f32.mrb[40].mxu1 }
 0x148   :  { %1121 = vst [vmem:[%s2474_s5 + $0x120] sm:$0xff] %v1057_v54  ;;  %v995_v58 = vadd.f32 %v2211_v50, %v822_v55  ;;  %v1536_v59 = vpop.f32.mrb[40].mxu0  ;;  %v446_v60 = vpop.f32.mrb[41].mxu1 }
 0x149   :  { %v1060_v61 = vmax.f32 %v996_v56, 0.0  ;;  %v837_v62 = vadd.f32 %v1536_v59, %v1408_v57  ;;  %v831_v63 = vpop.f32.mrb[41].mxu0 }
 0x14a   :  { %v1059_v0 = vmax.f32 %v995_v58, 0.0  ;;  %v832_v1 = vadd.f32 %v831_v63, %v446_v60 }
 0x14b   :  { %1124 = vst [vmem:[%s2474_s5 + $0x138] sm:$0xff] %v1060_v61  ;;  %v998_v2 = vadd.f32 %v2211_v50, %v837_v62  ;;  %v1411_v3 = vpop.f32.mrb[42].mxu1 }
 0x14c   :  { %1123 = vst [vmem:[%s2474_s5 + $0x130] sm:$0xff] %v1059_v0  ;;  %v997_v4 = vadd.f32 %v2211_v50, %v832_v1  ;;  %v1539_v5 = vpop.f32.mrb[42].mxu0  ;;  %v456_v6 = vpop.f32.mrb[43].mxu1 }
 0x14d   :  { %v1062_v7 = vmax.f32 %v998_v2, 0.0  ;;  %v847_v8 = vadd.f32 %v1539_v5, %v1411_v3  ;;  %v841_v9 = vpop.f32.mrb[43].mxu0 }
 0x14e   :  { %v1061_v10 = vmax.f32 %v997_v4, 0.0  ;;  %v842_v11 = vadd.f32 %v841_v9, %v456_v6 }
 0x14f   :  { %1126 = vst [vmem:[%s2474_s5 + $0x148] sm:$0xff] %v1062_v7  ;;  %v1000_v12 = vadd.f32 %v2211_v50, %v847_v8  ;;  %v1414_v13 = vpop.f32.mrb[44].mxu1 }
 0x150   :  { %1125 = vst [vmem:[%s2474_s5 + $0x140] sm:$0xff] %v1061_v10  ;;  %v999_v14 = vadd.f32 %v2211_v50, %v842_v11  ;;  %v1542_v15 = vpop.f32.mrb[44].mxu0  ;;  %v466_v16 = vpop.f32.mrb[45].mxu1 }
 0x151   :  { %v1064_v17 = vmax.f32 %v1000_v12, 0.0  ;;  %v857_v18 = vadd.f32 %v1542_v15, %v1414_v13  ;;  %v851_v19 = vpop.f32.mrb[45].mxu0 }
 0x152   :  { %v1063_v20 = vmax.f32 %v999_v14, 0.0  ;;  %v852_v21 = vadd.f32 %v851_v19, %v466_v16 }
 0x153   :  { %1128 = vst [vmem:[%s2474_s5 + $0x158] sm:$0xff] %v1064_v17  ;;  %v1002_v22 = vadd.f32 %v2211_v50, %v857_v18  ;;  %v1417_v23 = vpop.f32.mrb[46].mxu1 }
 0x154   :  { %1127 = vst [vmem:[%s2474_s5 + $0x150] sm:$0xff] %v1063_v20  ;;  %v1001_v24 = vadd.f32 %v2211_v50, %v852_v21  ;;  %v1545_v25 = vpop.f32.mrb[46].mxu0  ;;  %v476_v26 = vpop.f32.mrb[47].mxu1 }
 0x155   :  { %v1066_v27 = vmax.f32 %v1002_v22, 0.0  ;;  %v867_v28 = vadd.f32 %v1545_v25, %v1417_v23  ;;  %v861_v29 = vpop.f32.mrb[47].mxu0 }
 0x156   :  { %v1065_v30 = vmax.f32 %v1001_v24, 0.0  ;;  %v862_v31 = vadd.f32 %v861_v29, %v476_v26 }
 0x157   :  { %1130 = vst [vmem:[%s2474_s5 + $0x168] sm:$0xff] %v1066_v27  ;;  %v1004_v32 = vadd.f32 %v2211_v50, %v867_v28  ;;  %v1420_v33 = vpop.f32.mrb[48].mxu1 }
 0x158   :  { %1129 = vst [vmem:[%s2474_s5 + $0x160] sm:$0xff] %v1065_v30  ;;  %v1003_v34 = vadd.f32 %v2211_v50, %v862_v31  ;;  %v1548_v35 = vpop.f32.mrb[48].mxu0  ;;  %v486_v36 = vpop.f32.mrb[49].mxu1 }
 0x159   :  { %v1068_v37 = vmax.f32 %v1004_v32, 0.0  ;;  %v877_v38 = vadd.f32 %v1548_v35, %v1420_v33  ;;  %v871_v39 = vpop.f32.mrb[49].mxu0 }
 0x15a   :  { %v1067_v40 = vmax.f32 %v1003_v34, 0.0  ;;  %v872_v41 = vadd.f32 %v871_v39, %v486_v36 }
 0x15b   :  { %1132 = vst [vmem:[%s2474_s5 + $0x178] sm:$0xff] %v1068_v37  ;;  %v1006_v42 = vadd.f32 %v2211_v50, %v877_v38  ;;  %v1423_v43 = vpop.f32.mrb[50].mxu1 }
 0x15c   :  { %1131 = vst [vmem:[%s2474_s5 + $0x170] sm:$0xff] %v1067_v40  ;;  %v1005_v44 = vadd.f32 %v2211_v50, %v872_v41  ;;  %v1551_v45 = vpop.f32.mrb[50].mxu0  ;;  %v496_v46 = vpop.f32.mrb[51].mxu1 }
 0x15d   :  { %v1070_v47 = vmax.f32 %v1006_v42, 0.0  ;;  %v887_v48 = vadd.f32 %v1551_v45, %v1423_v43  ;;  %v881_v49 = vpop.f32.mrb[51].mxu0 }
 0x15e   :  { %v1069_v51 = vmax.f32 %v1005_v44, 0.0  ;;  %v882_v52 = vadd.f32 %v881_v49, %v496_v46 }
 0x15f   :  { %1134 = vst [vmem:[%s2474_s5 + $0x188] sm:$0xff] %v1070_v47  ;;  %v1008_v53 = vadd.f32 %v2211_v50, %v887_v48  ;;  %v1426_v54 = vpop.f32.mrb[52].mxu1 }
 0x160   :  { %1133 = vst [vmem:[%s2474_s5 + $0x180] sm:$0xff] %v1069_v51  ;;  %v1007_v55 = vadd.f32 %v2211_v50, %v882_v52  ;;  %v1554_v56 = vpop.f32.mrb[52].mxu0  ;;  %v506_v57 = vpop.f32.mrb[53].mxu1 }
 0x161   :  { %v1072_v58 = vmax.f32 %v1008_v53, 0.0  ;;  %v897_v59 = vadd.f32 %v1554_v56, %v1426_v54  ;;  %v891_v60 = vpop.f32.mrb[53].mxu0 }
 0x162   :  { %v1071_v61 = vmax.f32 %v1007_v55, 0.0  ;;  %v892_v62 = vadd.f32 %v891_v60, %v506_v57 }
 0x163   :  { %1136 = vst [vmem:[%s2474_s5 + $0x198] sm:$0xff] %v1072_v58  ;;  %v1010_v63 = vadd.f32 %v2211_v50, %v897_v59  ;;  %v1429_v0 = vpop.f32.mrb[54].mxu1 }
 0x164   :  { %1135 = vst [vmem:[%s2474_s5 + $0x190] sm:$0xff] %v1071_v61  ;;  %v1009_v1 = vadd.f32 %v2211_v50, %v892_v62  ;;  %v1557_v2 = vpop.f32.mrb[54].mxu0  ;;  %v516_v3 = vpop.f32.mrb[55].mxu1 }
 0x165   :  { %v1074_v4 = vmax.f32 %v1010_v63, 0.0  ;;  %v907_v5 = vadd.f32 %v1557_v2, %v1429_v0  ;;  %v901_v6 = vpop.f32.mrb[55].mxu0 }
 0x166   :  { %v1073_v7 = vmax.f32 %v1009_v1, 0.0  ;;  %v902_v8 = vadd.f32 %v901_v6, %v516_v3 }
 0x167   :  { %1138 = vst [vmem:[%s2474_s5 + $0x1a8] sm:$0xff] %v1074_v4  ;;  %v1012_v9 = vadd.f32 %v2211_v50, %v907_v5  ;;  %v1432_v10 = vpop.f32.mrb[56].mxu1 }
 0x168   :  { %1137 = vst [vmem:[%s2474_s5 + $0x1a0] sm:$0xff] %v1073_v7  ;;  %v1011_v11 = vadd.f32 %v2211_v50, %v902_v8  ;;  %v1560_v12 = vpop.f32.mrb[56].mxu0  ;;  %v526_v13 = vpop.f32.mrb[57].mxu1 }
 0x169   :  { %v1076_v14 = vmax.f32 %v1012_v9, 0.0  ;;  %v917_v15 = vadd.f32 %v1560_v12, %v1432_v10  ;;  %v911_v16 = vpop.f32.mrb[57].mxu0 }
 0x16a   :  { %v1075_v17 = vmax.f32 %v1011_v11, 0.0  ;;  %v912_v18 = vadd.f32 %v911_v16, %v526_v13 }
 0x16b   :  { %1140 = vst [vmem:[%s2474_s5 + $0x1b8] sm:$0xff] %v1076_v14  ;;  %v1014_v19 = vadd.f32 %v2211_v50, %v917_v15  ;;  %v1435_v20 = vpop.f32.mrb[58].mxu1 }
 0x16c   :  { %1139 = vst [vmem:[%s2474_s5 + $0x1b0] sm:$0xff] %v1075_v17  ;;  %v1013_v21 = vadd.f32 %v2211_v50, %v912_v18  ;;  %v1563_v22 = vpop.f32.mrb[58].mxu0  ;;  %v536_v23 = vpop.f32.mrb[59].mxu1 }
 0x16d   :  { %v1078_v24 = vmax.f32 %v1014_v19, 0.0  ;;  %v927_v25 = vadd.f32 %v1563_v22, %v1435_v20  ;;  %v921_v26 = vpop.f32.mrb[59].mxu0 }
 0x16e   :  { %v1077_v27 = vmax.f32 %v1013_v21, 0.0  ;;  %v922_v28 = vadd.f32 %v921_v26, %v536_v23 }
 0x16f   :  { %1142 = vst [vmem:[%s2474_s5 + $0x1c8] sm:$0xff] %v1078_v24  ;;  %v1016_v29 = vadd.f32 %v2211_v50, %v927_v25  ;;  %v1438_v30 = vpop.f32.mrb[60].mxu1 }
 0x170   :  { %1141 = vst [vmem:[%s2474_s5 + $0x1c0] sm:$0xff] %v1077_v27  ;;  %v1015_v31 = vadd.f32 %v2211_v50, %v922_v28  ;;  %v1566_v32 = vpop.f32.mrb[60].mxu0  ;;  %v546_v33 = vpop.f32.mrb[61].mxu1 }
 0x171   :  { %v1080_v34 = vmax.f32 %v1016_v29, 0.0  ;;  %v937_v35 = vadd.f32 %v1566_v32, %v1438_v30  ;;  %v931_v36 = vpop.f32.mrb[61].mxu0 }
 0x172   :  { %v1079_v37 = vmax.f32 %v1015_v31, 0.0  ;;  %v932_v38 = vadd.f32 %v931_v36, %v546_v33 }
 0x173   :  { %1144 = vst [vmem:[%s2474_s5 + $0x1d8] sm:$0xff] %v1080_v34  ;;  %v1018_v39 = vadd.f32 %v2211_v50, %v937_v35  ;;  %v1441_v40 = vpop.f32.mrb[62].mxu1 }
 0x174   :  { %1143 = vst [vmem:[%s2474_s5 + $0x1d0] sm:$0xff] %v1079_v37  ;;  %v1017_v41 = vadd.f32 %v2211_v50, %v932_v38  ;;  %v1569_v42 = vpop.f32.mrb[62].mxu0  ;;  %v556_v43 = vpop.f32.mrb[63].mxu1 }
 0x175   :  { %v1082_v44 = vmax.f32 %v1018_v39, 0.0  ;;  %v947_v45 = vadd.f32 %v1569_v42, %v1441_v40  ;;  %v941_v46 = vpop.f32.mrb[63].mxu0 }
 0x176   :  { %v1081_v47 = vmax.f32 %v1017_v41, 0.0  ;;  %v942_v48 = vadd.f32 %v941_v46, %v556_v43 }
 0x177   :  { %1146 = vst [vmem:[%s2474_s5 + $0x1e8] sm:$0xff] %v1082_v44  ;;  %v1020_v49 = vadd.f32 %v2211_v50, %v947_v45 }
 0x178   :  { %1145 = vst [vmem:[%s2474_s5 + $0x1e0] sm:$0xff] %v1081_v47  ;;  %v1019_v51 = vadd.f32 %v2211_v50, %v942_v48 }
 0x179   :  { %v1084_v52 = vmax.f32 %v1020_v49, 0.0 }
 0x17a   :  { %v1083_v53 = vmax.f32 %v1019_v51, 0.0 }
 0x17b   :  { %1148 = vst [vmem:[%s2474_s5 + $0x1f8] sm:$0xff] %v1084_v52 }
 0x17c   :  { %1147 = vst [vmem:[%s2474_s5 + $0x1f0] sm:$0xff] %v1083_v53 }

// kernel: inception_forward.4
= control target key start
LH: loop header
LB: loop body
LE: loop exit
PB: predicated region body
PF: predicated region fallthrough
CT: control target
= control target key end

     0   :  { %v2032_v0 = vmov 0.0|0.0   ;;  %vm333_vm0 = vcmask 719872   ;;  %s3742_s3 = inlined_call_operand.vmem [shape: f32[216,128], index: 3, kind: input, shape index: {}]   ;;  %s3743_s2 = inlined_call_operand.vmem [shape: f32[216,128], index: 2, kind: input, shape index: {}]   ;;  %s3744_s1 = inlined_call_operand.vmem [shape: f32[512,216], index: 1, kind: input, shape index: {}]   ;;  %s3745_s0 = inlined_call_operand.vmem [shape: f32[512,216], index: 0, kind: input, shape index: {}]   ;;  %s3746_s4 = inlined_call_operand.vmem [shape: f32[1,128], index: 4, kind: input, shape index: {}]   ;;  %s3747_s5 = inlined_call_operand.vmem [shape: f32[512,128], index: 5, kind: input, shape index: {}]   ;;  %s3748_s6 = inlined_call_operand.vmem [shape: f32[512,128], index: 6, kind: output, shape index: {}]  }
   0x1   :  { %1951 = vmatprep.subr.bf16.mxu0 %v2032_v0  ;;  %1990 = vmatprep.subr.bf16.mxu1 %v2032_v0  ;;  %v306_v1 = vld [vmem:[%s3742_s3] sm:$0xff]  ;;  %v307_v2 = vld [vmem:[%s3742_s3 + $0x8] sm:$0xff]  ;;  %v308_v6 = vld [vmem:[%s3742_s3 + $0x10] sm:$0xff] }
   0x2   :  { %v151_v3 = vld [vmem:[%s3743_s2] sm:$0xff]  ;;  %v1952_v4 = vpack.c.bf16 %v307_v2, %v306_v1  ;;  %v152_v5 = vld [vmem:[%s3743_s2 + $0x8] sm:$0xff]  ;;  %v309_v7 = vld [vmem:[%s3742_s3 + $0x18] sm:$0xff] }
   0x3   :  { %v1991_v8 = vpack.c.bf16 %v152_v5, %v151_v3  ;;  %v153_v9 = vld [vmem:[%s3743_s2 + $0x10] sm:$0xff]  ;;  %v154_v10 = vld [vmem:[%s3743_s2 + $0x18] sm:$0xff]  ;;  %v1955_v11 = vpack.c.bf16 %v309_v7, %v308_v6  ;;  %v310_v13 = vld [vmem:[%s3742_s3 + $0x20] sm:$0xff] }
   0x4   :  { %1953 = vmatpush1.bf16.msra.mxu0 %v1952_v4  ;;  %v1994_v12 = vpack.c.bf16 %v154_v10, %v153_v9  ;;  %v311_v14 = vld [vmem:[%s3742_s3 + $0x28] sm:$0xff]  ;;  %v155_v15 = vld [vmem:[%s3743_s2 + $0x20] sm:$0xff]  ;;  %v312_v19 = vld [vmem:[%s3742_s3 + $0x30] sm:$0xff] }
   0x5   :  { %1992 = vmatpush1.bf16.msra.mxu1 %v1991_v8  ;;  %1954 = vmatprep.subr.bf16.mxu0 %v2032_v0  ;;  %v156_v16 = vld [vmem:[%s3743_s2 + $0x28] sm:$0xff]  ;;  %v1958_v17 = vpack.c.bf16 %v311_v14, %v310_v13  ;;  %v313_v20 = vld [vmem:[%s3742_s3 + $0x38] sm:$0xff]  ;;  %v157_v21 = vld [vmem:[%s3743_s2 + $0x30] sm:$0xff] }
   0x6   :  { %1993 = vmatprep.subr.bf16.mxu1 %v2032_v0  ;;  %v1997_v18 = vpack.c.bf16 %v156_v16, %v155_v15  ;;  %v158_v22 = vld [vmem:[%s3743_s2 + $0x38] sm:$0xff]  ;;  %v1961_v23 = vpack.c.bf16 %v313_v20, %v312_v19  ;;  %v314_v25 = vld [vmem:[%s3742_s3 + $0x40] sm:$0xff]  ;;  %v315_v26 = vld [vmem:[%s3742_s3 + $0x48] sm:$0xff] }
   0x7   :  { %v2000_v24 = vpack.c.bf16 %v158_v22, %v157_v21  ;;  %v159_v27 = vld [vmem:[%s3743_s2 + $0x40] sm:$0xff]  ;;  %v160_v28 = vld [vmem:[%s3743_s2 + $0x48] sm:$0xff]  ;;  %v1964_v29 = vpack.c.bf16 %v315_v26, %v314_v25  ;;  %v316_v31 = vld [vmem:[%s3742_s3 + $0x50] sm:$0xff] }
   0x8   :  { %1956 = vmatpush1.bf16.msra.mxu0 %v1955_v11  ;;  %v2003_v30 = vpack.c.bf16 %v160_v28, %v159_v27  ;;  %v317_v32 = vld [vmem:[%s3742_s3 + $0x58] sm:$0xff]  ;;  %v161_v33 = vld [vmem:[%s3743_s2 + $0x50] sm:$0xff]  ;;  %v179_v35 = vld [vmem:[%s3744_s1 + $0x8] sm:$0xff] }
   0x9   :  { %1995 = vmatpush1.bf16.msra.mxu1 %v1994_v12  ;;  %1957 = vmatprep.subr.bf16.mxu0 %v2032_v0  ;;  %v162_v34 = vld [vmem:[%s3743_s2 + $0x58] sm:$0xff]  ;;  %v24_v36 = vld [vmem:[%s3745_s0 + $0x8] sm:$0xff]  ;;  %v1967_v37 = vpack.c.bf16 %v317_v32, %v316_v31  ;;  %v318_v39 = vld [vmem:[%s3742_s3 + $0x60] sm:$0xff] }
   0xa   :  { %1996 = vmatprep.subr.bf16.mxu1 %v2032_v0  ;;  %1822 = vmatprep.mubr.msk.f32.mxu0 %vm333_vm0, %v179_v35  ;;  %v2006_v38 = vpack.c.bf16 %v162_v34, %v161_v33  ;;  %v319_v40 = vld [vmem:[%s3742_s3 + $0x68] sm:$0xff]  ;;  %v163_v41 = vld [vmem:[%s3743_s2 + $0x60] sm:$0xff]  ;;  %v320_v45 = vld [vmem:[%s3742_s3 + $0x70] sm:$0xff] }
   0xb   :  { %1886 = vmatprep.mubr.msk.f32.mxu1 %vm333_vm0, %v24_v36  ;;  %v164_v42 = vld [vmem:[%s3743_s2 + $0x68] sm:$0xff]  ;;  %v1970_v43 = vpack.c.bf16 %v319_v40, %v318_v39  ;;  %v321_v46 = vld [vmem:[%s3742_s3 + $0x78] sm:$0xff]  ;;  %v165_v47 = vld [vmem:[%s3743_s2 + $0x70] sm:$0xff] }
   0xc   :  { %1959 = vmatpush1.bf16.msra.mxu0 %v1958_v17  ;;  %v2009_v44 = vpack.c.bf16 %v164_v42, %v163_v41  ;;  %v166_v48 = vld [vmem:[%s3743_s2 + $0x78] sm:$0xff]  ;;  %v1973_v49 = vpack.c.bf16 %v321_v46, %v320_v45  ;;  %v322_v51 = vld [vmem:[%s3742_s3 + $0x80] sm:$0xff]  ;;  %v323_v52 = vld [vmem:[%s3742_s3 + $0x88] sm:$0xff] }
   0xd   :  { %1998 = vmatpush1.bf16.msra.mxu1 %v1997_v18  ;;  %1960 = vmatprep.subr.bf16.mxu0 %v2032_v0  ;;  %v2012_v50 = vpack.c.bf16 %v166_v48, %v165_v47  ;;  %v167_v53 = vld [vmem:[%s3743_s2 + $0x80] sm:$0xff]  ;;  %v168_v54 = vld [vmem:[%s3743_s2 + $0x88] sm:$0xff]  ;;  %v1976_v55 = vpack.c.bf16 %v323_v52, %v322_v51  ;;  %v324_v57 = vld [vmem:[%s3742_s3 + $0x90] sm:$0xff]  ;;  %v2033_v18 = vmov 0.0  }
   0xe   :  { %1999 = vmatprep.subr.bf16.mxu1 %v2032_v0  ;;  %v2015_v56 = vpack.c.bf16 %v168_v54, %v167_v53  ;;  %v325_v58 = vld [vmem:[%s3742_s3 + $0x98] sm:$0xff]  ;;  %v169_v59 = vld [vmem:[%s3743_s2 + $0x90] sm:$0xff]  ;;  %v326_v63 = vld [vmem:[%s3742_s3 + $0xa0] sm:$0xff] }
   0xf   :  { %v170_v60 = vld [vmem:[%s3743_s2 + $0x98] sm:$0xff]  ;;  %v1979_v61 = vpack.c.bf16 %v325_v58, %v324_v57  ;;  %v327_v1 = vld [vmem:[%s3742_s3 + $0xa8] sm:$0xff]  ;;  %v171_v2 = vld [vmem:[%s3743_s2 + $0xa0] sm:$0xff] }
  0x10   :  { %1962 = vmatpush1.bf16.msra.mxu0 %v1961_v23  ;;  %v2018_v62 = vpack.c.bf16 %v170_v60, %v169_v59  ;;  %v172_v3 = vld [vmem:[%s3743_s2 + $0xa8] sm:$0xff]  ;;  %v1982_v4 = vpack.c.bf16 %v327_v1, %v326_v63  ;;  %v328_v6 = vld [vmem:[%s3742_s3 + $0xb0] sm:$0xff]  ;;  %v329_v7 = vld [vmem:[%s3742_s3 + $0xb8] sm:$0xff] }
  0x11   :  { %2001 = vmatpush1.bf16.msra.mxu1 %v2000_v24  ;;  %1963 = vmatprep.subr.bf16.mxu0 %v2032_v0  ;;  %v2021_v5 = vpack.c.bf16 %v172_v3, %v171_v2  ;;  %v173_v8 = vld [vmem:[%s3743_s2 + $0xb0] sm:$0xff]  ;;  %v174_v9 = vld [vmem:[%s3743_s2 + $0xb8] sm:$0xff]  ;;  %v1985_v10 = vpack.c.bf16 %v329_v7, %v328_v6  ;;  %v330_v12 = vld [vmem:[%s3742_s3 + $0xc0] sm:$0xff] }
  0x12   :  { %2002 = vmatprep.subr.bf16.mxu1 %v2032_v0  ;;  %v2024_v11 = vpack.c.bf16 %v174_v9, %v173_v8  ;;  %v331_v13 = vld [vmem:[%s3742_s3 + $0xc8] sm:$0xff]  ;;  %v175_v14 = vld [vmem:[%s3743_s2 + $0xc0] sm:$0xff]  ;;  %v332_v19 = vld [vmem:[%s3742_s3 + $0xd0] sm:$0xff] }
  0x13   :  { %v176_v15 = vld [vmem:[%s3743_s2 + $0xc8] sm:$0xff]  ;;  %v1988_v16 = vpack.c.bf16 %v331_v13, %v330_v12  ;;  %v177_v20 = vld [vmem:[%s3743_s2 + $0xd0] sm:$0xff]  ;;  %v178_v21 = vld [vmem:[%s3744_s1] sm:$0xff] }
  0x14   :  { %1965 = vmatpush1.bf16.msra.mxu0 %v1964_v29  ;;  %v2027_v17 = vpack.c.bf16 %v176_v15, %v175_v14  ;;  %v181_v22 = vld [vmem:[%s3744_s1 + $0x18] sm:$0xff]  ;;  %v180_v24 = vld [vmem:[%s3744_s1 + $0x10] sm:$0xff]  ;;  %v183_v26 = vld [vmem:[%s3744_s1 + $0x28] sm:$0xff] }
  0x15   :  { %2004 = vmatpush1.bf16.msra.mxu1 %v2003_v30  ;;  %1966 = vmatprep.subr.bf16.mxu0 %v2032_v0  ;;  %v26_v23 = vld [vmem:[%s3745_s0 + $0x18] sm:$0xff]  ;;  %v25_v25 = vld [vmem:[%s3745_s0 + $0x10] sm:$0xff]  ;;  %v28_v27 = vld [vmem:[%s3745_s0 + $0x28] sm:$0xff] }
  0x16   :  { %2005 = vmatprep.subr.bf16.mxu1 %v2032_v0  ;;  %v182_v28 = vld [vmem:[%s3744_s1 + $0x20] sm:$0xff]  ;;  %v185_v30 = vld [vmem:[%s3744_s1 + $0x38] sm:$0xff]  ;;  %v184_v32 = vld [vmem:[%s3744_s1 + $0x30] sm:$0xff] }
  0x17   :  { %v27_v29 = vld [vmem:[%s3745_s0 + $0x20] sm:$0xff]  ;;  %v30_v31 = vld [vmem:[%s3745_s0 + $0x38] sm:$0xff]  ;;  %v29_v33 = vld [vmem:[%s3745_s0 + $0x30] sm:$0xff] }
  0x18   :  { %1968 = vmatpush1.bf16.msra.mxu0 %v1967_v37  ;;  %v187_v34 = vld [vmem:[%s3744_s1 + $0x48] sm:$0xff]  ;;  %v186_v36 = vld [vmem:[%s3744_s1 + $0x40] sm:$0xff]  ;;  %v34_v39 = vld [vmem:[%s3745_s0 + $0x58] sm:$0xff] }
  0x19   :  { %2007 = vmatpush1.bf16.msra.mxu1 %v2006_v38  ;;  %1969 = vmatprep.subr.bf16.mxu0 %v2032_v0  ;;  %v32_v35 = vld [vmem:[%s3745_s0 + $0x48] sm:$0xff]  ;;  %v31_v37 = vld [vmem:[%s3745_s0 + $0x40] sm:$0xff]  ;;  %v189_v38 = vld [vmem:[%s3744_s1 + $0x58] sm:$0xff] }
  0x1a   :  { %2008 = vmatprep.subr.bf16.mxu1 %v2032_v0  ;;  %v188_v40 = vld [vmem:[%s3744_s1 + $0x50] sm:$0xff]  ;;  %v191_v42 = vld [vmem:[%s3744_s1 + $0x68] sm:$0xff]  ;;  %v35_v45 = vld [vmem:[%s3745_s0 + $0x60] sm:$0xff] }
  0x1b   :  { %v33_v41 = vld [vmem:[%s3745_s0 + $0x50] sm:$0xff]  ;;  %v193_v46 = vld [vmem:[%s3744_s1 + $0x78] sm:$0xff]  ;;  %v40_v51 = vld [vmem:[%s3745_s0 + $0x88] sm:$0xff] }
  0x1c   :  { %1971 = vmatpush1.bf16.msra.mxu0 %v1970_v43  ;;  %v36_v43 = vld [vmem:[%s3745_s0 + $0x68] sm:$0xff]  ;;  %v38_v47 = vld [vmem:[%s3745_s0 + $0x78] sm:$0xff]  ;;  %v192_v48 = vld [vmem:[%s3744_s1 + $0x70] sm:$0xff] }
  0x1d   :  { %2010 = vmatpush1.bf16.msra.mxu1 %v2009_v44  ;;  %1972 = vmatprep.subr.bf16.mxu0 %v2032_v0  ;;  %v190_v44 = vld [vmem:[%s3744_s1 + $0x60] sm:$0xff]  ;;  %v197_v54 = vld [vmem:[%s3744_s1 + $0x98] sm:$0xff]  ;;  %v41_v57 = vld [vmem:[%s3745_s0 + $0x90] sm:$0xff] }
  0x1e   :  { %2011 = vmatprep.subr.bf16.mxu1 %v2032_v0  ;;  %v194_v52 = vld [vmem:[%s3744_s1 + $0x80] sm:$0xff]  ;;  %v199_v58 = vld [vmem:[%s3744_s1 + $0xa8] sm:$0xff]  ;;  %v46_v63 = vld [vmem:[%s3745_s0 + $0xb8] sm:$0xff] }
  0x1f   :  { %v39_v53 = vld [vmem:[%s3745_s0 + $0x80] sm:$0xff]  ;;  %v44_v59 = vld [vmem:[%s3745_s0 + $0xa8] sm:$0xff]  ;;  %v200_v1 = vld [vmem:[%s3744_s1 + $0xb0] sm:$0xff] }
  0x20   :  { %1974 = vmatpush1.bf16.msra.mxu0 %v1973_v49  ;;  %v37_v49 = vld [vmem:[%s3745_s0 + $0x70] sm:$0xff]  ;;  %v198_v60 = vld [vmem:[%s3744_s1 + $0xa0] sm:$0xff]  ;;  %v203_v3 = vld [vmem:[%s3744_s1 + $0xc8] sm:$0xff] }
  0x21   :  { %2013 = vmatpush1.bf16.msra.mxu1 %v2012_v50  ;;  %1975 = vmatprep.subr.bf16.mxu0 %v2032_v0  ;;  %v195_v50 = vld [vmem:[%s3744_s1 + $0x88] sm:$0xff]  ;;  %v45_v2 = vld [vmem:[%s3745_s0 + $0xb0] sm:$0xff]  ;;  %v47_v6 = vld [vmem:[%s3745_s0 + $0xc0] sm:$0xff] }
  0x22   :  { %2014 = vmatprep.subr.bf16.mxu1 %v2032_v0  ;;  %v205_v7 = vld [vmem:[%s3744_s1 + $0xd8] sm:$0xff]  ;;  %v204_v9 = vld [vmem:[%s3744_s1 + $0xd0] sm:$0xff]  ;;  %v52_v12 = vld [vmem:[%s3745_s0 + $0xe8] sm:$0xff] }
  0x23   :  { %v50_v8 = vld [vmem:[%s3745_s0 + $0xd8] sm:$0xff]  ;;  %v206_v13 = vld [vmem:[%s3744_s1 + $0xe0] sm:$0xff] }
  0x24   :  { %1977 = vmatpush1.bf16.msra.mxu0 %v1976_v55  ;;  %v42_v55 = vld [vmem:[%s3745_s0 + $0x98] sm:$0xff]  ;;  %v51_v14 = vld [vmem:[%s3745_s0 + $0xe0] sm:$0xff] }
  0x25   :  { %2016 = vmatpush1.bf16.msra.mxu1 %v2015_v56  ;;  %1978 = vmatprep.subr.bf16.mxu0 %v2032_v0  ;;  %v196_v56 = vld [vmem:[%s3744_s1 + $0x90] sm:$0xff]  ;;  %v209_v15 = vld [vmem:[%s3744_s1 + $0xf8] sm:$0xff] }
  0x26   :  { %2017 = vmatprep.subr.bf16.mxu1 %v2032_v0 }
  0x28   :  { %1980 = vmatpush1.bf16.msra.mxu0 %v1979_v61  ;;  %v43_v61 = vld [vmem:[%s3745_s0 + $0xa0] sm:$0xff] }
  0x29   :  { %2019 = vmatpush1.bf16.msra.mxu1 %v2018_v62  ;;  %1981 = vmatprep.subr.bf16.mxu0 %v2032_v0  ;;  %v201_v62 = vld [vmem:[%s3744_s1 + $0xb8] sm:$0xff] }
  0x2a   :  { %2020 = vmatprep.subr.bf16.mxu1 %v2032_v0 }
  0x2c   :  { %1983 = vmatpush1.bf16.msra.mxu0 %v1982_v4  ;;  %v48_v4 = vld [vmem:[%s3745_s0 + $0xc8] sm:$0xff] }
  0x2d   :  { %2022 = vmatpush1.bf16.msra.mxu1 %v2021_v5  ;;  %1984 = vmatprep.subr.bf16.mxu0 %v2032_v0  ;;  %v202_v5 = vld [vmem:[%s3744_s1 + $0xc0] sm:$0xff] }
  0x2e   :  { %2023 = vmatprep.subr.bf16.mxu1 %v2032_v0 }
  0x30   :  { %1986 = vmatpush1.bf16.msra.mxu0 %v1985_v10  ;;  %v49_v10 = vld [vmem:[%s3745_s0 + $0xd0] sm:$0xff] }
  0x31   :  { %2025 = vmatpush1.bf16.msra.mxu1 %v2024_v11  ;;  %1987 = vmatprep.subr.bf16.mxu0 %v2032_v0  ;;  %v207_v11 = vld [vmem:[%s3744_s1 + $0xe8] sm:$0xff] }
  0x32   :  { %2026 = vmatprep.subr.bf16.mxu1 %v2032_v0  ;;  %v23_v0 = vld [vmem:[%s3745_s0] sm:$0xff] }
  0x34   :  { %1989 = vmatpush1.bf16.msra.mxu0 %v1988_v16  ;;  %v54_v16 = vld [vmem:[%s3745_s0 + $0xf8] sm:$0xff] }
  0x35   :  { %2028 = vmatpush1.bf16.msra.mxu1 %v2027_v17  ;;  %578 = vmatprep.subr.mxu0 %v2033_v18  ;;  %v208_v17 = vld [vmem:[%s3744_s1 + $0xf0] sm:$0xff] }
  0x36   :  { %1155 = vmatprep.subr.mxu1 %v2033_v18  ;;  %v53_v18 = vld [vmem:[%s3745_s0 + $0xf0] sm:$0xff] }
  0x38   :  { %579 = vmatpush1.msra.mxu0 %v332_v19  ;;  %v211_v19 = vld [vmem:[%s3744_s1 + $0x108] sm:$0xff] }
  0x39   :  { %1156 = vmatpush1.msra.mxu1 %v177_v20  ;;  %591 = vmatmul.mubr.f32.vlgmr.msra.gmra.mrb[0].mxu0 %v178_v21  ;;  %v56_v20 = vld [vmem:[%s3745_s0 + $0x108] sm:$0xff]  ;;  %v210_v21 = vld [vmem:[%s3744_s1 + $0x100] sm:$0xff] }
  0x3a   :  { %1168 = vmatmul.mubr.f32.vlgmr.msra.gmra.mrb[0].mxu1 %v23_v0  ;;  %1823 = vmatprep.mubr.msk.f32.mxu0 %vm333_vm0, %v181_v22  ;;  %v55_v0 = vld [vmem:[%s3745_s0 + $0x100] sm:$0xff]  ;;  %v213_v22 = vld [vmem:[%s3744_s1 + $0x118] sm:$0xff] }
  0x3b   :  { %1887 = vmatprep.mubr.msk.f32.mxu1 %vm333_vm0, %v26_v23  ;;  %v58_v23 = vld [vmem:[%s3745_s0 + $0x118] sm:$0xff] }
  0x3d   :  { %596 = vmatmul.mubr.f32.gmra.mrb[2].mxu0 %v180_v24  ;;  %v212_v24 = vld [vmem:[%s3744_s1 + $0x110] sm:$0xff] }
  0x3e   :  { %1173 = vmatmul.mubr.f32.gmra.mrb[2].mxu1 %v25_v25  ;;  %1824 = vmatprep.mubr.msk.f32.mxu0 %vm333_vm0, %v183_v26  ;;  %v57_v25 = vld [vmem:[%s3745_s0 + $0x110] sm:$0xff]  ;;  %v215_v26 = vld [vmem:[%s3744_s1 + $0x128] sm:$0xff] }
  0x3f   :  { %1888 = vmatprep.mubr.msk.f32.mxu1 %vm333_vm0, %v28_v27  ;;  %v60_v27 = vld [vmem:[%s3745_s0 + $0x128] sm:$0xff] }
  0x41   :  { %601 = vmatmul.mubr.f32.gmra.mrb[4].mxu0 %v182_v28  ;;  %v214_v28 = vld [vmem:[%s3744_s1 + $0x120] sm:$0xff] }
  0x42   :  { %1178 = vmatmul.mubr.f32.gmra.mrb[4].mxu1 %v27_v29  ;;  %1825 = vmatprep.mubr.msk.f32.mxu0 %vm333_vm0, %v185_v30  ;;  %v59_v29 = vld [vmem:[%s3745_s0 + $0x120] sm:$0xff]  ;;  %v217_v30 = vld [vmem:[%s3744_s1 + $0x138] sm:$0xff] }
  0x43   :  { %1889 = vmatprep.mubr.msk.f32.mxu1 %vm333_vm0, %v30_v31  ;;  %v62_v31 = vld [vmem:[%s3745_s0 + $0x138] sm:$0xff] }
  0x45   :  { %606 = vmatmul.mubr.f32.gmra.mrb[6].mxu0 %v184_v32  ;;  %v216_v32 = vld [vmem:[%s3744_s1 + $0x130] sm:$0xff] }
  0x46   :  { %1183 = vmatmul.mubr.f32.gmra.mrb[6].mxu1 %v29_v33  ;;  %1826 = vmatprep.mubr.msk.f32.mxu0 %vm333_vm0, %v187_v34  ;;  %v61_v33 = vld [vmem:[%s3745_s0 + $0x130] sm:$0xff]  ;;  %v219_v34 = vld [vmem:[%s3744_s1 + $0x148] sm:$0xff] }
  0x47   :  { %1890 = vmatprep.mubr.msk.f32.mxu1 %vm333_vm0, %v32_v35  ;;  %v64_v35 = vld [vmem:[%s3745_s0 + $0x148] sm:$0xff] }
  0x49   :  { %611 = vmatmul.mubr.f32.gmra.mrb[8].mxu0 %v186_v36  ;;  %v218_v36 = vld [vmem:[%s3744_s1 + $0x140] sm:$0xff] }
  0x4a   :  { %1188 = vmatmul.mubr.f32.gmra.mrb[8].mxu1 %v31_v37  ;;  %1827 = vmatprep.mubr.msk.f32.mxu0 %vm333_vm0, %v189_v38  ;;  %v63_v37 = vld [vmem:[%s3745_s0 + $0x140] sm:$0xff]  ;;  %v221_v38 = vld [vmem:[%s3744_s1 + $0x158] sm:$0xff] }
  0x4b   :  { %1891 = vmatprep.mubr.msk.f32.mxu1 %vm333_vm0, %v34_v39  ;;  %v66_v39 = vld [vmem:[%s3745_s0 + $0x158] sm:$0xff] }
  0x4d   :  { %616 = vmatmul.mubr.f32.gmra.mrb[10].mxu0 %v188_v40  ;;  %v220_v40 = vld [vmem:[%s3744_s1 + $0x150] sm:$0xff] }
  0x4e   :  { %1193 = vmatmul.mubr.f32.gmra.mrb[10].mxu1 %v33_v41  ;;  %1828 = vmatprep.mubr.msk.f32.mxu0 %vm333_vm0, %v191_v42  ;;  %v65_v41 = vld [vmem:[%s3745_s0 + $0x150] sm:$0xff]  ;;  %v223_v42 = vld [vmem:[%s3744_s1 + $0x168] sm:$0xff] }
  0x4f   :  { %1892 = vmatprep.mubr.msk.f32.mxu1 %vm333_vm0, %v36_v43  ;;  %v68_v43 = vld [vmem:[%s3745_s0 + $0x168] sm:$0xff] }
  0x51   :  { %621 = vmatmul.mubr.f32.gmra.mrb[12].mxu0 %v190_v44  ;;  %v222_v44 = vld [vmem:[%s3744_s1 + $0x160] sm:$0xff] }
  0x52   :  { %1198 = vmatmul.mubr.f32.gmra.mrb[12].mxu1 %v35_v45  ;;  %1829 = vmatprep.mubr.msk.f32.mxu0 %vm333_vm0, %v193_v46  ;;  %v67_v45 = vld [vmem:[%s3745_s0 + $0x160] sm:$0xff]  ;;  %v225_v46 = vld [vmem:[%s3744_s1 + $0x178] sm:$0xff] }
  0x53   :  { %1893 = vmatprep.mubr.msk.f32.mxu1 %vm333_vm0, %v38_v47  ;;  %v70_v47 = vld [vmem:[%s3745_s0 + $0x178] sm:$0xff] }
  0x55   :  { %626 = vmatmul.mubr.f32.gmra.mrb[14].mxu0 %v192_v48  ;;  %v224_v48 = vld [vmem:[%s3744_s1 + $0x170] sm:$0xff] }
  0x56   :  { %1203 = vmatmul.mubr.f32.gmra.mrb[14].mxu1 %v37_v49  ;;  %1830 = vmatprep.mubr.msk.f32.mxu0 %vm333_vm0, %v195_v50  ;;  %v69_v49 = vld [vmem:[%s3745_s0 + $0x170] sm:$0xff]  ;;  %v227_v50 = vld [vmem:[%s3744_s1 + $0x188] sm:$0xff] }
  0x57   :  { %1894 = vmatprep.mubr.msk.f32.mxu1 %vm333_vm0, %v40_v51  ;;  %v72_v51 = vld [vmem:[%s3745_s0 + $0x188] sm:$0xff] }
  0x59   :  { %631 = vmatmul.mubr.f32.gmra.mrb[16].mxu0 %v194_v52  ;;  %v226_v52 = vld [vmem:[%s3744_s1 + $0x180] sm:$0xff] }
  0x5a   :  { %1208 = vmatmul.mubr.f32.gmra.mrb[16].mxu1 %v39_v53  ;;  %1831 = vmatprep.mubr.msk.f32.mxu0 %vm333_vm0, %v197_v54  ;;  %v71_v53 = vld [vmem:[%s3745_s0 + $0x180] sm:$0xff]  ;;  %v229_v54 = vld [vmem:[%s3744_s1 + $0x198] sm:$0xff] }
  0x5b   :  { %1895 = vmatprep.mubr.msk.f32.mxu1 %vm333_vm0, %v42_v55  ;;  %v74_v55 = vld [vmem:[%s3745_s0 + $0x198] sm:$0xff] }
  0x5d   :  { %636 = vmatmul.mubr.f32.gmra.mrb[18].mxu0 %v196_v56  ;;  %v228_v56 = vld [vmem:[%s3744_s1 + $0x190] sm:$0xff] }
  0x5e   :  { %1213 = vmatmul.mubr.f32.gmra.mrb[18].mxu1 %v41_v57  ;;  %1832 = vmatprep.mubr.msk.f32.mxu0 %vm333_vm0, %v199_v58  ;;  %v73_v57 = vld [vmem:[%s3745_s0 + $0x190] sm:$0xff]  ;;  %v231_v58 = vld [vmem:[%s3744_s1 + $0x1a8] sm:$0xff] }
  0x5f   :  { %1896 = vmatprep.mubr.msk.f32.mxu1 %vm333_vm0, %v44_v59  ;;  %v76_v59 = vld [vmem:[%s3745_s0 + $0x1a8] sm:$0xff] }
  0x61   :  { %641 = vmatmul.mubr.f32.gmra.mrb[20].mxu0 %v198_v60  ;;  %v230_v60 = vld [vmem:[%s3744_s1 + $0x1a0] sm:$0xff] }
  0x62   :  { %1218 = vmatmul.mubr.f32.gmra.mrb[20].mxu1 %v43_v61  ;;  %1833 = vmatprep.mubr.msk.f32.mxu0 %vm333_vm0, %v201_v62  ;;  %v75_v61 = vld [vmem:[%s3745_s0 + $0x1a0] sm:$0xff]  ;;  %v233_v62 = vld [vmem:[%s3744_s1 + $0x1b8] sm:$0xff] }
  0x63   :  { %1897 = vmatprep.mubr.msk.f32.mxu1 %vm333_vm0, %v46_v63  ;;  %v78_v63 = vld [vmem:[%s3745_s0 + $0x1b8] sm:$0xff] }
  0x65   :  { %646 = vmatmul.mubr.f32.gmra.mrb[22].mxu0 %v200_v1  ;;  %v232_v1 = vld [vmem:[%s3744_s1 + $0x1b0] sm:$0xff] }
  0x66   :  { %1223 = vmatmul.mubr.f32.gmra.mrb[22].mxu1 %v45_v2  ;;  %1834 = vmatprep.mubr.msk.f32.mxu0 %vm333_vm0, %v203_v3  ;;  %v77_v2 = vld [vmem:[%s3745_s0 + $0x1b0] sm:$0xff]  ;;  %v235_v3 = vld [vmem:[%s3744_s1 + $0x1c8] sm:$0xff] }
  0x67   :  { %1898 = vmatprep.mubr.msk.f32.mxu1 %vm333_vm0, %v48_v4  ;;  %v80_v4 = vld [vmem:[%s3745_s0 + $0x1c8] sm:$0xff] }
  0x69   :  { %651 = vmatmul.mubr.f32.gmra.mrb[24].mxu0 %v202_v5  ;;  %v234_v5 = vld [vmem:[%s3744_s1 + $0x1c0] sm:$0xff] }
  0x6a   :  { %1228 = vmatmul.mubr.f32.gmra.mrb[24].mxu1 %v47_v6  ;;  %1835 = vmatprep.mubr.msk.f32.mxu0 %vm333_vm0, %v205_v7  ;;  %v79_v6 = vld [vmem:[%s3745_s0 + $0x1c0] sm:$0xff]  ;;  %v237_v7 = vld [vmem:[%s3744_s1 + $0x1d8] sm:$0xff] }
  0x6b   :  { %1899 = vmatprep.mubr.msk.f32.mxu1 %vm333_vm0, %v50_v8  ;;  %v82_v8 = vld [vmem:[%s3745_s0 + $0x1d8] sm:$0xff] }
  0x6d   :  { %656 = vmatmul.mubr.f32.gmra.mrb[26].mxu0 %v204_v9  ;;  %v236_v9 = vld [vmem:[%s3744_s1 + $0x1d0] sm:$0xff] }
  0x6e   :  { %1233 = vmatmul.mubr.f32.gmra.mrb[26].mxu1 %v49_v10  ;;  %1836 = vmatprep.mubr.msk.f32.mxu0 %vm333_vm0, %v207_v11  ;;  %v81_v10 = vld [vmem:[%s3745_s0 + $0x1d0] sm:$0xff]  ;;  %v239_v11 = vld [vmem:[%s3744_s1 + $0x1e8] sm:$0xff] }
  0x6f   :  { %1900 = vmatprep.mubr.msk.f32.mxu1 %vm333_vm0, %v52_v12  ;;  %v84_v12 = vld [vmem:[%s3745_s0 + $0x1e8] sm:$0xff] }
  0x71   :  { %661 = vmatmul.mubr.f32.gmra.mrb[28].mxu0 %v206_v13  ;;  %v238_v13 = vld [vmem:[%s3744_s1 + $0x1e0] sm:$0xff] }
  0x72   :  { %1238 = vmatmul.mubr.f32.gmra.mrb[28].mxu1 %v51_v14  ;;  %1837 = vmatprep.mubr.msk.f32.mxu0 %vm333_vm0, %v209_v15  ;;  %v83_v14 = vld [vmem:[%s3745_s0 + $0x1e0] sm:$0xff]  ;;  %v241_v15 = vld [vmem:[%s3744_s1 + $0x1f8] sm:$0xff] }
  0x73   :  { %1901 = vmatprep.mubr.msk.f32.mxu1 %vm333_vm0, %v54_v16  ;;  %v86_v16 = vld [vmem:[%s3745_s0 + $0x1f8] sm:$0xff] }
  0x75   :  { %666 = vmatmul.mubr.f32.gmra.mrb[30].mxu0 %v208_v17  ;;  %v240_v17 = vld [vmem:[%s3744_s1 + $0x1f0] sm:$0xff] }
  0x76   :  { %1243 = vmatmul.mubr.f32.gmra.mrb[30].mxu1 %v53_v18  ;;  %1838 = vmatprep.mubr.msk.f32.mxu0 %vm333_vm0, %v211_v19  ;;  %v85_v18 = vld [vmem:[%s3745_s0 + $0x1f0] sm:$0xff]  ;;  %v243_v19 = vld [vmem:[%s3744_s1 + $0x208] sm:$0xff] }
  0x77   :  { %1902 = vmatprep.mubr.msk.f32.mxu1 %vm333_vm0, %v56_v20  ;;  %v88_v20 = vld [vmem:[%s3745_s0 + $0x208] sm:$0xff] }
  0x79   :  { %671 = vmatmul.mubr.f32.gmra.mrb[32].mxu0 %v210_v21  ;;  %v242_v21 = vld [vmem:[%s3744_s1 + $0x200] sm:$0xff] }
  0x7a   :  { %1248 = vmatmul.mubr.f32.gmra.mrb[32].mxu1 %v55_v0  ;;  %1839 = vmatprep.mubr.msk.f32.mxu0 %vm333_vm0, %v213_v22  ;;  %v87_v0 = vld [vmem:[%s3745_s0 + $0x200] sm:$0xff]  ;;  %v245_v22 = vld [vmem:[%s3744_s1 + $0x218] sm:$0xff] }
  0x7b   :  { %1903 = vmatprep.mubr.msk.f32.mxu1 %vm333_vm0, %v58_v23  ;;  %v90_v23 = vld [vmem:[%s3745_s0 + $0x218] sm:$0xff] }
  0x7d   :  { %676 = vmatmul.mubr.f32.gmra.mrb[34].mxu0 %v212_v24  ;;  %v244_v24 = vld [vmem:[%s3744_s1 + $0x210] sm:$0xff] }
  0x7e   :  { %1253 = vmatmul.mubr.f32.gmra.mrb[34].mxu1 %v57_v25  ;;  %1840 = vmatprep.mubr.msk.f32.mxu0 %vm333_vm0, %v215_v26  ;;  %v89_v25 = vld [vmem:[%s3745_s0 + $0x210] sm:$0xff]  ;;  %v247_v26 = vld [vmem:[%s3744_s1 + $0x228] sm:$0xff] }
  0x7f   :  { %1904 = vmatprep.mubr.msk.f32.mxu1 %vm333_vm0, %v60_v27  ;;  %v92_v27 = vld [vmem:[%s3745_s0 + $0x228] sm:$0xff] }
  0x81   :  { %681 = vmatmul.mubr.f32.gmra.mrb[36].mxu0 %v214_v28  ;;  %v246_v28 = vld [vmem:[%s3744_s1 + $0x220] sm:$0xff] }
  0x82   :  { %1258 = vmatmul.mubr.f32.gmra.mrb[36].mxu1 %v59_v29  ;;  %1841 = vmatprep.mubr.msk.f32.mxu0 %vm333_vm0, %v217_v30  ;;  %v91_v29 = vld [vmem:[%s3745_s0 + $0x220] sm:$0xff]  ;;  %v249_v30 = vld [vmem:[%s3744_s1 + $0x238] sm:$0xff] }
  0x83   :  { %1905 = vmatprep.mubr.msk.f32.mxu1 %vm333_vm0, %v62_v31  ;;  %v94_v31 = vld [vmem:[%s3745_s0 + $0x238] sm:$0xff] }
  0x85   :  { %686 = vmatmul.mubr.f32.gmra.mrb[38].mxu0 %v216_v32  ;;  %v248_v32 = vld [vmem:[%s3744_s1 + $0x230] sm:$0xff] }
  0x86   :  { %1263 = vmatmul.mubr.f32.gmra.mrb[38].mxu1 %v61_v33  ;;  %1842 = vmatprep.mubr.msk.f32.mxu0 %vm333_vm0, %v219_v34  ;;  %v93_v33 = vld [vmem:[%s3745_s0 + $0x230] sm:$0xff]  ;;  %v251_v34 = vld [vmem:[%s3744_s1 + $0x248] sm:$0xff] }
  0x87   :  { %1906 = vmatprep.mubr.msk.f32.mxu1 %vm333_vm0, %v64_v35  ;;  %v96_v35 = vld [vmem:[%s3745_s0 + $0x248] sm:$0xff] }
  0x89   :  { %691 = vmatmul.mubr.f32.gmra.mrb[40].mxu0 %v218_v36  ;;  %v250_v36 = vld [vmem:[%s3744_s1 + $0x240] sm:$0xff] }
  0x8a   :  { %1268 = vmatmul.mubr.f32.gmra.mrb[40].mxu1 %v63_v37  ;;  %1843 = vmatprep.mubr.msk.f32.mxu0 %vm333_vm0, %v221_v38  ;;  %v95_v37 = vld [vmem:[%s3745_s0 + $0x240] sm:$0xff]  ;;  %v253_v38 = vld [vmem:[%s3744_s1 + $0x258] sm:$0xff] }
  0x8b   :  { %1907 = vmatprep.mubr.msk.f32.mxu1 %vm333_vm0, %v66_v39  ;;  %v98_v39 = vld [vmem:[%s3745_s0 + $0x258] sm:$0xff] }
  0x8d   :  { %696 = vmatmul.mubr.f32.gmra.mrb[42].mxu0 %v220_v40  ;;  %v252_v40 = vld [vmem:[%s3744_s1 + $0x250] sm:$0xff] }
  0x8e   :  { %1273 = vmatmul.mubr.f32.gmra.mrb[42].mxu1 %v65_v41  ;;  %1844 = vmatprep.mubr.msk.f32.mxu0 %vm333_vm0, %v223_v42  ;;  %v97_v41 = vld [vmem:[%s3745_s0 + $0x250] sm:$0xff]  ;;  %v255_v42 = vld [vmem:[%s3744_s1 + $0x268] sm:$0xff] }
  0x8f   :  { %1908 = vmatprep.mubr.msk.f32.mxu1 %vm333_vm0, %v68_v43  ;;  %v100_v43 = vld [vmem:[%s3745_s0 + $0x268] sm:$0xff] }
  0x91   :  { %701 = vmatmul.mubr.f32.gmra.mrb[44].mxu0 %v222_v44  ;;  %v254_v44 = vld [vmem:[%s3744_s1 + $0x260] sm:$0xff] }
  0x92   :  { %1278 = vmatmul.mubr.f32.gmra.mrb[44].mxu1 %v67_v45  ;;  %1845 = vmatprep.mubr.msk.f32.mxu0 %vm333_vm0, %v225_v46  ;;  %v99_v45 = vld [vmem:[%s3745_s0 + $0x260] sm:$0xff]  ;;  %v257_v46 = vld [vmem:[%s3744_s1 + $0x278] sm:$0xff] }
  0x93   :  { %1909 = vmatprep.mubr.msk.f32.mxu1 %vm333_vm0, %v70_v47  ;;  %v102_v47 = vld [vmem:[%s3745_s0 + $0x278] sm:$0xff] }
  0x95   :  { %706 = vmatmul.mubr.f32.gmra.mrb[46].mxu0 %v224_v48  ;;  %v256_v48 = vld [vmem:[%s3744_s1 + $0x270] sm:$0xff] }
  0x96   :  { %1283 = vmatmul.mubr.f32.gmra.mrb[46].mxu1 %v69_v49  ;;  %1846 = vmatprep.mubr.msk.f32.mxu0 %vm333_vm0, %v227_v50  ;;  %v101_v49 = vld [vmem:[%s3745_s0 + $0x270] sm:$0xff]  ;;  %v259_v50 = vld [vmem:[%s3744_s1 + $0x288] sm:$0xff] }
  0x97   :  { %1910 = vmatprep.mubr.msk.f32.mxu1 %vm333_vm0, %v72_v51  ;;  %v104_v51 = vld [vmem:[%s3745_s0 + $0x288] sm:$0xff] }
  0x99   :  { %711 = vmatmul.mubr.f32.gmra.mrb[48].mxu0 %v226_v52  ;;  %v258_v52 = vld [vmem:[%s3744_s1 + $0x280] sm:$0xff] }
  0x9a   :  { %1288 = vmatmul.mubr.f32.gmra.mrb[48].mxu1 %v71_v53  ;;  %1847 = vmatprep.mubr.msk.f32.mxu0 %vm333_vm0, %v229_v54  ;;  %v103_v53 = vld [vmem:[%s3745_s0 + $0x280] sm:$0xff]  ;;  %v261_v54 = vld [vmem:[%s3744_s1 + $0x298] sm:$0xff] }
  0x9b   :  { %1911 = vmatprep.mubr.msk.f32.mxu1 %vm333_vm0, %v74_v55  ;;  %v106_v55 = vld [vmem:[%s3745_s0 + $0x298] sm:$0xff] }
  0x9d   :  { %716 = vmatmul.mubr.f32.gmra.mrb[50].mxu0 %v228_v56  ;;  %v260_v56 = vld [vmem:[%s3744_s1 + $0x290] sm:$0xff] }
  0x9e   :  { %1293 = vmatmul.mubr.f32.gmra.mrb[50].mxu1 %v73_v57  ;;  %1848 = vmatprep.mubr.msk.f32.mxu0 %vm333_vm0, %v231_v58  ;;  %v105_v57 = vld [vmem:[%s3745_s0 + $0x290] sm:$0xff]  ;;  %v263_v58 = vld [vmem:[%s3744_s1 + $0x2a8] sm:$0xff] }
  0x9f   :  { %1912 = vmatprep.mubr.msk.f32.mxu1 %vm333_vm0, %v76_v59  ;;  %v108_v59 = vld [vmem:[%s3745_s0 + $0x2a8] sm:$0xff] }
  0xa1   :  { %721 = vmatmul.mubr.f32.gmra.mrb[52].mxu0 %v230_v60  ;;  %v262_v60 = vld [vmem:[%s3744_s1 + $0x2a0] sm:$0xff] }
  0xa2   :  { %1298 = vmatmul.mubr.f32.gmra.mrb[52].mxu1 %v75_v61  ;;  %1849 = vmatprep.mubr.msk.f32.mxu0 %vm333_vm0, %v233_v62  ;;  %v107_v61 = vld [vmem:[%s3745_s0 + $0x2a0] sm:$0xff]  ;;  %v265_v62 = vld [vmem:[%s3744_s1 + $0x2b8] sm:$0xff] }
  0xa3   :  { %1913 = vmatprep.mubr.msk.f32.mxu1 %vm333_vm0, %v78_v63  ;;  %v110_v63 = vld [vmem:[%s3745_s0 + $0x2b8] sm:$0xff] }
  0xa5   :  { %726 = vmatmul.mubr.f32.gmra.mrb[54].mxu0 %v232_v1  ;;  %v264_v1 = vld [vmem:[%s3744_s1 + $0x2b0] sm:$0xff] }
  0xa6   :  { %1303 = vmatmul.mubr.f32.gmra.mrb[54].mxu1 %v77_v2  ;;  %1850 = vmatprep.mubr.msk.f32.mxu0 %vm333_vm0, %v235_v3  ;;  %v109_v2 = vld [vmem:[%s3745_s0 + $0x2b0] sm:$0xff]  ;;  %v267_v3 = vld [vmem:[%s3744_s1 + $0x2c8] sm:$0xff] }
  0xa7   :  { %1914 = vmatprep.mubr.msk.f32.mxu1 %vm333_vm0, %v80_v4  ;;  %v112_v4 = vld [vmem:[%s3745_s0 + $0x2c8] sm:$0xff] }
  0xa9   :  { %731 = vmatmul.mubr.f32.gmra.mrb[56].mxu0 %v234_v5  ;;  %v266_v5 = vld [vmem:[%s3744_s1 + $0x2c0] sm:$0xff] }
  0xaa   :  { %1308 = vmatmul.mubr.f32.gmra.mrb[56].mxu1 %v79_v6  ;;  %1851 = vmatprep.mubr.msk.f32.mxu0 %vm333_vm0, %v237_v7  ;;  %v111_v6 = vld [vmem:[%s3745_s0 + $0x2c0] sm:$0xff]  ;;  %v269_v7 = vld [vmem:[%s3744_s1 + $0x2d8] sm:$0xff] }
  0xab   :  { %1915 = vmatprep.mubr.msk.f32.mxu1 %vm333_vm0, %v82_v8  ;;  %v114_v8 = vld [vmem:[%s3745_s0 + $0x2d8] sm:$0xff] }
  0xad   :  { %736 = vmatmul.mubr.f32.gmra.mrb[58].mxu0 %v236_v9  ;;  %v268_v9 = vld [vmem:[%s3744_s1 + $0x2d0] sm:$0xff] }
  0xae   :  { %1313 = vmatmul.mubr.f32.gmra.mrb[58].mxu1 %v81_v10  ;;  %1852 = vmatprep.mubr.msk.f32.mxu0 %vm333_vm0, %v239_v11  ;;  %v113_v10 = vld [vmem:[%s3745_s0 + $0x2d0] sm:$0xff]  ;;  %v271_v11 = vld [vmem:[%s3744_s1 + $0x2e8] sm:$0xff] }
  0xaf   :  { %1916 = vmatprep.mubr.msk.f32.mxu1 %vm333_vm0, %v84_v12  ;;  %v116_v12 = vld [vmem:[%s3745_s0 + $0x2e8] sm:$0xff] }
  0xb1   :  { %741 = vmatmul.mubr.f32.gmra.mrb[60].mxu0 %v238_v13  ;;  %v270_v13 = vld [vmem:[%s3744_s1 + $0x2e0] sm:$0xff] }
  0xb2   :  { %1318 = vmatmul.mubr.f32.gmra.mrb[60].mxu1 %v83_v14  ;;  %1853 = vmatprep.mubr.msk.f32.mxu0 %vm333_vm0, %v241_v15  ;;  %v115_v14 = vld [vmem:[%s3745_s0 + $0x2e0] sm:$0xff]  ;;  %v273_v15 = vld [vmem:[%s3744_s1 + $0x2f8] sm:$0xff] }
  0xb3   :  { %1917 = vmatprep.mubr.msk.f32.mxu1 %vm333_vm0, %v86_v16  ;;  %v118_v16 = vld [vmem:[%s3745_s0 + $0x2f8] sm:$0xff] }
  0xb5   :  { %746 = vmatmul.mubr.f32.gmra.mrb[62].mxu0 %v240_v17  ;;  %v272_v17 = vld [vmem:[%s3744_s1 + $0x2f0] sm:$0xff] }
  0xb6   :  { %1323 = vmatmul.mubr.f32.gmra.mrb[62].mxu1 %v85_v18  ;;  %1854 = vmatprep.mubr.msk.f32.mxu0 %vm333_vm0, %v243_v19  ;;  %v117_v18 = vld [vmem:[%s3745_s0 + $0x2f0] sm:$0xff]  ;;  %v275_v19 = vld [vmem:[%s3744_s1 + $0x308] sm:$0xff] }
  0xb7   :  { %1918 = vmatprep.mubr.msk.f32.mxu1 %vm333_vm0, %v88_v20  ;;  %v120_v20 = vld [vmem:[%s3745_s0 + $0x308] sm:$0xff] }
  0xb9   :  { %751 = vmatmul.mubr.f32.gmra.mrb[64].mxu0 %v242_v21  ;;  %v274_v21 = vld [vmem:[%s3744_s1 + $0x300] sm:$0xff] }
  0xba   :  { %1328 = vmatmul.mubr.f32.gmra.mrb[64].mxu1 %v87_v0  ;;  %1855 = vmatprep.mubr.msk.f32.mxu0 %vm333_vm0, %v245_v22  ;;  %v119_v0 = vld [vmem:[%s3745_s0 + $0x300] sm:$0xff]  ;;  %v277_v22 = vld [vmem:[%s3744_s1 + $0x318] sm:$0xff] }
  0xbb   :  { %1919 = vmatprep.mubr.msk.f32.mxu1 %vm333_vm0, %v90_v23  ;;  %v122_v23 = vld [vmem:[%s3745_s0 + $0x318] sm:$0xff] }
  0xbd   :  { %756 = vmatmul.mubr.f32.gmra.mrb[66].mxu0 %v244_v24  ;;  %v276_v24 = vld [vmem:[%s3744_s1 + $0x310] sm:$0xff] }
  0xbe   :  { %1333 = vmatmul.mubr.f32.gmra.mrb[66].mxu1 %v89_v25  ;;  %1856 = vmatprep.mubr.msk.f32.mxu0 %vm333_vm0, %v247_v26  ;;  %v121_v25 = vld [vmem:[%s3745_s0 + $0x310] sm:$0xff]  ;;  %v279_v26 = vld [vmem:[%s3744_s1 + $0x328] sm:$0xff] }
  0xbf   :  { %1920 = vmatprep.mubr.msk.f32.mxu1 %vm333_vm0, %v92_v27  ;;  %v124_v27 = vld [vmem:[%s3745_s0 + $0x328] sm:$0xff] }
  0xc1   :  { %761 = vmatmul.mubr.f32.gmra.mrb[68].mxu0 %v246_v28  ;;  %v278_v28 = vld [vmem:[%s3744_s1 + $0x320] sm:$0xff] }
  0xc2   :  { %1338 = vmatmul.mubr.f32.gmra.mrb[68].mxu1 %v91_v29  ;;  %1857 = vmatprep.mubr.msk.f32.mxu0 %vm333_vm0, %v249_v30  ;;  %v123_v29 = vld [vmem:[%s3745_s0 + $0x320] sm:$0xff]  ;;  %v281_v30 = vld [vmem:[%s3744_s1 + $0x338] sm:$0xff] }
  0xc3   :  { %1921 = vmatprep.mubr.msk.f32.mxu1 %vm333_vm0, %v94_v31  ;;  %v126_v31 = vld [vmem:[%s3745_s0 + $0x338] sm:$0xff] }
  0xc5   :  { %766 = vmatmul.mubr.f32.gmra.mrb[70].mxu0 %v248_v32  ;;  %v280_v32 = vld [vmem:[%s3744_s1 + $0x330] sm:$0xff] }
  0xc6   :  { %1343 = vmatmul.mubr.f32.gmra.mrb[70].mxu1 %v93_v33  ;;  %1858 = vmatprep.mubr.msk.f32.mxu0 %vm333_vm0, %v251_v34  ;;  %v125_v33 = vld [vmem:[%s3745_s0 + $0x330] sm:$0xff]  ;;  %v283_v34 = vld [vmem:[%s3744_s1 + $0x348] sm:$0xff] }
  0xc7   :  { %1922 = vmatprep.mubr.msk.f32.mxu1 %vm333_vm0, %v96_v35  ;;  %v128_v35 = vld [vmem:[%s3745_s0 + $0x348] sm:$0xff] }
  0xc9   :  { %771 = vmatmul.mubr.f32.gmra.mrb[72].mxu0 %v250_v36  ;;  %v282_v36 = vld [vmem:[%s3744_s1 + $0x340] sm:$0xff] }
  0xca   :  { %1348 = vmatmul.mubr.f32.gmra.mrb[72].mxu1 %v95_v37  ;;  %1859 = vmatprep.mubr.msk.f32.mxu0 %vm333_vm0, %v253_v38  ;;  %v127_v37 = vld [vmem:[%s3745_s0 + $0x340] sm:$0xff]  ;;  %v285_v38 = vld [vmem:[%s3744_s1 + $0x358] sm:$0xff] }
  0xcb   :  { %1923 = vmatprep.mubr.msk.f32.mxu1 %vm333_vm0, %v98_v39  ;;  %v130_v39 = vld [vmem:[%s3745_s0 + $0x358] sm:$0xff] }
  0xcd   :  { %776 = vmatmul.mubr.f32.gmra.mrb[74].mxu0 %v252_v40  ;;  %v1623_v40 = vlaneseq }
  0xce   :  { %1353 = vmatmul.mubr.f32.gmra.mrb[74].mxu1 %v97_v41  ;;  %1860 = vmatprep.mubr.msk.f32.mxu0 %vm333_vm0, %v255_v42  ;;  %v284_v41 = vld [vmem:[%s3744_s1 + $0x350] sm:$0xff] }
  0xcf   :  { %1924 = vmatprep.mubr.msk.f32.mxu1 %vm333_vm0, %v100_v43  ;;  %v129_v42 = vld [vmem:[%s3745_s0 + $0x350] sm:$0xff]  ;;  %v287_v43 = vld [vmem:[%s3744_s1 + $0x368] sm:$0xff] }
  0xd1   :  { %781 = vmatmul.mubr.f32.gmra.mrb[76].mxu0 %v254_v44 }
  0xd2   :  { %1358 = vmatmul.mubr.f32.gmra.mrb[76].mxu1 %v99_v45  ;;  %1861 = vmatprep.mubr.msk.f32.mxu0 %vm333_vm0, %v257_v46  ;;  %v132_v45 = vld [vmem:[%s3745_s0 + $0x368] sm:$0xff] }
  0xd3   :  { %1925 = vmatprep.mubr.msk.f32.mxu1 %vm333_vm0, %v102_v47  ;;  %v3022_v47 = vld [vmem:[%s3746_s4] ss:$0 sm:$0xff] }
  0xd5   :  { %786 = vmatmul.mubr.f32.gmra.mrb[78].mxu0 %v256_v48  ;;  %v3024_v48 = vand.u32 127, %v1623_v40  ;;  %v139_v40 = vld [vmem:[%s3745_s0 + $0x3a0] sm:$0xff] }
  0xd6   :  { %1363 = vmatmul.mubr.f32.gmra.mrb[78].mxu1 %v101_v49  ;;  %1862 = vmatprep.mubr.msk.f32.mxu0 %vm333_vm0, %v259_v50 }
  0xd7   :  { %1926 = vmatprep.mubr.msk.f32.mxu1 %vm333_vm0, %v104_v51  ;;  %vm1625_vm1 = vcmp.lt.s32.totalorder %v3024_v48, 64 }
  0xd9   :  { %791 = vmatmul.mubr.f32.gmra.mrb[80].mxu0 %v258_v52  ;;  %v286_v52 = vld [vmem:[%s3744_s1 + $0x360] sm:$0xff] }
  0xda   :  { %1368 = vmatmul.mubr.f32.gmra.mrb[80].mxu1 %v103_v53  ;;  %1863 = vmatprep.mubr.msk.f32.mxu0 %vm333_vm0, %v261_v54  ;;  %v131_v53 = vld [vmem:[%s3745_s0 + $0x360] sm:$0xff]  ;;  %v289_v54 = vld [vmem:[%s3744_s1 + $0x378] sm:$0xff] }
  0xdb   :  { %1927 = vmatprep.mubr.msk.f32.mxu1 %vm333_vm0, %v106_v55 }
  0xdd   :  { %796 = vmatmul.mubr.f32.gmra.mrb[82].mxu0 %v260_v56 }
  0xde   :  { %1373 = vmatmul.mubr.f32.gmra.mrb[82].mxu1 %v105_v57  ;;  %1864 = vmatprep.mubr.msk.f32.mxu0 %vm333_vm0, %v263_v58  ;;  %v134_v57 = vld [vmem:[%s3745_s0 + $0x378] sm:$0xff]  ;;  %v1626_v58 = vld [vmem:[%s3747_s5] sm:$0xff] }
  0xdf   :  { %1928 = vmatprep.mubr.msk.f32.mxu1 %vm333_vm0, %v108_v59 }
  0xe1   :  { %801 = vmatmul.mubr.f32.gmra.mrb[84].mxu0 %v262_v60 }
  0xe2   :  { %1378 = vmatmul.mubr.f32.gmra.mrb[84].mxu1 %v107_v61  ;;  %1865 = vmatprep.mubr.msk.f32.mxu0 %vm333_vm0, %v265_v62 }
  0xe3   :  { %1929 = vmatprep.mubr.msk.f32.mxu1 %vm333_vm0, %v110_v63 }
  0xe5   :  { %806 = vmatmul.mubr.f32.gmra.mrb[86].mxu0 %v264_v1  ;;  %v288_v1 = vld [vmem:[%s3744_s1 + $0x370] sm:$0xff] }
  0xe6   :  { %1383 = vmatmul.mubr.f32.gmra.mrb[86].mxu1 %v109_v2  ;;  %1866 = vmatprep.mubr.msk.f32.mxu0 %vm333_vm0, %v267_v3  ;;  %v133_v2 = vld [vmem:[%s3745_s0 + $0x370] sm:$0xff]  ;;  %v291_v3 = vld [vmem:[%s3744_s1 + $0x388] sm:$0xff] }
  0xe7   :  { %1930 = vmatprep.mubr.msk.f32.mxu1 %vm333_vm0, %v112_v4 }
  0xe9   :  { %811 = vmatmul.mubr.f32.gmra.mrb[88].mxu0 %v266_v5 }
  0xea   :  { %1388 = vmatmul.mubr.f32.gmra.mrb[88].mxu1 %v111_v6  ;;  %1867 = vmatprep.mubr.msk.f32.mxu0 %vm333_vm0, %v269_v7  ;;  %v136_v7 = vld [vmem:[%s3745_s0 + $0x388] sm:$0xff] }
  0xeb   :  { %1931 = vmatprep.mubr.msk.f32.mxu1 %vm333_vm0, %v114_v8  ;;  %v1627_v8 = vld [vmem:[%s3747_s5 + $0x8] sm:$0xff] }
  0xed   :  { %816 = vmatmul.mubr.f32.gmra.mrb[90].mxu0 %v268_v9 }
  0xee   :  { %1393 = vmatmul.mubr.f32.gmra.mrb[90].mxu1 %v113_v10  ;;  %1868 = vmatprep.mubr.msk.f32.mxu0 %vm333_vm0, %v271_v11 }
  0xef   :  { %1932 = vmatprep.mubr.msk.f32.mxu1 %vm333_vm0, %v116_v12 }
  0xf1   :  { %821 = vmatmul.mubr.f32.gmra.mrb[92].mxu0 %v270_v13 }
  0xf2   :  { %1398 = vmatmul.mubr.f32.gmra.mrb[92].mxu1 %v115_v14  ;;  %1869 = vmatprep.mubr.msk.f32.mxu0 %vm333_vm0, %v273_v15  ;;  %v290_v14 = vld [vmem:[%s3744_s1 + $0x380] sm:$0xff] }
  0xf3   :  { %1933 = vmatprep.mubr.msk.f32.mxu1 %vm333_vm0, %v118_v16  ;;  %v135_v15 = vld [vmem:[%s3745_s0 + $0x380] sm:$0xff]  ;;  %v293_v16 = vld [vmem:[%s3744_s1 + $0x398] sm:$0xff] }
  0xf5   :  { %826 = vmatmul.mubr.f32.gmra.mrb[94].mxu0 %v272_v17 }
  0xf6   :  { %1403 = vmatmul.mubr.f32.gmra.mrb[94].mxu1 %v117_v18  ;;  %1870 = vmatprep.mubr.msk.f32.mxu0 %vm333_vm0, %v275_v19 }
  0xf7   :  { %1934 = vmatprep.mubr.msk.f32.mxu1 %vm333_vm0, %v120_v20  ;;  %v138_v20 = vld [vmem:[%s3745_s0 + $0x398] sm:$0xff] }
  0xf9   :  { %831 = vmatmul.mubr.f32.gmra.mrb[96].mxu0 %v274_v21  ;;  %v1628_v21 = vld [vmem:[%s3747_s5 + $0x10] sm:$0xff] }
  0xfa   :  { %1408 = vmatmul.mubr.f32.gmra.mrb[96].mxu1 %v119_v0  ;;  %1871 = vmatprep.mubr.msk.f32.mxu0 %vm333_vm0, %v277_v22 }
  0xfb   :  { %1935 = vmatprep.mubr.msk.f32.mxu1 %vm333_vm0, %v122_v23 }
  0xfd   :  { %836 = vmatmul.mubr.f32.gmra.mrb[98].mxu0 %v276_v24 }
  0xfe   :  { %1413 = vmatmul.mubr.f32.gmra.mrb[98].mxu1 %v121_v25  ;;  %1872 = vmatprep.mubr.msk.f32.mxu0 %vm333_vm0, %v279_v26  ;;  %v292_v26 = vld [vmem:[%s3744_s1 + $0x390] sm:$0xff] }
  0xff   :  { %1936 = vmatprep.mubr.msk.f32.mxu1 %vm333_vm0, %v124_v27  ;;  %v137_v27 = vld [vmem:[%s3745_s0 + $0x390] sm:$0xff] }
 0x101   :  { %841 = vmatmul.mubr.f32.gmra.mrb[100].mxu0 %v278_v28  ;;  %v295_v28 = vld [vmem:[%s3744_s1 + $0x3a8] sm:$0xff] }
 0x102   :  { %1418 = vmatmul.mubr.f32.gmra.mrb[100].mxu1 %v123_v29  ;;  %1873 = vmatprep.mubr.msk.f32.mxu0 %vm333_vm0, %v281_v30 }
 0x103   :  { %1937 = vmatprep.mubr.msk.f32.mxu1 %vm333_vm0, %v126_v31 }
 0x105   :  { %846 = vmatmul.mubr.f32.gmra.mrb[102].mxu0 %v280_v32  ;;  %v140_v32 = vld [vmem:[%s3745_s0 + $0x3a8] sm:$0xff] }
 0x106   :  { %1423 = vmatmul.mubr.f32.gmra.mrb[102].mxu1 %v125_v33  ;;  %1874 = vmatprep.mubr.msk.f32.mxu0 %vm333_vm0, %v283_v34  ;;  %v1629_v33 = vld [vmem:[%s3747_s5 + $0x18] sm:$0xff] }
 0x107   :  { %1938 = vmatprep.mubr.msk.f32.mxu1 %vm333_vm0, %v128_v35 }
 0x109   :  { %851 = vmatmul.mubr.f32.gmra.mrb[104].mxu0 %v282_v36 }
 0x10a   :  { %1428 = vmatmul.mubr.f32.gmra.mrb[104].mxu1 %v127_v37  ;;  %1875 = vmatprep.mubr.msk.f32.mxu0 %vm333_vm0, %v285_v38 }
 0x10b   :  { %1939 = vmatprep.mubr.msk.f32.mxu1 %vm333_vm0, %v130_v39  ;;  %v294_v39 = vld [vmem:[%s3744_s1 + $0x3a0] sm:$0xff] }
 0x10c   :  { %v592_v44 = vpop.f32.mrb[0].mxu0 }
 0x10d   :  { %v1169_v46 = vpop.f32.mrb[0].mxu1  ;;  %v594_v49 = vpop.f32.mrb[1].mxu0  ;;  %856 = vmatmul.mubr.f32.gmra.mrb[106].mxu0 %v284_v41  ;;  %v297_v41 = vld [vmem:[%s3744_s1 + $0x3b8] sm:$0xff] }
 0x10e   :  { %v1170_v50 = vadd.f32 %v1169_v46, %v592_v44  ;;  %v1171_v51 = vpop.f32.mrb[1].mxu1  ;;  %1433 = vmatmul.mubr.f32.gmra.mrb[106].mxu1 %v129_v42  ;;  %1876 = vmatprep.mubr.msk.f32.mxu0 %vm333_vm0, %v287_v43  ;;  %v1630_v46 = vld [vmem:[%s3747_s5 + $0x20] sm:$0xff] }
 0x10f   :  { %1940 = vmatprep.mubr.msk.f32.mxu1 %vm333_vm0, %v132_v45  ;;  %v142_v45 = vld [vmem:[%s3745_s0 + $0x3b8] sm:$0xff] }
 0x110   :  { %v1495_v55 = vadd.f32 %v3022_v47, %v1170_v50  ;;  %v597_v56 = vpop.f32.mrb[2].mxu0 }
 0x111   :  { %v1174_v59 = vpop.f32.mrb[2].mxu1  ;;  %v599_v60 = vpop.f32.mrb[3].mxu0  ;;  %861 = vmatmul.mubr.f32.gmra.mrb[108].mxu0 %v286_v52 }
 0x112   :  { %v1559_v61 = vmax.f32 %v1495_v55, 0.0  ;;  %v1175_v62 = vadd.f32 %v1174_v59, %v597_v56  ;;  %v1176_v63 = vpop.f32.mrb[3].mxu1  ;;  %1438 = vmatmul.mubr.f32.gmra.mrb[108].mxu1 %v131_v53  ;;  %1877 = vmatprep.mubr.msk.f32.mxu0 %vm333_vm0, %v289_v54  ;;  %v296_v54 = vld [vmem:[%s3744_s1 + $0x3b0] sm:$0xff]  ;;  %v299_v56 = vld [vmem:[%s3744_s1 + $0x3c8] sm:$0xff] }
 0x113   :  { %1941 = vmatprep.mubr.msk.f32.mxu1 %vm333_vm0, %v134_v57  ;;  %v141_v55 = vld [vmem:[%s3745_s0 + $0x3b0] sm:$0xff]  ;;  %v144_v60 = vld [vmem:[%s3745_s0 + $0x3c8] sm:$0xff] }
 0x114   :  { %v1690_v4 = vsel %vm1625_vm1, %v1626_v58, %v1559_v61  ;;  %v1496_v5 = vadd.f32 %v3022_v47, %v1175_v62  ;;  %v602_v6 = vpop.f32.mrb[4].mxu0  ;;  %v1631_v61 = vld [vmem:[%s3747_s5 + $0x28] sm:$0xff] }
 0x115   :  { %1754 = vst [vmem:[%s3748_s6] sm:$0xff] %v1690_v4  ;;  %v1179_v9 = vpop.f32.mrb[4].mxu1  ;;  %v604_v10 = vpop.f32.mrb[5].mxu0  ;;  %866 = vmatmul.mubr.f32.gmra.mrb[110].mxu0 %v288_v1  ;;  %v298_v4 = vld [vmem:[%s3744_s1 + $0x3c0] sm:$0xff] }
 0x116   :  { %v1560_v11 = vmax.f32 %v1496_v5, 0.0  ;;  %v1180_v12 = vadd.f32 %v1179_v9, %v602_v6  ;;  %v1181_v13 = vpop.f32.mrb[5].mxu1  ;;  %1443 = vmatmul.mubr.f32.gmra.mrb[110].mxu1 %v133_v2  ;;  %1878 = vmatprep.mubr.msk.f32.mxu0 %vm333_vm0, %v291_v3  ;;  %v143_v5 = vld [vmem:[%s3745_s0 + $0x3c0] sm:$0xff]  ;;  %v301_v6 = vld [vmem:[%s3744_s1 + $0x3d8] sm:$0xff] }
 0x117   :  { %1942 = vmatprep.mubr.msk.f32.mxu1 %vm333_vm0, %v136_v7  ;;  %v146_v10 = vld [vmem:[%s3745_s0 + $0x3d8] sm:$0xff] }
 0x118   :  { %v1691_v17 = vsel %vm1625_vm1, %v1627_v8, %v1560_v11  ;;  %v1497_v18 = vadd.f32 %v3022_v47, %v1180_v12  ;;  %v607_v19 = vpop.f32.mrb[6].mxu0  ;;  %v1632_v11 = vld [vmem:[%s3747_s5 + $0x30] sm:$0xff] }
 0x119   :  { %1755 = vst [vmem:[%s3748_s6 + $0x8] sm:$0xff] %v1691_v17  ;;  %v1184_v0 = vpop.f32.mrb[6].mxu1  ;;  %v609_v22 = vpop.f32.mrb[7].mxu0  ;;  %871 = vmatmul.mubr.f32.gmra.mrb[112].mxu0 %v290_v14  ;;  %v300_v17 = vld [vmem:[%s3744_s1 + $0x3d0] sm:$0xff] }
 0x11a   :  { %v1561_v23 = vmax.f32 %v1497_v18, 0.0  ;;  %v1185_v24 = vadd.f32 %v1184_v0, %v607_v19  ;;  %v1186_v25 = vpop.f32.mrb[7].mxu1  ;;  %1448 = vmatmul.mubr.f32.gmra.mrb[112].mxu1 %v135_v15  ;;  %1879 = vmatprep.mubr.msk.f32.mxu0 %vm333_vm0, %v293_v16  ;;  %v145_v18 = vld [vmem:[%s3745_s0 + $0x3d0] sm:$0xff]  ;;  %v303_v19 = vld [vmem:[%s3744_s1 + $0x3e8] sm:$0xff] }
 0x11b   :  { %1943 = vmatprep.mubr.msk.f32.mxu1 %vm333_vm0, %v138_v20  ;;  %v148_v22 = vld [vmem:[%s3745_s0 + $0x3e8] sm:$0xff] }
 0x11c   :  { %v1692_v29 = vsel %vm1625_vm1, %v1628_v21, %v1561_v23  ;;  %v1498_v30 = vadd.f32 %v3022_v47, %v1185_v24  ;;  %v612_v31 = vpop.f32.mrb[8].mxu0  ;;  %v1633_v23 = vld [vmem:[%s3747_s5 + $0x38] sm:$0xff] }
 0x11d   :  { %1756 = vst [vmem:[%s3748_s6 + $0x10] sm:$0xff] %v1692_v29  ;;  %v1189_v34 = vpop.f32.mrb[8].mxu1  ;;  %v614_v35 = vpop.f32.mrb[9].mxu0  ;;  %876 = vmatmul.mubr.f32.gmra.mrb[114].mxu0 %v292_v26  ;;  %v302_v29 = vld [vmem:[%s3744_s1 + $0x3e0] sm:$0xff] }
 0x11e   :  { %v1562_v36 = vmax.f32 %v1498_v30, 0.0  ;;  %v1190_v37 = vadd.f32 %v1189_v34, %v612_v31  ;;  %v1191_v38 = vpop.f32.mrb[9].mxu1  ;;  %1453 = vmatmul.mubr.f32.gmra.mrb[114].mxu1 %v137_v27  ;;  %1880 = vmatprep.mubr.msk.f32.mxu0 %vm333_vm0, %v295_v28  ;;  %v147_v30 = vld [vmem:[%s3745_s0 + $0x3e0] sm:$0xff]  ;;  %v305_v31 = vld [vmem:[%s3744_s1 + $0x3f8] sm:$0xff] }
 0x11f   :  { %1944 = vmatprep.mubr.msk.f32.mxu1 %vm333_vm0, %v140_v32  ;;  %v150_v35 = vld [vmem:[%s3745_s0 + $0x3f8] sm:$0xff] }
 0x120   :  { %v1693_v42 = vsel %vm1625_vm1, %v1629_v33, %v1562_v36  ;;  %v1499_v43 = vadd.f32 %v3022_v47, %v1190_v37  ;;  %v617_v44 = vpop.f32.mrb[10].mxu0  ;;  %v1634_v36 = vld [vmem:[%s3747_s5 + $0x40] sm:$0xff] }
 0x121   :  { %1757 = vst [vmem:[%s3748_s6 + $0x18] sm:$0xff] %v1693_v42  ;;  %v1194_v49 = vpop.f32.mrb[10].mxu1  ;;  %v619_v50 = vpop.f32.mrb[11].mxu0  ;;  %881 = vmatmul.mubr.f32.gmra.mrb[116].mxu0 %v294_v39  ;;  %v304_v42 = vld [vmem:[%s3744_s1 + $0x3f0] sm:$0xff] }
 0x122   :  { %v1563_v51 = vmax.f32 %v1499_v43, 0.0  ;;  %v1195_v52 = vadd.f32 %v1194_v49, %v617_v44  ;;  %v1196_v53 = vpop.f32.mrb[11].mxu1  ;;  %1458 = vmatmul.mubr.f32.gmra.mrb[116].mxu1 %v139_v40  ;;  %1881 = vmatprep.mubr.msk.f32.mxu0 %vm333_vm0, %v297_v41  ;;  %v149_v43 = vld [vmem:[%s3745_s0 + $0x3f0] sm:$0xff]  ;;  %v1635_v49 = vld [vmem:[%s3747_s5 + $0x48] sm:$0xff] }
 0x123   :  { %1945 = vmatprep.mubr.msk.f32.mxu1 %vm333_vm0, %v142_v45 }
 0x124   :  { %v1694_v57 = vsel %vm1625_vm1, %v1630_v46, %v1563_v51  ;;  %v1500_v58 = vadd.f32 %v3022_v47, %v1195_v52  ;;  %v622_v59 = vpop.f32.mrb[12].mxu0 }
 0x125   :  { %1758 = vst [vmem:[%s3748_s6 + $0x20] sm:$0xff] %v1694_v57  ;;  %v1199_v62 = vpop.f32.mrb[12].mxu1  ;;  %v624_v63 = vpop.f32.mrb[13].mxu0  ;;  %886 = vmatmul.mubr.f32.gmra.mrb[118].mxu0 %v296_v54 }
 0x126   :  { %v1564_v1 = vmax.f32 %v1500_v58, 0.0  ;;  %v1200_v2 = vadd.f32 %v1199_v62, %v622_v59  ;;  %v1201_v3 = vpop.f32.mrb[13].mxu1  ;;  %1463 = vmatmul.mubr.f32.gmra.mrb[118].mxu1 %v141_v55  ;;  %1882 = vmatprep.mubr.msk.f32.mxu0 %vm333_vm0, %v299_v56  ;;  %v1636_v58 = vld [vmem:[%s3747_s5 + $0x50] sm:$0xff] }
 0x127   :  { %1946 = vmatprep.mubr.msk.f32.mxu1 %vm333_vm0, %v144_v60 }
 0x128   :  { %v1695_v7 = vsel %vm1625_vm1, %v1631_v61, %v1564_v1  ;;  %v1501_v8 = vadd.f32 %v3022_v47, %v1200_v2  ;;  %v627_v9 = vpop.f32.mrb[14].mxu0 }
 0x129   :  { %1759 = vst [vmem:[%s3748_s6 + $0x28] sm:$0xff] %v1695_v7  ;;  %v1204_v12 = vpop.f32.mrb[14].mxu1  ;;  %v629_v13 = vpop.f32.mrb[15].mxu0  ;;  %891 = vmatmul.mubr.f32.gmra.mrb[120].mxu0 %v298_v4  ;;  %v1637_v4 = vld [vmem:[%s3747_s5 + $0x58] sm:$0xff] }
 0x12a   :  { %v1565_v14 = vmax.f32 %v1501_v8, 0.0  ;;  %v1205_v15 = vadd.f32 %v1204_v12, %v627_v9  ;;  %v1206_v16 = vpop.f32.mrb[15].mxu1  ;;  %1468 = vmatmul.mubr.f32.gmra.mrb[120].mxu1 %v143_v5  ;;  %1883 = vmatprep.mubr.msk.f32.mxu0 %vm333_vm0, %v301_v6  ;;  %v1638_v13 = vld [vmem:[%s3747_s5 + $0x60] sm:$0xff] }
 0x12b   :  { %1947 = vmatprep.mubr.msk.f32.mxu1 %vm333_vm0, %v146_v10 }
 0x12c   :  { %v1696_v20 = vsel %vm1625_vm1, %v1632_v11, %v1565_v14  ;;  %v1502_v21 = vadd.f32 %v3022_v47, %v1205_v15  ;;  %v632_v0 = vpop.f32.mrb[16].mxu0 }
 0x12d   :  { %1760 = vst [vmem:[%s3748_s6 + $0x30] sm:$0xff] %v1696_v20  ;;  %v1209_v24 = vpop.f32.mrb[16].mxu1  ;;  %v634_v25 = vpop.f32.mrb[17].mxu0  ;;  %896 = vmatmul.mubr.f32.gmra.mrb[122].mxu0 %v300_v17 }
 0x12e   :  { %v1566_v26 = vmax.f32 %v1502_v21, 0.0  ;;  %v1210_v27 = vadd.f32 %v1209_v24, %v632_v0  ;;  %v1211_v28 = vpop.f32.mrb[17].mxu1  ;;  %1473 = vmatmul.mubr.f32.gmra.mrb[122].mxu1 %v145_v18  ;;  %1884 = vmatprep.mubr.msk.f32.mxu0 %vm333_vm0, %v303_v19  ;;  %v1639_v0 = vld [vmem:[%s3747_s5 + $0x68] sm:$0xff] }
 0x12f   :  { %1948 = vmatprep.mubr.msk.f32.mxu1 %vm333_vm0, %v148_v22 }
 0x130   :  { %v1697_v32 = vsel %vm1625_vm1, %v1633_v23, %v1566_v26  ;;  %v1503_v33 = vadd.f32 %v3022_v47, %v1210_v27  ;;  %v637_v34 = vpop.f32.mrb[18].mxu0 }
 0x131   :  { %1761 = vst [vmem:[%s3748_s6 + $0x38] sm:$0xff] %v1697_v32  ;;  %v1214_v37 = vpop.f32.mrb[18].mxu1  ;;  %v639_v38 = vpop.f32.mrb[19].mxu0  ;;  %901 = vmatmul.mubr.f32.gmra.mrb[124].mxu0 %v302_v29 }
 0x132   :  { %v1567_v39 = vmax.f32 %v1503_v33, 0.0  ;;  %v1215_v40 = vadd.f32 %v1214_v37, %v637_v34  ;;  %v1216_v41 = vpop.f32.mrb[19].mxu1  ;;  %1478 = vmatmul.mubr.f32.gmra.mrb[124].mxu1 %v147_v30  ;;  %1885 = vmatprep.mubr.msk.f32.mxu0 %vm333_vm0, %v305_v31  ;;  %v1640_v30 = vld [vmem:[%s3747_s5 + $0x70] sm:$0xff] }
 0x133   :  { %1949 = vmatprep.mubr.msk.f32.mxu1 %vm333_vm0, %v150_v35 }
 0x134   :  { %v1698_v44 = vsel %vm1625_vm1, %v1634_v36, %v1567_v39  ;;  %v1504_v45 = vadd.f32 %v3022_v47, %v1215_v40  ;;  %v642_v46 = vpop.f32.mrb[20].mxu0  ;;  %v1641_v39 = vld [vmem:[%s3747_s5 + $0x78] sm:$0xff] }
 0x135   :  { %1762 = vst [vmem:[%s3748_s6 + $0x40] sm:$0xff] %v1698_v44  ;;  %v1219_v50 = vpop.f32.mrb[20].mxu1  ;;  %v644_v51 = vpop.f32.mrb[21].mxu0  ;;  %906 = vmatmul.mubr.f32.gmra.mrb[126].mxu0 %v304_v42 }
 0x136   :  { %v1568_v52 = vmax.f32 %v1504_v45, 0.0  ;;  %v1220_v53 = vadd.f32 %v1219_v50, %v642_v46  ;;  %v1221_v54 = vpop.f32.mrb[21].mxu1  ;;  %1483 = vmatmul.mubr.f32.gmra.mrb[126].mxu1 %v149_v43  ;;  %v1642_v50 = vld [vmem:[%s3747_s5 + $0x80] sm:$0xff] }
 0x138   :  { %v1699_v55 = vsel %vm1625_vm1, %v1635_v49, %v1568_v52  ;;  %v1505_v56 = vadd.f32 %v3022_v47, %v1220_v53  ;;  %v647_v57 = vpop.f32.mrb[22].mxu0 }
 0x139   :  { %1763 = vst [vmem:[%s3748_s6 + $0x48] sm:$0xff] %v1699_v55  ;;  %v1224_v59 = vpop.f32.mrb[22].mxu1  ;;  %v649_v60 = vpop.f32.mrb[23].mxu0 }
 0x13a   :  { %v1569_v61 = vmax.f32 %v1505_v56, 0.0  ;;  %v1225_v62 = vadd.f32 %v1224_v59, %v647_v57  ;;  %v1226_v63 = vpop.f32.mrb[23].mxu1  ;;  %v1643_v59 = vld [vmem:[%s3747_s5 + $0x88] sm:$0xff] }
 0x13c   :  { %v1700_v1 = vsel %vm1625_vm1, %v1636_v58, %v1569_v61  ;;  %v1506_v2 = vadd.f32 %v3022_v47, %v1225_v62  ;;  %v652_v3 = vpop.f32.mrb[24].mxu0 }
 0x13d   :  { %1764 = vst [vmem:[%s3748_s6 + $0x50] sm:$0xff] %v1700_v1  ;;  %v1229_v5 = vpop.f32.mrb[24].mxu1  ;;  %v654_v6 = vpop.f32.mrb[25].mxu0 }
 0x13e   :  { %v1570_v7 = vmax.f32 %v1506_v2, 0.0  ;;  %v1230_v8 = vadd.f32 %v1229_v5, %v652_v3  ;;  %v1231_v9 = vpop.f32.mrb[25].mxu1  ;;  %v1644_v5 = vld [vmem:[%s3747_s5 + $0x90] sm:$0xff] }
 0x140   :  { %v1701_v10 = vsel %vm1625_vm1, %v1637_v4, %v1570_v7  ;;  %v1507_v11 = vadd.f32 %v3022_v47, %v1230_v8  ;;  %v657_v12 = vpop.f32.mrb[26].mxu0 }
 0x141   :  { %1765 = vst [vmem:[%s3748_s6 + $0x58] sm:$0xff] %v1701_v10  ;;  %v1234_v14 = vpop.f32.mrb[26].mxu1  ;;  %v659_v15 = vpop.f32.mrb[27].mxu0 }
 0x142   :  { %v1571_v16 = vmax.f32 %v1507_v11, 0.0  ;;  %v1235_v17 = vadd.f32 %v1234_v14, %v657_v12  ;;  %v1236_v18 = vpop.f32.mrb[27].mxu1  ;;  %v1645_v14 = vld [vmem:[%s3747_s5 + $0x98] sm:$0xff] }
 0x144   :  { %v1702_v19 = vsel %vm1625_vm1, %v1638_v13, %v1571_v16  ;;  %v1508_v20 = vadd.f32 %v3022_v47, %v1235_v17  ;;  %v662_v21 = vpop.f32.mrb[28].mxu0 }
 0x145   :  { %1766 = vst [vmem:[%s3748_s6 + $0x60] sm:$0xff] %v1702_v19  ;;  %v1239_v22 = vpop.f32.mrb[28].mxu1  ;;  %v664_v23 = vpop.f32.mrb[29].mxu0 }
 0x146   :  { %v1572_v24 = vmax.f32 %v1508_v20, 0.0  ;;  %v1240_v25 = vadd.f32 %v1239_v22, %v662_v21  ;;  %v1241_v26 = vpop.f32.mrb[29].mxu1  ;;  %v1646_v22 = vld [vmem:[%s3747_s5 + $0xa0] sm:$0xff] }
 0x148   :  { %v1703_v27 = vsel %vm1625_vm1, %v1639_v0, %v1572_v24  ;;  %v1509_v28 = vadd.f32 %v3022_v47, %v1240_v25  ;;  %v667_v29 = vpop.f32.mrb[30].mxu0 }
 0x149   :  { %1767 = vst [vmem:[%s3748_s6 + $0x68] sm:$0xff] %v1703_v27  ;;  %v1244_v31 = vpop.f32.mrb[30].mxu1  ;;  %v669_v32 = vpop.f32.mrb[31].mxu0 }
 0x14a   :  { %v1573_v33 = vmax.f32 %v1509_v28, 0.0  ;;  %v1245_v34 = vadd.f32 %v1244_v31, %v667_v29  ;;  %v1246_v35 = vpop.f32.mrb[31].mxu1  ;;  %v1647_v31 = vld [vmem:[%s3747_s5 + $0xa8] sm:$0xff] }
 0x14c   :  { %v1704_v36 = vsel %vm1625_vm1, %v1640_v30, %v1573_v33  ;;  %v1510_v37 = vadd.f32 %v3022_v47, %v1245_v34  ;;  %v672_v38 = vpop.f32.mrb[32].mxu0 }
 0x14d   :  { %1768 = vst [vmem:[%s3748_s6 + $0x70] sm:$0xff] %v1704_v36  ;;  %v1249_v40 = vpop.f32.mrb[32].mxu1  ;;  %v674_v41 = vpop.f32.mrb[33].mxu0 }
 0x14e   :  { %v1574_v42 = vmax.f32 %v1510_v37, 0.0  ;;  %v1250_v43 = vadd.f32 %v1249_v40, %v672_v38  ;;  %v1251_v44 = vpop.f32.mrb[33].mxu1  ;;  %v1648_v40 = vld [vmem:[%s3747_s5 + $0xb0] sm:$0xff] }
 0x150   :  { %v1705_v45 = vsel %vm1625_vm1, %v1641_v39, %v1574_v42  ;;  %v1511_v46 = vadd.f32 %v3022_v47, %v1250_v43  ;;  %v677_v49 = vpop.f32.mrb[34].mxu0 }
 0x151   :  { %1769 = vst [vmem:[%s3748_s6 + $0x78] sm:$0xff] %v1705_v45  ;;  %v1254_v51 = vpop.f32.mrb[34].mxu1  ;;  %v679_v52 = vpop.f32.mrb[35].mxu0 }
 0x152   :  { %v1575_v53 = vmax.f32 %v1511_v46, 0.0  ;;  %v1255_v54 = vadd.f32 %v1254_v51, %v677_v49  ;;  %v1256_v55 = vpop.f32.mrb[35].mxu1  ;;  %v1649_v51 = vld [vmem:[%s3747_s5 + $0xb8] sm:$0xff] }
 0x154   :  { %v1706_v56 = vsel %vm1625_vm1, %v1642_v50, %v1575_v53  ;;  %v1512_v57 = vadd.f32 %v3022_v47, %v1255_v54  ;;  %v682_v58 = vpop.f32.mrb[36].mxu0 }
 0x155   :  { %1770 = vst [vmem:[%s3748_s6 + $0x80] sm:$0xff] %v1706_v56  ;;  %v1259_v60 = vpop.f32.mrb[36].mxu1  ;;  %v684_v61 = vpop.f32.mrb[37].mxu0 }
 0x156   :  { %v1576_v62 = vmax.f32 %v1512_v57, 0.0  ;;  %v1260_v63 = vadd.f32 %v1259_v60, %v682_v58  ;;  %v1261_v1 = vpop.f32.mrb[37].mxu1  ;;  %v1650_v60 = vld [vmem:[%s3747_s5 + $0xc0] sm:$0xff] }
 0x158   :  { %v1707_v2 = vsel %vm1625_vm1, %v1643_v59, %v1576_v62  ;;  %v1513_v3 = vadd.f32 %v3022_v47, %v1260_v63  ;;  %v687_v4 = vpop.f32.mrb[38].mxu0 }
 0x159   :  { %1771 = vst [vmem:[%s3748_s6 + $0x88] sm:$0xff] %v1707_v2  ;;  %v1264_v6 = vpop.f32.mrb[38].mxu1  ;;  %v689_v7 = vpop.f32.mrb[39].mxu0 }
 0x15a   :  { %v1577_v8 = vmax.f32 %v1513_v3, 0.0  ;;  %v1265_v9 = vadd.f32 %v1264_v6, %v687_v4  ;;  %v1266_v10 = vpop.f32.mrb[39].mxu1  ;;  %v1651_v6 = vld [vmem:[%s3747_s5 + $0xc8] sm:$0xff] }
 0x15c   :  { %v1708_v11 = vsel %vm1625_vm1, %v1644_v5, %v1577_v8  ;;  %v1514_v12 = vadd.f32 %v3022_v47, %v1265_v9  ;;  %v692_v13 = vpop.f32.mrb[40].mxu0 }
 0x15d   :  { %1772 = vst [vmem:[%s3748_s6 + $0x90] sm:$0xff] %v1708_v11  ;;  %v1269_v15 = vpop.f32.mrb[40].mxu1  ;;  %v694_v16 = vpop.f32.mrb[41].mxu0 }
 0x15e   :  { %v1578_v17 = vmax.f32 %v1514_v12, 0.0  ;;  %v1270_v18 = vadd.f32 %v1269_v15, %v692_v13  ;;  %v1271_v19 = vpop.f32.mrb[41].mxu1  ;;  %v1652_v15 = vld [vmem:[%s3747_s5 + $0xd0] sm:$0xff] }
 0x160   :  { %v1709_v20 = vsel %vm1625_vm1, %v1645_v14, %v1578_v17  ;;  %v1515_v21 = vadd.f32 %v3022_v47, %v1270_v18  ;;  %v697_v0 = vpop.f32.mrb[42].mxu0 }
 0x161   :  { %1773 = vst [vmem:[%s3748_s6 + $0x98] sm:$0xff] %v1709_v20  ;;  %v1274_v23 = vpop.f32.mrb[42].mxu1  ;;  %v699_v24 = vpop.f32.mrb[43].mxu0 }
 0x162   :  { %v1579_v25 = vmax.f32 %v1515_v21, 0.0  ;;  %v1275_v26 = vadd.f32 %v1274_v23, %v697_v0  ;;  %v1276_v27 = vpop.f32.mrb[43].mxu1  ;;  %v1653_v23 = vld [vmem:[%s3747_s5 + $0xd8] sm:$0xff] }
 0x164   :  { %v1710_v28 = vsel %vm1625_vm1, %v1646_v22, %v1579_v25  ;;  %v1516_v29 = vadd.f32 %v3022_v47, %v1275_v26  ;;  %v702_v30 = vpop.f32.mrb[44].mxu0 }
 0x165   :  { %1774 = vst [vmem:[%s3748_s6 + $0xa0] sm:$0xff] %v1710_v28  ;;  %v1279_v32 = vpop.f32.mrb[44].mxu1  ;;  %v704_v33 = vpop.f32.mrb[45].mxu0 }
 0x166   :  { %v1580_v34 = vmax.f32 %v1516_v29, 0.0  ;;  %v1280_v35 = vadd.f32 %v1279_v32, %v702_v30  ;;  %v1281_v36 = vpop.f32.mrb[45].mxu1  ;;  %v1654_v32 = vld [vmem:[%s3747_s5 + $0xe0] sm:$0xff] }
 0x168   :  { %v1711_v37 = vsel %vm1625_vm1, %v1647_v31, %v1580_v34  ;;  %v1517_v38 = vadd.f32 %v3022_v47, %v1280_v35  ;;  %v707_v39 = vpop.f32.mrb[46].mxu0 }
 0x169   :  { %1775 = vst [vmem:[%s3748_s6 + $0xa8] sm:$0xff] %v1711_v37  ;;  %v1284_v41 = vpop.f32.mrb[46].mxu1  ;;  %v709_v42 = vpop.f32.mrb[47].mxu0 }
 0x16a   :  { %v1581_v43 = vmax.f32 %v1517_v38, 0.0  ;;  %v1285_v44 = vadd.f32 %v1284_v41, %v707_v39  ;;  %v1286_v45 = vpop.f32.mrb[47].mxu1  ;;  %v1655_v41 = vld [vmem:[%s3747_s5 + $0xe8] sm:$0xff] }
 0x16c   :  { %v1712_v46 = vsel %vm1625_vm1, %v1648_v40, %v1581_v43  ;;  %v1518_v49 = vadd.f32 %v3022_v47, %v1285_v44  ;;  %v712_v50 = vpop.f32.mrb[48].mxu0 }
 0x16d   :  { %1776 = vst [vmem:[%s3748_s6 + $0xb0] sm:$0xff] %v1712_v46  ;;  %v1289_v52 = vpop.f32.mrb[48].mxu1  ;;  %v714_v53 = vpop.f32.mrb[49].mxu0 }
 0x16e   :  { %v1582_v54 = vmax.f32 %v1518_v49, 0.0  ;;  %v1290_v55 = vadd.f32 %v1289_v52, %v712_v50  ;;  %v1291_v56 = vpop.f32.mrb[49].mxu1  ;;  %v1656_v52 = vld [vmem:[%s3747_s5 + $0xf0] sm:$0xff] }
 0x170   :  { %v1713_v57 = vsel %vm1625_vm1, %v1649_v51, %v1582_v54  ;;  %v1519_v58 = vadd.f32 %v3022_v47, %v1290_v55  ;;  %v717_v59 = vpop.f32.mrb[50].mxu0 }
 0x171   :  { %1777 = vst [vmem:[%s3748_s6 + $0xb8] sm:$0xff] %v1713_v57  ;;  %v1294_v61 = vpop.f32.mrb[50].mxu1  ;;  %v719_v62 = vpop.f32.mrb[51].mxu0 }
 0x172   :  { %v1583_v63 = vmax.f32 %v1519_v58, 0.0  ;;  %v1295_v1 = vadd.f32 %v1294_v61, %v717_v59  ;;  %v1296_v2 = vpop.f32.mrb[51].mxu1  ;;  %v1657_v61 = vld [vmem:[%s3747_s5 + $0xf8] sm:$0xff] }
 0x174   :  { %v1714_v3 = vsel %vm1625_vm1, %v1650_v60, %v1583_v63  ;;  %v1520_v4 = vadd.f32 %v3022_v47, %v1295_v1  ;;  %v722_v5 = vpop.f32.mrb[52].mxu0 }
 0x175   :  { %1778 = vst [vmem:[%s3748_s6 + $0xc0] sm:$0xff] %v1714_v3  ;;  %v1299_v7 = vpop.f32.mrb[52].mxu1  ;;  %v724_v8 = vpop.f32.mrb[53].mxu0 }
 0x176   :  { %v1584_v9 = vmax.f32 %v1520_v4, 0.0  ;;  %v1300_v10 = vadd.f32 %v1299_v7, %v722_v5  ;;  %v1301_v11 = vpop.f32.mrb[53].mxu1  ;;  %v1658_v7 = vld [vmem:[%s3747_s5 + $0x100] sm:$0xff] }
 0x178   :  { %v1715_v12 = vsel %vm1625_vm1, %v1651_v6, %v1584_v9  ;;  %v1521_v13 = vadd.f32 %v3022_v47, %v1300_v10  ;;  %v727_v14 = vpop.f32.mrb[54].mxu0 }
 0x179   :  { %1779 = vst [vmem:[%s3748_s6 + $0xc8] sm:$0xff] %v1715_v12  ;;  %v1304_v16 = vpop.f32.mrb[54].mxu1  ;;  %v729_v17 = vpop.f32.mrb[55].mxu0 }
 0x17a   :  { %v1585_v18 = vmax.f32 %v1521_v13, 0.0  ;;  %v1305_v19 = vadd.f32 %v1304_v16, %v727_v14  ;;  %v1306_v20 = vpop.f32.mrb[55].mxu1  ;;  %v1659_v16 = vld [vmem:[%s3747_s5 + $0x108] sm:$0xff] }
 0x17c   :  { %v1716_v21 = vsel %vm1625_vm1, %v1652_v15, %v1585_v18  ;;  %v1522_v0 = vadd.f32 %v3022_v47, %v1305_v19  ;;  %v732_v22 = vpop.f32.mrb[56].mxu0 }
 0x17d   :  { %1780 = vst [vmem:[%s3748_s6 + $0xd0] sm:$0xff] %v1716_v21  ;;  %v1309_v24 = vpop.f32.mrb[56].mxu1  ;;  %v734_v25 = vpop.f32.mrb[57].mxu0 }
 0x17e   :  { %v1586_v26 = vmax.f32 %v1522_v0, 0.0  ;;  %v1310_v27 = vadd.f32 %v1309_v24, %v732_v22  ;;  %v1311_v28 = vpop.f32.mrb[57].mxu1  ;;  %v1660_v24 = vld [vmem:[%s3747_s5 + $0x110] sm:$0xff] }
 0x180   :  { %v1717_v29 = vsel %vm1625_vm1, %v1653_v23, %v1586_v26  ;;  %v1523_v30 = vadd.f32 %v3022_v47, %v1310_v27  ;;  %v737_v31 = vpop.f32.mrb[58].mxu0 }
 0x181   :  { %1781 = vst [vmem:[%s3748_s6 + $0xd8] sm:$0xff] %v1717_v29  ;;  %v1314_v33 = vpop.f32.mrb[58].mxu1  ;;  %v739_v34 = vpop.f32.mrb[59].mxu0 }
 0x182   :  { %v1587_v35 = vmax.f32 %v1523_v30, 0.0  ;;  %v1315_v36 = vadd.f32 %v1314_v33, %v737_v31  ;;  %v1316_v37 = vpop.f32.mrb[59].mxu1  ;;  %v1661_v33 = vld [vmem:[%s3747_s5 + $0x118] sm:$0xff] }
 0x184   :  { %v1718_v38 = vsel %vm1625_vm1, %v1654_v32, %v1587_v35  ;;  %v1524_v39 = vadd.f32 %v3022_v47, %v1315_v36  ;;  %v742_v40 = vpop.f32.mrb[60].mxu0 }
 0x185   :  { %1782 = vst [vmem:[%s3748_s6 + $0xe0] sm:$0xff] %v1718_v38  ;;  %v1319_v42 = vpop.f32.mrb[60].mxu1  ;;  %v744_v43 = vpop.f32.mrb[61].mxu0 }
 0x186   :  { %v1588_v44 = vmax.f32 %v1524_v39, 0.0  ;;  %v1320_v45 = vadd.f32 %v1319_v42, %v742_v40  ;;  %v1321_v46 = vpop.f32.mrb[61].mxu1  ;;  %v1662_v42 = vld [vmem:[%s3747_s5 + $0x120] sm:$0xff] }
 0x188   :  { %v1719_v49 = vsel %vm1625_vm1, %v1655_v41, %v1588_v44  ;;  %v1525_v50 = vadd.f32 %v3022_v47, %v1320_v45  ;;  %v747_v51 = vpop.f32.mrb[62].mxu0 }
 0x189   :  { %1783 = vst [vmem:[%s3748_s6 + $0xe8] sm:$0xff] %v1719_v49  ;;  %v1324_v53 = vpop.f32.mrb[62].mxu1  ;;  %v749_v54 = vpop.f32.mrb[63].mxu0 }
 0x18a   :  { %v1589_v55 = vmax.f32 %v1525_v50, 0.0  ;;  %v1325_v56 = vadd.f32 %v1324_v53, %v747_v51  ;;  %v1326_v57 = vpop.f32.mrb[63].mxu1  ;;  %v1663_v53 = vld [vmem:[%s3747_s5 + $0x128] sm:$0xff] }
 0x18c   :  { %v1720_v58 = vsel %vm1625_vm1, %v1656_v52, %v1589_v55  ;;  %v1526_v59 = vadd.f32 %v3022_v47, %v1325_v56  ;;  %v752_v60 = vpop.f32.mrb[64].mxu0 }
 0x18d   :  { %1784 = vst [vmem:[%s3748_s6 + $0xf0] sm:$0xff] %v1720_v58  ;;  %v1329_v62 = vpop.f32.mrb[64].mxu1  ;;  %v754_v63 = vpop.f32.mrb[65].mxu0 }
 0x18e   :  { %v1590_v1 = vmax.f32 %v1526_v59, 0.0  ;;  %v1330_v2 = vadd.f32 %v1329_v62, %v752_v60  ;;  %v1331_v3 = vpop.f32.mrb[65].mxu1  ;;  %v1664_v62 = vld [vmem:[%s3747_s5 + $0x130] sm:$0xff] }
 0x190   :  { %v1721_v4 = vsel %vm1625_vm1, %v1657_v61, %v1590_v1  ;;  %v1527_v5 = vadd.f32 %v3022_v47, %v1330_v2  ;;  %v757_v6 = vpop.f32.mrb[66].mxu0 }
 0x191   :  { %1785 = vst [vmem:[%s3748_s6 + $0xf8] sm:$0xff] %v1721_v4  ;;  %v1334_v8 = vpop.f32.mrb[66].mxu1  ;;  %v759_v9 = vpop.f32.mrb[67].mxu0 }
 0x192   :  { %v1591_v10 = vmax.f32 %v1527_v5, 0.0  ;;  %v1335_v11 = vadd.f32 %v1334_v8, %v757_v6  ;;  %v1336_v12 = vpop.f32.mrb[67].mxu1  ;;  %v1665_v8 = vld [vmem:[%s3747_s5 + $0x138] sm:$0xff] }
 0x194   :  { %v1722_v13 = vsel %vm1625_vm1, %v1658_v7, %v1591_v10  ;;  %v1528_v14 = vadd.f32 %v3022_v47, %v1335_v11  ;;  %v762_v15 = vpop.f32.mrb[68].mxu0 }
 0x195   :  { %1786 = vst [vmem:[%s3748_s6 + $0x100] sm:$0xff] %v1722_v13  ;;  %v1339_v17 = vpop.f32.mrb[68].mxu1  ;;  %v764_v18 = vpop.f32.mrb[69].mxu0 }
 0x196   :  { %v1592_v19 = vmax.f32 %v1528_v14, 0.0  ;;  %v1340_v20 = vadd.f32 %v1339_v17, %v762_v15  ;;  %v1341_v21 = vpop.f32.mrb[69].mxu1  ;;  %v1666_v17 = vld [vmem:[%s3747_s5 + $0x140] sm:$0xff] }
 0x198   :  { %v1723_v0 = vsel %vm1625_vm1, %v1659_v16, %v1592_v19  ;;  %v1529_v22 = vadd.f32 %v3022_v47, %v1340_v20  ;;  %v767_v23 = vpop.f32.mrb[70].mxu0 }
 0x199   :  { %1787 = vst [vmem:[%s3748_s6 + $0x108] sm:$0xff] %v1723_v0  ;;  %v1344_v25 = vpop.f32.mrb[70].mxu1  ;;  %v769_v26 = vpop.f32.mrb[71].mxu0 }
 0x19a   :  { %v1593_v27 = vmax.f32 %v1529_v22, 0.0  ;;  %v1345_v28 = vadd.f32 %v1344_v25, %v767_v23  ;;  %v1346_v29 = vpop.f32.mrb[71].mxu1  ;;  %v1667_v25 = vld [vmem:[%s3747_s5 + $0x148] sm:$0xff] }
 0x19c   :  { %v1724_v30 = vsel %vm1625_vm1, %v1660_v24, %v1593_v27  ;;  %v1530_v31 = vadd.f32 %v3022_v47, %v1345_v28  ;;  %v772_v32 = vpop.f32.mrb[72].mxu0 }
 0x19d   :  { %1788 = vst [vmem:[%s3748_s6 + $0x110] sm:$0xff] %v1724_v30  ;;  %v1349_v34 = vpop.f32.mrb[72].mxu1  ;;  %v774_v35 = vpop.f32.mrb[73].mxu0 }
 0x19e   :  { %v1594_v36 = vmax.f32 %v1530_v31, 0.0  ;;  %v1350_v37 = vadd.f32 %v1349_v34, %v772_v32  ;;  %v1351_v38 = vpop.f32.mrb[73].mxu1  ;;  %v1668_v34 = vld [vmem:[%s3747_s5 + $0x150] sm:$0xff] }
 0x1a0   :  { %v1725_v39 = vsel %vm1625_vm1, %v1661_v33, %v1594_v36  ;;  %v1531_v40 = vadd.f32 %v3022_v47, %v1350_v37  ;;  %v777_v41 = vpop.f32.mrb[74].mxu0 }
 0x1a1   :  { %1789 = vst [vmem:[%s3748_s6 + $0x118] sm:$0xff] %v1725_v39  ;;  %v1354_v43 = vpop.f32.mrb[74].mxu1  ;;  %v779_v44 = vpop.f32.mrb[75].mxu0 }
 0x1a2   :  { %v1595_v45 = vmax.f32 %v1531_v40, 0.0  ;;  %v1355_v46 = vadd.f32 %v1354_v43, %v777_v41  ;;  %v1356_v49 = vpop.f32.mrb[75].mxu1  ;;  %v1669_v43 = vld [vmem:[%s3747_s5 + $0x158] sm:$0xff] }
 0x1a4   :  { %v1726_v50 = vsel %vm1625_vm1, %v1662_v42, %v1595_v45  ;;  %v1532_v51 = vadd.f32 %v3022_v47, %v1355_v46  ;;  %v782_v52 = vpop.f32.mrb[76].mxu0 }
 0x1a5   :  { %1790 = vst [vmem:[%s3748_s6 + $0x120] sm:$0xff] %v1726_v50  ;;  %v1359_v54 = vpop.f32.mrb[76].mxu1  ;;  %v784_v55 = vpop.f32.mrb[77].mxu0 }
 0x1a6   :  { %v1596_v56 = vmax.f32 %v1532_v51, 0.0  ;;  %v1360_v57 = vadd.f32 %v1359_v54, %v782_v52  ;;  %v1361_v58 = vpop.f32.mrb[77].mxu1  ;;  %v1670_v54 = vld [vmem:[%s3747_s5 + $0x160] sm:$0xff] }
 0x1a8   :  { %v1727_v59 = vsel %vm1625_vm1, %v1663_v53, %v1596_v56  ;;  %v1533_v60 = vadd.f32 %v3022_v47, %v1360_v57  ;;  %v787_v61 = vpop.f32.mrb[78].mxu0 }
 0x1a9   :  { %1791 = vst [vmem:[%s3748_s6 + $0x128] sm:$0xff] %v1727_v59  ;;  %v1364_v63 = vpop.f32.mrb[78].mxu1  ;;  %v789_v1 = vpop.f32.mrb[79].mxu0 }
 0x1aa   :  { %v1597_v2 = vmax.f32 %v1533_v60, 0.0  ;;  %v1365_v3 = vadd.f32 %v1364_v63, %v787_v61  ;;  %v1366_v4 = vpop.f32.mrb[79].mxu1  ;;  %v1671_v63 = vld [vmem:[%s3747_s5 + $0x168] sm:$0xff] }
 0x1ac   :  { %v1728_v5 = vsel %vm1625_vm1, %v1664_v62, %v1597_v2  ;;  %v1534_v6 = vadd.f32 %v3022_v47, %v1365_v3  ;;  %v792_v7 = vpop.f32.mrb[80].mxu0 }
 0x1ad   :  { %1792 = vst [vmem:[%s3748_s6 + $0x130] sm:$0xff] %v1728_v5  ;;  %v1369_v9 = vpop.f32.mrb[80].mxu1  ;;  %v794_v10 = vpop.f32.mrb[81].mxu0 }
 0x1ae   :  { %v1598_v11 = vmax.f32 %v1534_v6, 0.0  ;;  %v1370_v12 = vadd.f32 %v1369_v9, %v792_v7  ;;  %v1371_v13 = vpop.f32.mrb[81].mxu1  ;;  %v1672_v9 = vld [vmem:[%s3747_s5 + $0x170] sm:$0xff] }
 0x1b0   :  { %v1729_v14 = vsel %vm1625_vm1, %v1665_v8, %v1598_v11  ;;  %v1535_v15 = vadd.f32 %v3022_v47, %v1370_v12  ;;  %v797_v16 = vpop.f32.mrb[82].mxu0 }
 0x1b1   :  { %1793 = vst [vmem:[%s3748_s6 + $0x138] sm:$0xff] %v1729_v14  ;;  %v1374_v18 = vpop.f32.mrb[82].mxu1  ;;  %v799_v19 = vpop.f32.mrb[83].mxu0 }
 0x1b2   :  { %v1599_v20 = vmax.f32 %v1535_v15, 0.0  ;;  %v1375_v21 = vadd.f32 %v1374_v18, %v797_v16  ;;  %v1376_v0 = vpop.f32.mrb[83].mxu1  ;;  %v1673_v18 = vld [vmem:[%s3747_s5 + $0x178] sm:$0xff] }
 0x1b4   :  { %v1730_v22 = vsel %vm1625_vm1, %v1666_v17, %v1599_v20  ;;  %v1536_v23 = vadd.f32 %v3022_v47, %v1375_v21  ;;  %v802_v24 = vpop.f32.mrb[84].mxu0 }
 0x1b5   :  { %1794 = vst [vmem:[%s3748_s6 + $0x140] sm:$0xff] %v1730_v22  ;;  %v1379_v26 = vpop.f32.mrb[84].mxu1  ;;  %v804_v27 = vpop.f32.mrb[85].mxu0 }
 0x1b6   :  { %v1600_v28 = vmax.f32 %v1536_v23, 0.0  ;;  %v1380_v29 = vadd.f32 %v1379_v26, %v802_v24  ;;  %v1381_v30 = vpop.f32.mrb[85].mxu1  ;;  %v1674_v26 = vld [vmem:[%s3747_s5 + $0x180] sm:$0xff] }
 0x1b8   :  { %v1731_v31 = vsel %vm1625_vm1, %v1667_v25, %v1600_v28  ;;  %v1537_v32 = vadd.f32 %v3022_v47, %v1380_v29  ;;  %v807_v33 = vpop.f32.mrb[86].mxu0  ;;  %v3548_v47 = vld [vmem:[%s3746_s4] ss:$0 sm:$0xff] }
 0x1b9   :  { %1795 = vst [vmem:[%s3748_s6 + $0x148] sm:$0xff] %v1731_v31  ;;  %v1384_v35 = vpop.f32.mrb[86].mxu1  ;;  %v809_v36 = vpop.f32.mrb[87].mxu0 }
 0x1ba   :  { %v1601_v37 = vmax.f32 %v1537_v32, 0.0  ;;  %v1385_v38 = vadd.f32 %v1384_v35, %v807_v33  ;;  %v1386_v39 = vpop.f32.mrb[87].mxu1  ;;  %v1675_v35 = vld [vmem:[%s3747_s5 + $0x188] sm:$0xff] }
 0x1bc   :  { %v1732_v40 = vsel %vm1625_vm1, %v1668_v34, %v1601_v37  ;;  %v1538_v41 = vadd.f32 %v3548_v47, %v1385_v38  ;;  %v812_v42 = vpop.f32.mrb[88].mxu0 }
 0x1bd   :  { %1796 = vst [vmem:[%s3748_s6 + $0x150] sm:$0xff] %v1732_v40  ;;  %v1389_v44 = vpop.f32.mrb[88].mxu1  ;;  %v814_v45 = vpop.f32.mrb[89].mxu0 }
 0x1be   :  { %v1602_v46 = vmax.f32 %v1538_v41, 0.0  ;;  %v1390_v49 = vadd.f32 %v1389_v44, %v812_v42  ;;  %v1391_v50 = vpop.f32.mrb[89].mxu1  ;;  %v1676_v44 = vld [vmem:[%s3747_s5 + $0x190] sm:$0xff] }
 0x1c0   :  { %v1733_v51 = vsel %vm1625_vm1, %v1669_v43, %v1602_v46  ;;  %v1539_v52 = vadd.f32 %v3548_v47, %v1390_v49  ;;  %v817_v53 = vpop.f32.mrb[90].mxu0 }
 0x1c1   :  { %1797 = vst [vmem:[%s3748_s6 + $0x158] sm:$0xff] %v1733_v51  ;;  %v1394_v55 = vpop.f32.mrb[90].mxu1  ;;  %v819_v56 = vpop.f32.mrb[91].mxu0 }
 0x1c2   :  { %v1603_v57 = vmax.f32 %v1539_v52, 0.0  ;;  %v1395_v58 = vadd.f32 %v1394_v55, %v817_v53  ;;  %v1396_v59 = vpop.f32.mrb[91].mxu1  ;;  %v1677_v55 = vld [vmem:[%s3747_s5 + $0x198] sm:$0xff] }
 0x1c4   :  { %v1734_v60 = vsel %vm1625_vm1, %v1670_v54, %v1603_v57  ;;  %v1540_v61 = vadd.f32 %v3548_v47, %v1395_v58  ;;  %v822_v62 = vpop.f32.mrb[92].mxu0 }
 0x1c5   :  { %1798 = vst [vmem:[%s3748_s6 + $0x160] sm:$0xff] %v1734_v60  ;;  %v1399_v1 = vpop.f32.mrb[92].mxu1  ;;  %v824_v2 = vpop.f32.mrb[93].mxu0 }
 0x1c6   :  { %v1604_v3 = vmax.f32 %v1540_v61, 0.0  ;;  %v1400_v4 = vadd.f32 %v1399_v1, %v822_v62  ;;  %v1401_v5 = vpop.f32.mrb[93].mxu1  ;;  %v1678_v1 = vld [vmem:[%s3747_s5 + $0x1a0] sm:$0xff] }
 0x1c8   :  { %v1735_v6 = vsel %vm1625_vm1, %v1671_v63, %v1604_v3  ;;  %v1541_v7 = vadd.f32 %v3548_v47, %v1400_v4  ;;  %v827_v8 = vpop.f32.mrb[94].mxu0 }
 0x1c9   :  { %1799 = vst [vmem:[%s3748_s6 + $0x168] sm:$0xff] %v1735_v6  ;;  %v1404_v10 = vpop.f32.mrb[94].mxu1  ;;  %v829_v11 = vpop.f32.mrb[95].mxu0 }
 0x1ca   :  { %v1605_v12 = vmax.f32 %v1541_v7, 0.0  ;;  %v1405_v13 = vadd.f32 %v1404_v10, %v827_v8  ;;  %v1406_v14 = vpop.f32.mrb[95].mxu1  ;;  %v1679_v10 = vld [vmem:[%s3747_s5 + $0x1a8] sm:$0xff] }
 0x1cc   :  { %v1736_v15 = vsel %vm1625_vm1, %v1672_v9, %v1605_v12  ;;  %v1542_v16 = vadd.f32 %v3548_v47, %v1405_v13  ;;  %v832_v17 = vpop.f32.mrb[96].mxu0 }
 0x1cd   :  { %1800 = vst [vmem:[%s3748_s6 + $0x170] sm:$0xff] %v1736_v15  ;;  %v1409_v19 = vpop.f32.mrb[96].mxu1  ;;  %v834_v20 = vpop.f32.mrb[97].mxu0 }
 0x1ce   :  { %v1606_v21 = vmax.f32 %v1542_v16, 0.0  ;;  %v1410_v0 = vadd.f32 %v1409_v19, %v832_v17  ;;  %v1411_v22 = vpop.f32.mrb[97].mxu1  ;;  %v1680_v19 = vld [vmem:[%s3747_s5 + $0x1b0] sm:$0xff] }
 0x1d0   :  { %v1737_v23 = vsel %vm1625_vm1, %v1673_v18, %v1606_v21  ;;  %v1543_v24 = vadd.f32 %v3548_v47, %v1410_v0  ;;  %v837_v25 = vpop.f32.mrb[98].mxu0 }
 0x1d1   :  { %1801 = vst [vmem:[%s3748_s6 + $0x178] sm:$0xff] %v1737_v23  ;;  %v1414_v27 = vpop.f32.mrb[98].mxu1  ;;  %v839_v28 = vpop.f32.mrb[99].mxu0 }
 0x1d2   :  { %v1607_v29 = vmax.f32 %v1543_v24, 0.0  ;;  %v1415_v30 = vadd.f32 %v1414_v27, %v837_v25  ;;  %v1416_v31 = vpop.f32.mrb[99].mxu1  ;;  %v1681_v27 = vld [vmem:[%s3747_s5 + $0x1b8] sm:$0xff] }
 0x1d4   :  { %v1738_v32 = vsel %vm1625_vm1, %v1674_v26, %v1607_v29  ;;  %v1544_v33 = vadd.f32 %v3548_v47, %v1415_v30  ;;  %v842_v34 = vpop.f32.mrb[100].mxu0 }
 0x1d5   :  { %1802 = vst [vmem:[%s3748_s6 + $0x180] sm:$0xff] %v1738_v32  ;;  %v1419_v36 = vpop.f32.mrb[100].mxu1  ;;  %v844_v37 = vpop.f32.mrb[101].mxu0 }
 0x1d6   :  { %v1608_v38 = vmax.f32 %v1544_v33, 0.0  ;;  %v1420_v39 = vadd.f32 %v1419_v36, %v842_v34  ;;  %v1421_v40 = vpop.f32.mrb[101].mxu1  ;;  %v1682_v36 = vld [vmem:[%s3747_s5 + $0x1c0] sm:$0xff] }
 0x1d8   :  { %v1739_v41 = vsel %vm1625_vm1, %v1675_v35, %v1608_v38  ;;  %v1545_v42 = vadd.f32 %v3548_v47, %v1420_v39  ;;  %v847_v43 = vpop.f32.mrb[102].mxu0 }
 0x1d9   :  { %1803 = vst [vmem:[%s3748_s6 + $0x188] sm:$0xff] %v1739_v41  ;;  %v1424_v45 = vpop.f32.mrb[102].mxu1  ;;  %v849_v46 = vpop.f32.mrb[103].mxu0 }
 0x1da   :  { %v1609_v49 = vmax.f32 %v1545_v42, 0.0  ;;  %v1425_v50 = vadd.f32 %v1424_v45, %v847_v43  ;;  %v1426_v51 = vpop.f32.mrb[103].mxu1  ;;  %v1683_v45 = vld [vmem:[%s3747_s5 + $0x1c8] sm:$0xff] }
 0x1dc   :  { %v1740_v52 = vsel %vm1625_vm1, %v1676_v44, %v1609_v49  ;;  %v1546_v53 = vadd.f32 %v3548_v47, %v1425_v50  ;;  %v852_v54 = vpop.f32.mrb[104].mxu0 }
 0x1dd   :  { %1804 = vst [vmem:[%s3748_s6 + $0x190] sm:$0xff] %v1740_v52  ;;  %v1429_v56 = vpop.f32.mrb[104].mxu1  ;;  %v854_v57 = vpop.f32.mrb[105].mxu0 }
 0x1de   :  { %v1610_v58 = vmax.f32 %v1546_v53, 0.0  ;;  %v1430_v59 = vadd.f32 %v1429_v56, %v852_v54  ;;  %v1431_v60 = vpop.f32.mrb[105].mxu1  ;;  %v1684_v56 = vld [vmem:[%s3747_s5 + $0x1d0] sm:$0xff] }
 0x1e0   :  { %v1741_v61 = vsel %vm1625_vm1, %v1677_v55, %v1610_v58  ;;  %v1547_v62 = vadd.f32 %v3548_v47, %v1430_v59  ;;  %v857_v63 = vpop.f32.mrb[106].mxu0 }
 0x1e1   :  { %1805 = vst [vmem:[%s3748_s6 + $0x198] sm:$0xff] %v1741_v61  ;;  %v1434_v2 = vpop.f32.mrb[106].mxu1  ;;  %v859_v3 = vpop.f32.mrb[107].mxu0 }
 0x1e2   :  { %v1611_v4 = vmax.f32 %v1547_v62, 0.0  ;;  %v1435_v5 = vadd.f32 %v1434_v2, %v857_v63  ;;  %v1436_v6 = vpop.f32.mrb[107].mxu1  ;;  %v1685_v2 = vld [vmem:[%s3747_s5 + $0x1d8] sm:$0xff] }
 0x1e4   :  { %v1742_v7 = vsel %vm1625_vm1, %v1678_v1, %v1611_v4  ;;  %v1548_v8 = vadd.f32 %v3548_v47, %v1435_v5  ;;  %v862_v9 = vpop.f32.mrb[108].mxu0 }
 0x1e5   :  { %1806 = vst [vmem:[%s3748_s6 + $0x1a0] sm:$0xff] %v1742_v7  ;;  %v1439_v11 = vpop.f32.mrb[108].mxu1  ;;  %v864_v12 = vpop.f32.mrb[109].mxu0 }
 0x1e6   :  { %v1612_v13 = vmax.f32 %v1548_v8, 0.0  ;;  %v1440_v14 = vadd.f32 %v1439_v11, %v862_v9  ;;  %v1441_v15 = vpop.f32.mrb[109].mxu1  ;;  %v1686_v11 = vld [vmem:[%s3747_s5 + $0x1e0] sm:$0xff] }
 0x1e8   :  { %v1743_v16 = vsel %vm1625_vm1, %v1679_v10, %v1612_v13  ;;  %v1549_v17 = vadd.f32 %v3548_v47, %v1440_v14  ;;  %v867_v18 = vpop.f32.mrb[110].mxu0 }
 0x1e9   :  { %1807 = vst [vmem:[%s3748_s6 + $0x1a8] sm:$0xff] %v1743_v16  ;;  %v1444_v20 = vpop.f32.mrb[110].mxu1  ;;  %v869_v21 = vpop.f32.mrb[111].mxu0 }
 0x1ea   :  { %v1613_v0 = vmax.f32 %v1549_v17, 0.0  ;;  %v1445_v22 = vadd.f32 %v1444_v20, %v867_v18  ;;  %v1446_v23 = vpop.f32.mrb[111].mxu1  ;;  %v1687_v20 = vld [vmem:[%s3747_s5 + $0x1e8] sm:$0xff] }
 0x1ec   :  { %v1744_v24 = vsel %vm1625_vm1, %v1680_v19, %v1613_v0  ;;  %v1550_v25 = vadd.f32 %v3548_v47, %v1445_v22  ;;  %v872_v26 = vpop.f32.mrb[112].mxu0 }
 0x1ed   :  { %1808 = vst [vmem:[%s3748_s6 + $0x1b0] sm:$0xff] %v1744_v24  ;;  %v1449_v28 = vpop.f32.mrb[112].mxu1  ;;  %v874_v29 = vpop.f32.mrb[113].mxu0 }
 0x1ee   :  { %v1614_v30 = vmax.f32 %v1550_v25, 0.0  ;;  %v1450_v31 = vadd.f32 %v1449_v28, %v872_v26  ;;  %v1451_v32 = vpop.f32.mrb[113].mxu1  ;;  %v1688_v28 = vld [vmem:[%s3747_s5 + $0x1f0] sm:$0xff] }
 0x1f0   :  { %v1745_v33 = vsel %vm1625_vm1, %v1681_v27, %v1614_v30  ;;  %v1551_v34 = vadd.f32 %v3548_v47, %v1450_v31  ;;  %v877_v35 = vpop.f32.mrb[114].mxu0 }
 0x1f1   :  { %1809 = vst [vmem:[%s3748_s6 + $0x1b8] sm:$0xff] %v1745_v33  ;;  %v1454_v37 = vpop.f32.mrb[114].mxu1  ;;  %v879_v38 = vpop.f32.mrb[115].mxu0 }
 0x1f2   :  { %v1615_v39 = vmax.f32 %v1551_v34, 0.0  ;;  %v1455_v40 = vadd.f32 %v1454_v37, %v877_v35  ;;  %v1456_v41 = vpop.f32.mrb[115].mxu1 }
 0x1f4   :  { %v1746_v42 = vsel %vm1625_vm1, %v1682_v36, %v1615_v39  ;;  %v1552_v43 = vadd.f32 %v3548_v47, %v1455_v40  ;;  %v882_v44 = vpop.f32.mrb[116].mxu0  ;;  %v1689_v36 = vld [vmem:[%s3747_s5 + $0x1f8] sm:$0xff] }
 0x1f5   :  { %1810 = vst [vmem:[%s3748_s6 + $0x1c0] sm:$0xff] %v1746_v42  ;;  %v1459_v46 = vpop.f32.mrb[116].mxu1  ;;  %v884_v49 = vpop.f32.mrb[117].mxu0 }
 0x1f6   :  { %v1616_v50 = vmax.f32 %v1552_v43, 0.0  ;;  %v1460_v51 = vadd.f32 %v1459_v46, %v882_v44  ;;  %v1461_v52 = vpop.f32.mrb[117].mxu1 }
 0x1f8   :  { %v1747_v53 = vsel %vm1625_vm1, %v1683_v45, %v1616_v50  ;;  %v1553_v54 = vadd.f32 %v3548_v47, %v1460_v51  ;;  %v887_v55 = vpop.f32.mrb[118].mxu0 }
 0x1f9   :  { %1811 = vst [vmem:[%s3748_s6 + $0x1c8] sm:$0xff] %v1747_v53  ;;  %v1464_v57 = vpop.f32.mrb[118].mxu1  ;;  %v889_v58 = vpop.f32.mrb[119].mxu0 }
 0x1fa   :  { %v1617_v59 = vmax.f32 %v1553_v54, 0.0  ;;  %v1465_v60 = vadd.f32 %v1464_v57, %v887_v55  ;;  %v1466_v61 = vpop.f32.mrb[119].mxu1 }
 0x1fc   :  { %v1748_v62 = vsel %vm1625_vm1, %v1684_v56, %v1617_v59  ;;  %v1554_v63 = vadd.f32 %v3548_v47, %v1465_v60  ;;  %v892_v1 = vpop.f32.mrb[120].mxu0 }
 0x1fd   :  { %1812 = vst [vmem:[%s3748_s6 + $0x1d0] sm:$0xff] %v1748_v62  ;;  %v1469_v3 = vpop.f32.mrb[120].mxu1  ;;  %v894_v4 = vpop.f32.mrb[121].mxu0 }
 0x1fe   :  { %v1618_v5 = vmax.f32 %v1554_v63, 0.0  ;;  %v1470_v6 = vadd.f32 %v1469_v3, %v892_v1  ;;  %v1471_v7 = vpop.f32.mrb[121].mxu1 }
 0x200   :  { %v1749_v8 = vsel %vm1625_vm1, %v1685_v2, %v1618_v5  ;;  %v1555_v9 = vadd.f32 %v3548_v47, %v1470_v6  ;;  %v897_v10 = vpop.f32.mrb[122].mxu0 }
 0x201   :  { %1813 = vst [vmem:[%s3748_s6 + $0x1d8] sm:$0xff] %v1749_v8  ;;  %v1474_v12 = vpop.f32.mrb[122].mxu1  ;;  %v899_v13 = vpop.f32.mrb[123].mxu0 }
 0x202   :  { %v1619_v14 = vmax.f32 %v1555_v9, 0.0  ;;  %v1475_v15 = vadd.f32 %v1474_v12, %v897_v10  ;;  %v1476_v16 = vpop.f32.mrb[123].mxu1 }
 0x204   :  { %v1750_v17 = vsel %vm1625_vm1, %v1686_v11, %v1619_v14  ;;  %v1556_v18 = vadd.f32 %v3548_v47, %v1475_v15  ;;  %v902_v19 = vpop.f32.mrb[124].mxu0 }
 0x205   :  { %1814 = vst [vmem:[%s3748_s6 + $0x1e0] sm:$0xff] %v1750_v17  ;;  %v1479_v21 = vpop.f32.mrb[124].mxu1  ;;  %v904_v0 = vpop.f32.mrb[125].mxu0 }
 0x206   :  { %v1620_v22 = vmax.f32 %v1556_v18, 0.0  ;;  %v1480_v23 = vadd.f32 %v1479_v21, %v902_v19  ;;  %v1481_v24 = vpop.f32.mrb[125].mxu1 }
 0x208   :  { %v1751_v25 = vsel %vm1625_vm1, %v1687_v20, %v1620_v22  ;;  %v1557_v26 = vadd.f32 %v3548_v47, %v1480_v23  ;;  %v907_v27 = vpop.f32.mrb[126].mxu0 }
 0x209   :  { %1815 = vst [vmem:[%s3748_s6 + $0x1e8] sm:$0xff] %v1751_v25  ;;  %v1484_v29 = vpop.f32.mrb[126].mxu1  ;;  %v909_v30 = vpop.f32.mrb[127].mxu0 }
 0x20a   :  { %v1621_v31 = vmax.f32 %v1557_v26, 0.0  ;;  %v1485_v32 = vadd.f32 %v1484_v29, %v907_v27  ;;  %v1486_v33 = vpop.f32.mrb[127].mxu1 }
 0x20c   :  { %v1752_v34 = vsel %vm1625_vm1, %v1688_v28, %v1621_v31  ;;  %v1558_v35 = vadd.f32 %v3548_v47, %v1485_v32 }
 0x20d   :  { %1816 = vst [vmem:[%s3748_s6 + $0x1f0] sm:$0xff] %v1752_v34 }
 0x20e   :  { %v1622_v37 = vmax.f32 %v1558_v35, 0.0 }
 0x210   :  { %v1753_v38 = vsel %vm1625_vm1, %v1689_v36, %v1622_v37 }
 0x211   :  { %1817 = vst [vmem:[%s3748_s6 + $0x1f8] sm:$0xff] %v1753_v38 }

// kernel: inception_forward.5
= control target key start
LH: loop header
LB: loop body
LE: loop exit
PB: predicated region body
PF: predicated region fallthrough
CT: control target
= control target key end

     0   :  { %v1844_v3 = vmov 0.0|0.0   ;;  %s3195_s0 = inlined_call_operand.vmem [shape: f32[512,288], index: 0, kind: input, shape index: {}]   ;;  %s3196_s1 = inlined_call_operand.vmem [shape: f32[288,128], index: 1, kind: input, shape index: {}]   ;;  %s3197_s2 = inlined_call_operand.vmem [shape: f32[1,128], index: 2, kind: input, shape index: {}]   ;;  %s3198_s3 = inlined_call_operand.vmem [shape: f32[512,128], index: 3, kind: input, shape index: {}]   ;;  %s3199_s4 = inlined_call_operand.hbm [shape: f32[512,128], index: 4, kind: output, shape index: {}]  }
   0x1   :  { %v210_v0 = vld [vmem:[%s3196_s1] sm:$0xff]  ;;  %v211_v1 = vld [vmem:[%s3196_s1 + $0x8] sm:$0xff]  ;;  %v212_v2 = vld [vmem:[%s3196_s1 + $0x10] sm:$0xff]  ;;  %1728 = vmatprep.subr.bf16.mxu0 %v1844_v3  ;;  %1784 = vmatprep.subr.bf16.mxu1 %v1844_v3 }
   0x2   :  { %v1729_v4 = vpack.c.bf16 %v211_v1, %v210_v0  ;;  %v213_v5 = vld [vmem:[%s3196_s1 + $0x18] sm:$0xff]  ;;  %v214_v7 = vld [vmem:[%s3196_s1 + $0x20] sm:$0xff]  ;;  %v215_v8 = vld [vmem:[%s3196_s1 + $0x28] sm:$0xff] }
   0x3   :  { %v1732_v6 = vpack.c.bf16 %v213_v5, %v212_v2  ;;  %v1735_v9 = vpack.c.bf16 %v215_v8, %v214_v7  ;;  %v216_v10 = vld [vmem:[%s3196_s1 + $0x30] sm:$0xff]  ;;  %v217_v11 = vld [vmem:[%s3196_s1 + $0x38] sm:$0xff]  ;;  %v19_v12 = vld [vmem:[%s3195_s0 + $0x8] sm:$0xff] }
   0x4   :  { %1730 = vmatpush1.bf16.msra.mxu0 %v1729_v4  ;;  %1800 = vmatpush1.bf16.msra.mxu1 %v1729_v4  ;;  %v1738_v13 = vpack.c.bf16 %v217_v11, %v216_v10  ;;  %v163_v14 = vld [vmem:[%s3195_s0 + $0x488] sm:$0xff]  ;;  %v218_v15 = vld [vmem:[%s3196_s1 + $0x40] sm:$0xff]  ;;  %v220_v18 = vld [vmem:[%s3196_s1 + $0x50] sm:$0xff] }
   0x5   :  { %1731 = vmatprep.subr.bf16.mxu0 %v1844_v3  ;;  %1785 = vmatprep.subr.bf16.mxu1 %v1844_v3  ;;  %v219_v16 = vld [vmem:[%s3196_s1 + $0x48] sm:$0xff]  ;;  %v221_v19 = vld [vmem:[%s3196_s1 + $0x58] sm:$0xff]  ;;  %v222_v21 = vld [vmem:[%s3196_s1 + $0x60] sm:$0xff] }
   0x6   :  { %510 = vmatprep.mubr.f32.mxu0 %v19_v12  ;;  %750 = vmatprep.mubr.f32.mxu1 %v163_v14  ;;  %v1741_v17 = vpack.c.bf16 %v219_v16, %v218_v15  ;;  %v1744_v20 = vpack.c.bf16 %v221_v19, %v220_v18  ;;  %v223_v22 = vld [vmem:[%s3196_s1 + $0x68] sm:$0xff]  ;;  %v224_v24 = vld [vmem:[%s3196_s1 + $0x70] sm:$0xff]  ;;  %v225_v25 = vld [vmem:[%s3196_s1 + $0x78] sm:$0xff] }
   0x7   :  { %v1747_v23 = vpack.c.bf16 %v223_v22, %v222_v21  ;;  %v1750_v26 = vpack.c.bf16 %v225_v25, %v224_v24  ;;  %v226_v27 = vld [vmem:[%s3196_s1 + $0x80] sm:$0xff]  ;;  %v227_v28 = vld [vmem:[%s3196_s1 + $0x88] sm:$0xff]  ;;  %v228_v30 = vld [vmem:[%s3196_s1 + $0x90] sm:$0xff] }
   0x8   :  { %1733 = vmatpush1.bf16.msra.mxu0 %v1732_v6  ;;  %1801 = vmatpush1.bf16.msra.mxu1 %v1732_v6  ;;  %v1753_v29 = vpack.c.bf16 %v227_v28, %v226_v27  ;;  %v229_v31 = vld [vmem:[%s3196_s1 + $0x98] sm:$0xff]  ;;  %v230_v33 = vld [vmem:[%s3196_s1 + $0xa0] sm:$0xff]  ;;  %v231_v34 = vld [vmem:[%s3196_s1 + $0xa8] sm:$0xff] }
   0x9   :  { %1734 = vmatprep.subr.bf16.mxu0 %v1844_v3  ;;  %1786 = vmatprep.subr.bf16.mxu1 %v1844_v3  ;;  %v1756_v32 = vpack.c.bf16 %v229_v31, %v228_v30  ;;  %v1759_v35 = vpack.c.bf16 %v231_v34, %v230_v33  ;;  %v232_v36 = vld [vmem:[%s3196_s1 + $0xb0] sm:$0xff]  ;;  %v233_v37 = vld [vmem:[%s3196_s1 + $0xb8] sm:$0xff]  ;;  %v234_v39 = vld [vmem:[%s3196_s1 + $0xc0] sm:$0xff] }
   0xa   :  { %v1762_v38 = vpack.c.bf16 %v233_v37, %v232_v36  ;;  %v235_v40 = vld [vmem:[%s3196_s1 + $0xc8] sm:$0xff]  ;;  %v236_v42 = vld [vmem:[%s3196_s1 + $0xd0] sm:$0xff]  ;;  %v237_v43 = vld [vmem:[%s3196_s1 + $0xd8] sm:$0xff] }
   0xb   :  { %v1765_v41 = vpack.c.bf16 %v235_v40, %v234_v39  ;;  %v1768_v44 = vpack.c.bf16 %v237_v43, %v236_v42 }
   0xc   :  { %1736 = vmatpush1.bf16.msra.mxu0 %v1735_v9  ;;  %1802 = vmatpush1.bf16.msra.mxu1 %v1735_v9 }
   0xd   :  { %1737 = vmatprep.subr.bf16.mxu0 %v1844_v3  ;;  %1787 = vmatprep.subr.bf16.mxu1 %v1844_v3 }
  0x10   :  { %1739 = vmatpush1.bf16.msra.mxu0 %v1738_v13  ;;  %1803 = vmatpush1.bf16.msra.mxu1 %v1738_v13 }
  0x11   :  { %1740 = vmatprep.subr.bf16.mxu0 %v1844_v3  ;;  %1788 = vmatprep.subr.bf16.mxu1 %v1844_v3 }
  0x14   :  { %1742 = vmatpush1.bf16.msra.mxu0 %v1741_v17  ;;  %1804 = vmatpush1.bf16.msra.mxu1 %v1741_v17 }
  0x15   :  { %1743 = vmatprep.subr.bf16.mxu0 %v1844_v3  ;;  %1789 = vmatprep.subr.bf16.mxu1 %v1844_v3 }
  0x18   :  { %1745 = vmatpush1.bf16.msra.mxu0 %v1744_v20  ;;  %1805 = vmatpush1.bf16.msra.mxu1 %v1744_v20 }
  0x19   :  { %1746 = vmatprep.subr.bf16.mxu0 %v1844_v3  ;;  %1790 = vmatprep.subr.bf16.mxu1 %v1844_v3 }
  0x1c   :  { %1748 = vmatpush1.bf16.msra.mxu0 %v1747_v23  ;;  %1806 = vmatpush1.bf16.msra.mxu1 %v1747_v23 }
  0x1d   :  { %1749 = vmatprep.subr.bf16.mxu0 %v1844_v3  ;;  %1791 = vmatprep.subr.bf16.mxu1 %v1844_v3 }
  0x20   :  { %1751 = vmatpush1.bf16.msra.mxu0 %v1750_v26  ;;  %1807 = vmatpush1.bf16.msra.mxu1 %v1750_v26 }
  0x21   :  { %1752 = vmatprep.subr.bf16.mxu0 %v1844_v3  ;;  %1792 = vmatprep.subr.bf16.mxu1 %v1844_v3 }
  0x24   :  { %1754 = vmatpush1.bf16.msra.mxu0 %v1753_v29  ;;  %1808 = vmatpush1.bf16.msra.mxu1 %v1753_v29 }
  0x25   :  { %1755 = vmatprep.subr.bf16.mxu0 %v1844_v3  ;;  %1793 = vmatprep.subr.bf16.mxu1 %v1844_v3 }
  0x28   :  { %1757 = vmatpush1.bf16.msra.mxu0 %v1756_v32  ;;  %1809 = vmatpush1.bf16.msra.mxu1 %v1756_v32 }
  0x29   :  { %1758 = vmatprep.subr.bf16.mxu0 %v1844_v3  ;;  %1794 = vmatprep.subr.bf16.mxu1 %v1844_v3 }
  0x2c   :  { %1760 = vmatpush1.bf16.msra.mxu0 %v1759_v35  ;;  %1810 = vmatpush1.bf16.msra.mxu1 %v1759_v35 }
  0x2d   :  { %1761 = vmatprep.subr.bf16.mxu0 %v1844_v3  ;;  %1795 = vmatprep.subr.bf16.mxu1 %v1844_v3 }
  0x30   :  { %1763 = vmatpush1.bf16.msra.mxu0 %v1762_v38  ;;  %1811 = vmatpush1.bf16.msra.mxu1 %v1762_v38 }
  0x31   :  { %1764 = vmatprep.subr.bf16.mxu0 %v1844_v3  ;;  %1796 = vmatprep.subr.bf16.mxu1 %v1844_v3 }
  0x34   :  { %1766 = vmatpush1.bf16.msra.mxu0 %v1765_v41  ;;  %1812 = vmatpush1.bf16.msra.mxu1 %v1765_v41 }
  0x35   :  { %9 = vsyncpa [#allocation3], 0  ;;  %1767 = vmatprep.subr.bf16.mxu0 %v1844_v3  ;;  %1797 = vmatprep.subr.bf16.mxu1 %v1844_v3  ;;  %v238_v45 = vld [vmem:[%s3196_s1 + $0xe0] sm:$0xff]  ;;  %v239_v46 = vld [vmem:[%s3196_s1 + $0xe8] sm:$0xff]  ;;  %vm253_vm0 = vcmask 261120   ;;  %s1845_s22 = smov [#allocation2]  }
  0x36   :  { %v1771_v47 = vpack.c.bf16 %v239_v46, %v238_v45  ;;  %v240_v48 = vld [vmem:[%s3196_s1 + $0xf0] sm:$0xff]  ;;  %v241_v49 = vld [vmem:[%s3196_s1 + $0xf8] sm:$0xff]  ;;  %v242_v50 = vld [vmem:[%s3196_s1 + $0x100] sm:$0xff]  ;;  %s1480_s23 = sshll.u32 %s1845_s22, 4  ;;  %s1481_s23 = int_to_ptr.vmem [resolvable:$true] %s1480_s23 }
  0x37   :  { %v243_v51 = vld [vmem:[%s3196_s1 + $0x108] sm:$0xff]  ;;  %v1774_v52 = vpack.c.bf16 %v241_v49, %v240_v48  ;;  %v244_v54 = vld [vmem:[%s3196_s1 + $0x110] sm:$0xff]  ;;  %v245_v55 = vld [vmem:[%s3196_s1 + $0x118] sm:$0xff]  ;;  %s1820_s28 = scalar_lea.vmem %s1481_s23, 8192  ;;  %p1825_p1 = scmp.lt.s32.totalorder %s1481_s23, %s1481_s23 }
  0x38   :  { %1769 = vmatpush1.bf16.msra.mxu0 %v1768_v44  ;;  %1813 = vmatpush1.bf16.msra.mxu1 %v1768_v44  ;;  %v1776_v53 = vpack.c.bf16 %v243_v51, %v242_v50  ;;  %v18_v56 = vld [vmem:[%s3195_s0] sm:$0xff]  ;;  %v1780_v59 = vpack.c.bf16 %v245_v55, %v244_v54  ;;  %v21_v61 = vld [vmem:[%s3195_s0 + $0x18] sm:$0xff]  ;;  %v24_v1 = vld [vmem:[%s3195_s0 + $0x30] sm:$0xff]  ;;  %p1821_p0 = scmp.ne.s32.totalorder %s1481_s23, %s1820_s28  ;;  %p1826_p2 = scmp.lt.s32.totalorder %s1820_s28, %s1820_s28 }
  0x39   :  { %1770 = vmatprep.subr.bf16.mxu0 %v1844_v3  ;;  %1798 = vmatprep.subr.bf16.mxu1 %v1844_v3  ;;  %v162_v57 = vld [vmem:[%s3195_s0 + $0x480] sm:$0xff]  ;;  %v165_v62 = vld [vmem:[%s3195_s0 + $0x498] sm:$0xff]  ;;  %v168_v2 = vld [vmem:[%s3195_s0 + $0x4b0] sm:$0xff] }
  0x3a   :  { %v22_v58 = vld [vmem:[%s3195_s0 + $0x20] sm:$0xff]  ;;  %v25_v63 = vld [vmem:[%s3195_s0 + $0x38] sm:$0xff]  ;;  %v172_v4 = vld [vmem:[%s3195_s0 + $0x4d0] sm:$0xff]  ;;  %p1827_p3 = por %p1826_p2, %p1825_p1 }
  0x3b   :  { %v166_v60 = vld [vmem:[%s3195_s0 + $0x4a0] sm:$0xff]  ;;  %v169_v0 = vld [vmem:[%s3195_s0 + $0x4b8] sm:$0xff]  ;;  %v27_v5 = vld [vmem:[%s3195_s0 + $0x48] sm:$0xff] }
  0x3c   :  { %1772 = vmatpush1.bf16.msra.mxu0 %v1771_v47  ;;  %1814 = vmatpush1.bf16.msra.mxu1 %v1771_v47  ;;  %v171_v6 = vld [vmem:[%s3195_s0 + $0x4c8] sm:$0xff]  ;;  %v30_v9 = vld [vmem:[%s3195_s0 + $0x60] sm:$0xff]  ;;  %v33_v13 = vld [vmem:[%s3195_s0 + $0x78] sm:$0xff]  ;;  %p1828_p4 = pnand %p1827_p3, %p1821_p0 }
  0x3d   :  { %1773 = vmatprep.subr.bf16.mxu0 %v1844_v3  ;;  %1799 = vmatprep.subr.bf16.mxu1 %v1844_v3  ;;  %v28_v3 = vld [vmem:[%s3195_s0 + $0x50] sm:$0xff]  ;;  %v31_v7 = vld [vmem:[%s3195_s0 + $0x68] sm:$0xff]  ;;  %v174_v10 = vld [vmem:[%s3195_s0 + $0x4e0] sm:$0xff] }
  0x3e   :  { %v175_v8 = vld [vmem:[%s3195_s0 + $0x4e8] sm:$0xff]  ;;  %v34_v11 = vld [vmem:[%s3195_s0 + $0x80] sm:$0xff]  ;;  %v177_v14 = vld [vmem:[%s3195_s0 + $0x4f8] sm:$0xff] }
  0x3f   :  { %v178_v12 = vld [vmem:[%s3195_s0 + $0x500] sm:$0xff]  ;;  %v37_v15 = vld [vmem:[%s3195_s0 + $0x98] sm:$0xff]  ;;  %v36_v17 = vld [vmem:[%s3195_s0 + $0x90] sm:$0xff] }
  0x40   :  { %1775 = vmatpush1.bf16.msra.mxu0 %v1774_v52  ;;  %1815 = vmatpush1.bf16.msra.mxu1 %v1774_v52  ;;  %v181_v16 = vld [vmem:[%s3195_s0 + $0x518] sm:$0xff]  ;;  %v180_v18 = vld [vmem:[%s3195_s0 + $0x510] sm:$0xff]  ;;  %v39_v21 = vld [vmem:[%s3195_s0 + $0xa8] sm:$0xff] }
  0x41   :  { %1777 = vmatprep.subr.bf16.mxu1 %v1776_v53  ;;  %v40_v19 = vld [vmem:[%s3195_s0 + $0xb0] sm:$0xff]  ;;  %v183_v22 = vld [vmem:[%s3195_s0 + $0x528] sm:$0xff]  ;;  %v42_v25 = vld [vmem:[%s3195_s0 + $0xc0] sm:$0xff] }
  0x42   :  { %v184_v20 = vld [vmem:[%s3195_s0 + $0x530] sm:$0xff]  ;;  %v43_v23 = vld [vmem:[%s3195_s0 + $0xc8] sm:$0xff]  ;;  %v186_v26 = vld [vmem:[%s3195_s0 + $0x540] sm:$0xff] }
  0x43   :  { %511 = vmatmul.mubr.f32.vlgmr.msra.gmra.mrb[0].mxu0 %v18_v56  ;;  %751 = vmatmul.mubr.f32.vlgmr.msra.gmra.mrb[0].mxu1 %v162_v57  ;;  %v187_v24 = vld [vmem:[%s3195_s0 + $0x548] sm:$0xff]  ;;  %v46_v27 = vld [vmem:[%s3195_s0 + $0xe0] sm:$0xff]  ;;  %v45_v29 = vld [vmem:[%s3195_s0 + $0xd8] sm:$0xff] }
  0x44   :  { %1779 = vmatpush3.bf16.msra.mxu1 %v1776_v53  ;;  %515 = vmatprep.mubr.f32.mxu0 %v22_v58  ;;  %v190_v28 = vld [vmem:[%s3195_s0 + $0x560] sm:$0xff]  ;;  %v189_v30 = vld [vmem:[%s3195_s0 + $0x558] sm:$0xff]  ;;  %v48_v33 = vld [vmem:[%s3195_s0 + $0xf0] sm:$0xff] }
  0x45   :  { %755 = vmatprep.mubr.f32.mxu1 %v166_v60  ;;  %1781 = vmatprep.subr.bf16.mxu1 %v1780_v59  ;;  %v49_v31 = vld [vmem:[%s3195_s0 + $0xf8] sm:$0xff]  ;;  %v192_v34 = vld [vmem:[%s3195_s0 + $0x570] sm:$0xff]  ;;  %v51_v37 = vld [vmem:[%s3195_s0 + $0x108] sm:$0xff] }
  0x46   :  { %v193_v32 = vld [vmem:[%s3195_s0 + $0x578] sm:$0xff]  ;;  %v52_v35 = vld [vmem:[%s3195_s0 + $0x110] sm:$0xff]  ;;  %v195_v38 = vld [vmem:[%s3195_s0 + $0x588] sm:$0xff] }
  0x47   :  { %516 = vmatmul.mubr.f32.gmra.mrb[2].mxu0 %v21_v61  ;;  %756 = vmatmul.mubr.f32.gmra.mrb[2].mxu1 %v165_v62  ;;  %v196_v36 = vld [vmem:[%s3195_s0 + $0x590] sm:$0xff]  ;;  %v55_v39 = vld [vmem:[%s3195_s0 + $0x128] sm:$0xff]  ;;  %v54_v41 = vld [vmem:[%s3195_s0 + $0x120] sm:$0xff] }
  0x48   :  { %520 = vmatprep.mubr.f32.mxu0 %v25_v63  ;;  %760 = vmatprep.mubr.f32.mxu1 %v169_v0  ;;  %v199_v40 = vld [vmem:[%s3195_s0 + $0x5a8] sm:$0xff]  ;;  %v198_v42 = vld [vmem:[%s3195_s0 + $0x5a0] sm:$0xff]  ;;  %v57_v45 = vld [vmem:[%s3195_s0 + $0x138] sm:$0xff] }
  0x49   :  { %1783 = vmatpush3.bf16.msra.mxu1 %v1780_v59  ;;  %v58_v43 = vld [vmem:[%s3195_s0 + $0x140] sm:$0xff]  ;;  %v201_v46 = vld [vmem:[%s3195_s0 + $0x5b8] sm:$0xff]  ;;  %v60_v49 = vld [vmem:[%s3195_s0 + $0x150] sm:$0xff] }
  0x4a   :  { %v202_v44 = vld [vmem:[%s3195_s0 + $0x5c0] sm:$0xff]  ;;  %v61_v47 = vld [vmem:[%s3195_s0 + $0x158] sm:$0xff]  ;;  %v204_v50 = vld [vmem:[%s3195_s0 + $0x5d0] sm:$0xff] }
  0x4b   :  { %521 = vmatmul.mubr.f32.gmra.mrb[4].mxu0 %v24_v1  ;;  %761 = vmatmul.mubr.f32.gmra.mrb[4].mxu1 %v168_v2  ;;  %v205_v48 = vld [vmem:[%s3195_s0 + $0x5d8] sm:$0xff]  ;;  %v64_v51 = vld [vmem:[%s3195_s0 + $0x170] sm:$0xff]  ;;  %v63_v53 = vld [vmem:[%s3195_s0 + $0x168] sm:$0xff] }
  0x4c   :  { %525 = vmatprep.mubr.f32.mxu0 %v28_v3  ;;  %765 = vmatprep.mubr.f32.mxu1 %v172_v4  ;;  %v208_v52 = vld [vmem:[%s3195_s0 + $0x5f0] sm:$0xff]  ;;  %v207_v54 = vld [vmem:[%s3195_s0 + $0x5e8] sm:$0xff]  ;;  %v66_v57 = vld [vmem:[%s3195_s0 + $0x180] sm:$0xff] }
  0x4d   :  { %v67_v55 = vld [vmem:[%s3195_s0 + $0x188] sm:$0xff]  ;;  %v20_v56 = vld [vmem:[%s3195_s0 + $0x10] sm:$0xff]  ;;  %v70_v59 = vld [vmem:[%s3195_s0 + $0x1a0] sm:$0xff] }
  0x4e   :  { %v23_v58 = vld [vmem:[%s3195_s0 + $0x28] sm:$0xff]  ;;  %v26_v60 = vld [vmem:[%s3195_s0 + $0x40] sm:$0xff]  ;;  %v69_v61 = vld [vmem:[%s3195_s0 + $0x198] sm:$0xff] }
  0x4f   :  { %526 = vmatmul.mubr.f32.gmra.mrb[6].mxu0 %v27_v5  ;;  %766 = vmatmul.mubr.f32.gmra.mrb[6].mxu1 %v171_v6  ;;  %v29_v62 = vld [vmem:[%s3195_s0 + $0x58] sm:$0xff]  ;;  %v32_v0 = vld [vmem:[%s3195_s0 + $0x70] sm:$0xff]  ;;  %v35_v2 = vld [vmem:[%s3195_s0 + $0x88] sm:$0xff] }
  0x50   :  { %530 = vmatprep.mubr.f32.mxu0 %v31_v7  ;;  %770 = vmatprep.mubr.f32.mxu1 %v175_v8  ;;  %v73_v63 = vld [vmem:[%s3195_s0 + $0x1b8] sm:$0xff]  ;;  %v72_v1 = vld [vmem:[%s3195_s0 + $0x1b0] sm:$0xff]  ;;  %v38_v4 = vld [vmem:[%s3195_s0 + $0xa0] sm:$0xff] }
  0x51   :  { %v76_v3 = vld [vmem:[%s3195_s0 + $0x1d0] sm:$0xff]  ;;  %v75_v5 = vld [vmem:[%s3195_s0 + $0x1c8] sm:$0xff]  ;;  %v41_v6 = vld [vmem:[%s3195_s0 + $0xb8] sm:$0xff] }
  0x52   :  { %v79_v7 = vld [vmem:[%s3195_s0 + $0x1e8] sm:$0xff]  ;;  %v44_v8 = vld [vmem:[%s3195_s0 + $0xd0] sm:$0xff] }
  0x53   :  { %531 = vmatmul.mubr.f32.gmra.mrb[8].mxu0 %v30_v9  ;;  %771 = vmatmul.mubr.f32.gmra.mrb[8].mxu1 %v174_v10  ;;  %v78_v9 = vld [vmem:[%s3195_s0 + $0x1e0] sm:$0xff]  ;;  %v47_v10 = vld [vmem:[%s3195_s0 + $0xe8] sm:$0xff] }
  0x54   :  { %535 = vmatprep.mubr.f32.mxu0 %v34_v11  ;;  %775 = vmatprep.mubr.f32.mxu1 %v178_v12  ;;  %v82_v11 = vld [vmem:[%s3195_s0 + $0x200] sm:$0xff] }
  0x55   :  { %v50_v12 = vld [vmem:[%s3195_s0 + $0x100] sm:$0xff] }
  0x57   :  { %536 = vmatmul.mubr.f32.gmra.mrb[10].mxu0 %v33_v13  ;;  %776 = vmatmul.mubr.f32.gmra.mrb[10].mxu1 %v177_v14  ;;  %v81_v13 = vld [vmem:[%s3195_s0 + $0x1f8] sm:$0xff] }
  0x58   :  { %540 = vmatprep.mubr.f32.mxu0 %v37_v15  ;;  %780 = vmatprep.mubr.f32.mxu1 %v181_v16  ;;  %v53_v14 = vld [vmem:[%s3195_s0 + $0x118] sm:$0xff]  ;;  %v56_v16 = vld [vmem:[%s3195_s0 + $0x130] sm:$0xff] }
  0x59   :  { %v85_v15 = vld [vmem:[%s3195_s0 + $0x218] sm:$0xff] }
  0x5b   :  { %541 = vmatmul.mubr.f32.gmra.mrb[12].mxu0 %v36_v17  ;;  %781 = vmatmul.mubr.f32.gmra.mrb[12].mxu1 %v180_v18  ;;  %v84_v17 = vld [vmem:[%s3195_s0 + $0x210] sm:$0xff]  ;;  %v59_v18 = vld [vmem:[%s3195_s0 + $0x148] sm:$0xff] }
  0x5c   :  { %545 = vmatprep.mubr.f32.mxu0 %v40_v19  ;;  %785 = vmatprep.mubr.f32.mxu1 %v184_v20  ;;  %v88_v19 = vld [vmem:[%s3195_s0 + $0x230] sm:$0xff]  ;;  %v62_v20 = vld [vmem:[%s3195_s0 + $0x160] sm:$0xff] }
  0x5f   :  { %546 = vmatmul.mubr.f32.gmra.mrb[14].mxu0 %v39_v21  ;;  %786 = vmatmul.mubr.f32.gmra.mrb[14].mxu1 %v183_v22  ;;  %v87_v21 = vld [vmem:[%s3195_s0 + $0x228] sm:$0xff]  ;;  %v65_v22 = vld [vmem:[%s3195_s0 + $0x178] sm:$0xff] }
  0x60   :  { %550 = vmatprep.mubr.f32.mxu0 %v43_v23  ;;  %790 = vmatprep.mubr.f32.mxu1 %v187_v24  ;;  %v91_v23 = vld [vmem:[%s3195_s0 + $0x248] sm:$0xff]  ;;  %v68_v24 = vld [vmem:[%s3195_s0 + $0x190] sm:$0xff] }
  0x63   :  { %551 = vmatmul.mubr.f32.gmra.mrb[16].mxu0 %v42_v25  ;;  %791 = vmatmul.mubr.f32.gmra.mrb[16].mxu1 %v186_v26  ;;  %v90_v25 = vld [vmem:[%s3195_s0 + $0x240] sm:$0xff]  ;;  %v71_v26 = vld [vmem:[%s3195_s0 + $0x1a8] sm:$0xff] }
  0x64   :  { %555 = vmatprep.mubr.f32.mxu0 %v46_v27  ;;  %795 = vmatprep.mubr.f32.mxu1 %v190_v28  ;;  %v94_v27 = vld [vmem:[%s3195_s0 + $0x260] sm:$0xff] }
  0x65   :  { %v74_v28 = vld [vmem:[%s3195_s0 + $0x1c0] sm:$0xff] }
  0x67   :  { %556 = vmatmul.mubr.f32.gmra.mrb[18].mxu0 %v45_v29  ;;  %796 = vmatmul.mubr.f32.gmra.mrb[18].mxu1 %v189_v30  ;;  %v93_v29 = vld [vmem:[%s3195_s0 + $0x258] sm:$0xff] }
  0x68   :  { %560 = vmatprep.mubr.f32.mxu0 %v49_v31  ;;  %800 = vmatprep.mubr.f32.mxu1 %v193_v32  ;;  %v77_v30 = vld [vmem:[%s3195_s0 + $0x1d8] sm:$0xff]  ;;  %v80_v32 = vld [vmem:[%s3195_s0 + $0x1f0] sm:$0xff] }
  0x69   :  { %v97_v31 = vld [vmem:[%s3195_s0 + $0x278] sm:$0xff] }
  0x6b   :  { %561 = vmatmul.mubr.f32.gmra.mrb[20].mxu0 %v48_v33  ;;  %801 = vmatmul.mubr.f32.gmra.mrb[20].mxu1 %v192_v34  ;;  %v96_v33 = vld [vmem:[%s3195_s0 + $0x270] sm:$0xff]  ;;  %v83_v34 = vld [vmem:[%s3195_s0 + $0x208] sm:$0xff] }
  0x6c   :  { %565 = vmatprep.mubr.f32.mxu0 %v52_v35  ;;  %805 = vmatprep.mubr.f32.mxu1 %v196_v36  ;;  %v100_v35 = vld [vmem:[%s3195_s0 + $0x290] sm:$0xff]  ;;  %v86_v36 = vld [vmem:[%s3195_s0 + $0x220] sm:$0xff] }
  0x6f   :  { %566 = vmatmul.mubr.f32.gmra.mrb[22].mxu0 %v51_v37  ;;  %806 = vmatmul.mubr.f32.gmra.mrb[22].mxu1 %v195_v38  ;;  %v99_v37 = vld [vmem:[%s3195_s0 + $0x288] sm:$0xff]  ;;  %v89_v38 = vld [vmem:[%s3195_s0 + $0x238] sm:$0xff] }
  0x70   :  { %570 = vmatprep.mubr.f32.mxu0 %v55_v39  ;;  %810 = vmatprep.mubr.f32.mxu1 %v199_v40  ;;  %v103_v39 = vld [vmem:[%s3195_s0 + $0x2a8] sm:$0xff]  ;;  %v92_v40 = vld [vmem:[%s3195_s0 + $0x250] sm:$0xff] }
  0x73   :  { %571 = vmatmul.mubr.f32.gmra.mrb[24].mxu0 %v54_v41  ;;  %811 = vmatmul.mubr.f32.gmra.mrb[24].mxu1 %v198_v42  ;;  %v102_v41 = vld [vmem:[%s3195_s0 + $0x2a0] sm:$0xff]  ;;  %v95_v42 = vld [vmem:[%s3195_s0 + $0x268] sm:$0xff] }
  0x74   :  { %575 = vmatprep.mubr.f32.mxu0 %v58_v43  ;;  %815 = vmatprep.mubr.f32.mxu1 %v202_v44  ;;  %v106_v43 = vld [vmem:[%s3195_s0 + $0x2c0] sm:$0xff] }
  0x75   :  { %v98_v44 = vld [vmem:[%s3195_s0 + $0x280] sm:$0xff] }
  0x77   :  { %576 = vmatmul.mubr.f32.gmra.mrb[26].mxu0 %v57_v45  ;;  %816 = vmatmul.mubr.f32.gmra.mrb[26].mxu1 %v201_v46  ;;  %v105_v45 = vld [vmem:[%s3195_s0 + $0x2b8] sm:$0xff] }
  0x78   :  { %580 = vmatprep.mubr.f32.mxu0 %v61_v47  ;;  %820 = vmatprep.mubr.f32.mxu1 %v205_v48  ;;  %v101_v46 = vld [vmem:[%s3195_s0 + $0x298] sm:$0xff]  ;;  %v104_v48 = vld [vmem:[%s3195_s0 + $0x2b0] sm:$0xff] }
  0x79   :  { %v109_v47 = vld [vmem:[%s3195_s0 + $0x2d8] sm:$0xff] }
  0x7b   :  { %581 = vmatmul.mubr.f32.gmra.mrb[28].mxu0 %v60_v49  ;;  %821 = vmatmul.mubr.f32.gmra.mrb[28].mxu1 %v204_v50  ;;  %v108_v49 = vld [vmem:[%s3195_s0 + $0x2d0] sm:$0xff]  ;;  %v107_v50 = vld [vmem:[%s3195_s0 + $0x2c8] sm:$0xff] }
  0x7c   :  { %585 = vmatprep.mubr.f32.mxu0 %v64_v51  ;;  %825 = vmatprep.mubr.f32.mxu1 %v208_v52  ;;  %v112_v51 = vld [vmem:[%s3195_s0 + $0x2f0] sm:$0xff]  ;;  %v110_v52 = vld [vmem:[%s3195_s0 + $0x2e0] sm:$0xff] }
  0x7f   :  { %586 = vmatmul.mubr.f32.gmra.mrb[30].mxu0 %v63_v53  ;;  %826 = vmatmul.mubr.f32.gmra.mrb[30].mxu1 %v207_v54  ;;  %v111_v53 = vld [vmem:[%s3195_s0 + $0x2e8] sm:$0xff]  ;;  %v113_v54 = vld [vmem:[%s3195_s0 + $0x2f8] sm:$0xff] }
  0x80   :  { %590 = vmatprep.mubr.f32.mxu0 %v67_v55  ;;  %1632 = vmatprep.mubr.msk.f32.mxu1 %vm253_vm0, %v20_v56  ;;  %v115_v55 = vld [vmem:[%s3195_s0 + $0x308] sm:$0xff]  ;;  %v116_v56 = vld [vmem:[%s3195_s0 + $0x310] sm:$0xff] }
  0x83   :  { %591 = vmatmul.mubr.f32.gmra.mrb[32].mxu0 %v66_v57  ;;  %1633 = vmatmul.mubr.msk.f32.vlgmr.msra.gmra.mrb[32].mxu1 %vm253_vm0, %v23_v58  ;;  %v114_v57 = vld [vmem:[%s3195_s0 + $0x300] sm:$0xff]  ;;  %v119_v58 = vld [vmem:[%s3195_s0 + $0x328] sm:$0xff] }
  0x84   :  { %595 = vmatprep.mubr.f32.mxu0 %v70_v59  ;;  %1635 = vmatprep.mubr.msk.f32.mxu1 %vm253_vm0, %v26_v60  ;;  %v118_v59 = vld [vmem:[%s3195_s0 + $0x320] sm:$0xff] }
  0x85   :  { %v122_v60 = vld [vmem:[%s3195_s0 + $0x340] sm:$0xff] }
  0x87   :  { %596 = vmatmul.mubr.f32.gmra.mrb[34].mxu0 %v69_v61  ;;  %1636 = vmatmul.mubr.msk.f32.gmra.mrb[34].mxu1 %vm253_vm0, %v29_v62  ;;  %v117_v61 = vld [vmem:[%s3195_s0 + $0x318] sm:$0xff] }
  0x88   :  { %600 = vmatprep.mubr.f32.mxu0 %v73_v63  ;;  %1638 = vmatprep.mubr.msk.f32.mxu1 %vm253_vm0, %v32_v0  ;;  %v125_v62 = vld [vmem:[%s3195_s0 + $0x358] sm:$0xff]  ;;  %v128_v0 = vld [vmem:[%s3195_s0 + $0x370] sm:$0xff] }
  0x89   :  { %v121_v63 = vld [vmem:[%s3195_s0 + $0x338] sm:$0xff] }
  0x8b   :  { %601 = vmatmul.mubr.f32.gmra.mrb[36].mxu0 %v72_v1  ;;  %1639 = vmatmul.mubr.msk.f32.gmra.mrb[36].mxu1 %vm253_vm0, %v35_v2  ;;  %v120_v1 = vld [vmem:[%s3195_s0 + $0x330] sm:$0xff]  ;;  %v131_v2 = vld [vmem:[%s3195_s0 + $0x388] sm:$0xff] }
  0x8c   :  { %605 = vmatprep.mubr.f32.mxu0 %v76_v3  ;;  %1641 = vmatprep.mubr.msk.f32.mxu1 %vm253_vm0, %v38_v4  ;;  %v124_v3 = vld [vmem:[%s3195_s0 + $0x350] sm:$0xff]  ;;  %v134_v4 = vld [vmem:[%s3195_s0 + $0x3a0] sm:$0xff] }
  0x8f   :  { %606 = vmatmul.mubr.f32.gmra.mrb[38].mxu0 %v75_v5  ;;  %1642 = vmatmul.mubr.msk.f32.gmra.mrb[38].mxu1 %vm253_vm0, %v41_v6  ;;  %v123_v5 = vld [vmem:[%s3195_s0 + $0x348] sm:$0xff]  ;;  %v137_v6 = vld [vmem:[%s3195_s0 + $0x3b8] sm:$0xff] }
  0x90   :  { %610 = vmatprep.mubr.f32.mxu0 %v79_v7  ;;  %1644 = vmatprep.mubr.msk.f32.mxu1 %vm253_vm0, %v44_v8  ;;  %v127_v7 = vld [vmem:[%s3195_s0 + $0x368] sm:$0xff]  ;;  %v140_v8 = vld [vmem:[%s3195_s0 + $0x3d0] sm:$0xff] }
  0x93   :  { %611 = vmatmul.mubr.f32.gmra.mrb[40].mxu0 %v78_v9  ;;  %1645 = vmatmul.mubr.msk.f32.gmra.mrb[40].mxu1 %vm253_vm0, %v47_v10  ;;  %v126_v9 = vld [vmem:[%s3195_s0 + $0x360] sm:$0xff]  ;;  %v143_v10 = vld [vmem:[%s3195_s0 + $0x3e8] sm:$0xff] }
  0x94   :  { %615 = vmatprep.mubr.f32.mxu0 %v82_v11  ;;  %1647 = vmatprep.mubr.msk.f32.mxu1 %vm253_vm0, %v50_v12  ;;  %v130_v11 = vld [vmem:[%s3195_s0 + $0x380] sm:$0xff] }
  0x95   :  { %v146_v12 = vld [vmem:[%s3195_s0 + $0x400] sm:$0xff] }
  0x97   :  { %616 = vmatmul.mubr.f32.gmra.mrb[42].mxu0 %v81_v13  ;;  %1648 = vmatmul.mubr.msk.f32.gmra.mrb[42].mxu1 %vm253_vm0, %v53_v14  ;;  %v129_v13 = vld [vmem:[%s3195_s0 + $0x378] sm:$0xff] }
  0x98   :  { %620 = vmatprep.mubr.f32.mxu0 %v85_v15  ;;  %1650 = vmatprep.mubr.msk.f32.mxu1 %vm253_vm0, %v56_v16  ;;  %v149_v14 = vld [vmem:[%s3195_s0 + $0x418] sm:$0xff]  ;;  %v152_v16 = vld [vmem:[%s3195_s0 + $0x430] sm:$0xff] }
  0x99   :  { %v133_v15 = vld [vmem:[%s3195_s0 + $0x398] sm:$0xff] }
  0x9b   :  { %621 = vmatmul.mubr.f32.gmra.mrb[44].mxu0 %v84_v17  ;;  %1651 = vmatmul.mubr.msk.f32.gmra.mrb[44].mxu1 %vm253_vm0, %v59_v18  ;;  %v132_v17 = vld [vmem:[%s3195_s0 + $0x390] sm:$0xff]  ;;  %v155_v18 = vld [vmem:[%s3195_s0 + $0x448] sm:$0xff] }
  0x9c   :  { %625 = vmatprep.mubr.f32.mxu0 %v88_v19  ;;  %1653 = vmatprep.mubr.msk.f32.mxu1 %vm253_vm0, %v62_v20  ;;  %v136_v19 = vld [vmem:[%s3195_s0 + $0x3b0] sm:$0xff]  ;;  %v158_v20 = vld [vmem:[%s3195_s0 + $0x460] sm:$0xff] }
  0x9f   :  { %626 = vmatmul.mubr.f32.gmra.mrb[46].mxu0 %v87_v21  ;;  %1654 = vmatmul.mubr.msk.f32.gmra.mrb[46].mxu1 %vm253_vm0, %v65_v22  ;;  %v135_v21 = vld [vmem:[%s3195_s0 + $0x3a8] sm:$0xff]  ;;  %v161_v22 = vld [vmem:[%s3195_s0 + $0x478] sm:$0xff] }
  0xa0   :  { %630 = vmatprep.mubr.f32.mxu0 %v91_v23  ;;  %1656 = vmatprep.mubr.msk.f32.mxu1 %vm253_vm0, %v68_v24  ;;  %v139_v23 = vld [vmem:[%s3195_s0 + $0x3c8] sm:$0xff]  ;;  %v164_v24 = vld [vmem:[%s3195_s0 + $0x490] sm:$0xff] }
  0xa3   :  { %631 = vmatmul.mubr.f32.gmra.mrb[48].mxu0 %v90_v25  ;;  %1657 = vmatmul.mubr.msk.f32.gmra.mrb[48].mxu1 %vm253_vm0, %v71_v26  ;;  %v138_v25 = vld [vmem:[%s3195_s0 + $0x3c0] sm:$0xff]  ;;  %v167_v26 = vld [vmem:[%s3195_s0 + $0x4a8] sm:$0xff] }
  0xa4   :  { %635 = vmatprep.mubr.f32.mxu0 %v94_v27  ;;  %1659 = vmatprep.mubr.msk.f32.mxu1 %vm253_vm0, %v74_v28  ;;  %v142_v27 = vld [vmem:[%s3195_s0 + $0x3e0] sm:$0xff] }
  0xa5   :  { %v170_v28 = vld [vmem:[%s3195_s0 + $0x4c0] sm:$0xff] }
  0xa7   :  { %636 = vmatmul.mubr.f32.gmra.mrb[50].mxu0 %v93_v29  ;;  %1660 = vmatmul.mubr.msk.f32.gmra.mrb[50].mxu1 %vm253_vm0, %v77_v30  ;;  %v141_v29 = vld [vmem:[%s3195_s0 + $0x3d8] sm:$0xff] }
  0xa8   :  { %640 = vmatprep.mubr.f32.mxu0 %v97_v31  ;;  %1662 = vmatprep.mubr.msk.f32.mxu1 %vm253_vm0, %v80_v32  ;;  %v173_v30 = vld [vmem:[%s3195_s0 + $0x4d8] sm:$0xff]  ;;  %v176_v32 = vld [vmem:[%s3195_s0 + $0x4f0] sm:$0xff] }
  0xa9   :  { %v145_v31 = vld [vmem:[%s3195_s0 + $0x3f8] sm:$0xff] }
  0xab   :  { %641 = vmatmul.mubr.f32.gmra.mrb[52].mxu0 %v96_v33  ;;  %1663 = vmatmul.mubr.msk.f32.gmra.mrb[52].mxu1 %vm253_vm0, %v83_v34  ;;  %v144_v33 = vld [vmem:[%s3195_s0 + $0x3f0] sm:$0xff]  ;;  %v179_v34 = vld [vmem:[%s3195_s0 + $0x508] sm:$0xff] }
  0xac   :  { %645 = vmatprep.mubr.f32.mxu0 %v100_v35  ;;  %1665 = vmatprep.mubr.msk.f32.mxu1 %vm253_vm0, %v86_v36  ;;  %v148_v35 = vld [vmem:[%s3195_s0 + $0x410] sm:$0xff]  ;;  %v182_v36 = vld [vmem:[%s3195_s0 + $0x520] sm:$0xff] }
  0xaf   :  { %646 = vmatmul.mubr.f32.gmra.mrb[54].mxu0 %v99_v37  ;;  %1666 = vmatmul.mubr.msk.f32.gmra.mrb[54].mxu1 %vm253_vm0, %v89_v38  ;;  %v147_v37 = vld [vmem:[%s3195_s0 + $0x408] sm:$0xff]  ;;  %v185_v38 = vld [vmem:[%s3195_s0 + $0x538] sm:$0xff] }
  0xb0   :  { %650 = vmatprep.mubr.f32.mxu0 %v103_v39  ;;  %1668 = vmatprep.mubr.msk.f32.mxu1 %vm253_vm0, %v92_v40  ;;  %v151_v39 = vld [vmem:[%s3195_s0 + $0x428] sm:$0xff]  ;;  %v188_v40 = vld [vmem:[%s3195_s0 + $0x550] sm:$0xff] }
  0xb3   :  { %651 = vmatmul.mubr.f32.gmra.mrb[56].mxu0 %v102_v41  ;;  %1669 = vmatmul.mubr.msk.f32.gmra.mrb[56].mxu1 %vm253_vm0, %v95_v42  ;;  %v150_v41 = vld [vmem:[%s3195_s0 + $0x420] sm:$0xff]  ;;  %v191_v42 = vld [vmem:[%s3195_s0 + $0x568] sm:$0xff] }
  0xb4   :  { %655 = vmatprep.mubr.f32.mxu0 %v106_v43  ;;  %1671 = vmatprep.mubr.msk.f32.mxu1 %vm253_vm0, %v98_v44  ;;  %v154_v43 = vld [vmem:[%s3195_s0 + $0x440] sm:$0xff] }
  0xb5   :  { %v194_v44 = vld [vmem:[%s3195_s0 + $0x580] sm:$0xff] }
  0xb7   :  { %656 = vmatmul.mubr.f32.gmra.mrb[58].mxu0 %v105_v45  ;;  %1672 = vmatmul.mubr.msk.f32.gmra.mrb[58].mxu1 %vm253_vm0, %v101_v46  ;;  %v153_v45 = vld [vmem:[%s3195_s0 + $0x438] sm:$0xff] }
  0xb8   :  { %660 = vmatprep.mubr.f32.mxu0 %v109_v47  ;;  %1674 = vmatprep.mubr.msk.f32.mxu1 %vm253_vm0, %v104_v48  ;;  %v197_v46 = vld [vmem:[%s3195_s0 + $0x598] sm:$0xff]  ;;  %v200_v48 = vld [vmem:[%s3195_s0 + $0x5b0] sm:$0xff] }
  0xb9   :  { %v157_v47 = vld [vmem:[%s3195_s0 + $0x458] sm:$0xff] }
  0xbb   :  { %661 = vmatmul.mubr.f32.gmra.mrb[60].mxu0 %v108_v49  ;;  %1675 = vmatmul.mubr.msk.f32.gmra.mrb[60].mxu1 %vm253_vm0, %v107_v50  ;;  %v156_v49 = vld [vmem:[%s3195_s0 + $0x450] sm:$0xff]  ;;  %v203_v50 = vld [vmem:[%s3195_s0 + $0x5c8] sm:$0xff] }
  0xbc   :  { %665 = vmatprep.mubr.f32.mxu0 %v112_v51  ;;  %1677 = vmatprep.mubr.msk.f32.mxu1 %vm253_vm0, %v110_v52  ;;  %v160_v51 = vld [vmem:[%s3195_s0 + $0x470] sm:$0xff]  ;;  %v206_v52 = vld [vmem:[%s3195_s0 + $0x5e0] sm:$0xff] }
  0xbf   :  { %666 = vmatmul.mubr.f32.gmra.mrb[62].mxu0 %v111_v53  ;;  %1678 = vmatmul.mubr.msk.f32.gmra.mrb[62].mxu1 %vm253_vm0, %v113_v54  ;;  %v159_v53 = vld [vmem:[%s3195_s0 + $0x468] sm:$0xff]  ;;  %v209_v54 = vld [vmem:[%s3195_s0 + $0x5f8] sm:$0xff] }
  0xc0   :  { %670 = vmatprep.mubr.f32.mxu0 %v115_v55  ;;  %1680 = vmatprep.mubr.msk.f32.mxu1 %vm253_vm0, %v116_v56 }
  0xc3   :  { %671 = vmatmul.mubr.f32.gmra.mrb[64].mxu0 %v114_v57  ;;  %1681 = vmatmul.mubr.msk.f32.gmra.mrb[64].mxu1 %vm253_vm0, %v119_v58 }
  0xc4   :  { %675 = vmatprep.mubr.f32.mxu0 %v118_v59  ;;  %1683 = vmatprep.mubr.msk.f32.mxu1 %vm253_vm0, %v122_v60 }
  0xc7   :  { %676 = vmatmul.mubr.f32.gmra.mrb[66].mxu0 %v117_v61  ;;  %1684 = vmatmul.mubr.msk.f32.gmra.mrb[66].mxu1 %vm253_vm0, %v125_v62 }
  0xc8   :  { %680 = vmatprep.mubr.f32.mxu0 %v121_v63  ;;  %1686 = vmatprep.mubr.msk.f32.mxu1 %vm253_vm0, %v128_v0 }
  0xcb   :  { %681 = vmatmul.mubr.f32.gmra.mrb[68].mxu0 %v120_v1  ;;  %1687 = vmatmul.mubr.msk.f32.gmra.mrb[68].mxu1 %vm253_vm0, %v131_v2 }
  0xcc   :  { %685 = vmatprep.mubr.f32.mxu0 %v124_v3  ;;  %1689 = vmatprep.mubr.msk.f32.mxu1 %vm253_vm0, %v134_v4 }
  0xcf   :  { %686 = vmatmul.mubr.f32.gmra.mrb[70].mxu0 %v123_v5  ;;  %1690 = vmatmul.mubr.msk.f32.gmra.mrb[70].mxu1 %vm253_vm0, %v137_v6 }
  0xd0   :  { %690 = vmatprep.mubr.f32.mxu0 %v127_v7  ;;  %1692 = vmatprep.mubr.msk.f32.mxu1 %vm253_vm0, %v140_v8 }
  0xd3   :  { %691 = vmatmul.mubr.f32.gmra.mrb[72].mxu0 %v126_v9  ;;  %1693 = vmatmul.mubr.msk.f32.gmra.mrb[72].mxu1 %vm253_vm0, %v143_v10 }
  0xd4   :  { %695 = vmatprep.mubr.f32.mxu0 %v130_v11  ;;  %1695 = vmatprep.mubr.msk.f32.mxu1 %vm253_vm0, %v146_v12 }
  0xd7   :  { %696 = vmatmul.mubr.f32.gmra.mrb[74].mxu0 %v129_v13  ;;  %1696 = vmatmul.mubr.msk.f32.gmra.mrb[74].mxu1 %vm253_vm0, %v149_v14 }
  0xd8   :  { %700 = vmatprep.mubr.f32.mxu0 %v133_v15  ;;  %1698 = vmatprep.mubr.msk.f32.mxu1 %vm253_vm0, %v152_v16 }
  0xdb   :  { %701 = vmatmul.mubr.f32.gmra.mrb[76].mxu0 %v132_v17  ;;  %1699 = vmatmul.mubr.msk.f32.gmra.mrb[76].mxu1 %vm253_vm0, %v155_v18 }
  0xdc   :  { %705 = vmatprep.mubr.f32.mxu0 %v136_v19  ;;  %1701 = vmatprep.mubr.msk.f32.mxu1 %vm253_vm0, %v158_v20 }
  0xdf   :  { %706 = vmatmul.mubr.f32.gmra.mrb[78].mxu0 %v135_v21  ;;  %1702 = vmatmul.mubr.msk.f32.gmra.mrb[78].mxu1 %vm253_vm0, %v161_v22 }
  0xe0   :  { %710 = vmatprep.mubr.f32.mxu0 %v139_v23  ;;  %1704 = vmatprep.mubr.msk.f32.mxu1 %vm253_vm0, %v164_v24 }
  0xe3   :  { %711 = vmatmul.mubr.f32.gmra.mrb[80].mxu0 %v138_v25  ;;  %1705 = vmatmul.mubr.msk.f32.gmra.mrb[80].mxu1 %vm253_vm0, %v167_v26 }
  0xe4   :  { %715 = vmatprep.mubr.f32.mxu0 %v142_v27  ;;  %1707 = vmatprep.mubr.msk.f32.mxu1 %vm253_vm0, %v170_v28 }
  0xe7   :  { %716 = vmatmul.mubr.f32.gmra.mrb[82].mxu0 %v141_v29  ;;  %1708 = vmatmul.mubr.msk.f32.gmra.mrb[82].mxu1 %vm253_vm0, %v173_v30 }
  0xe8   :  { %720 = vmatprep.mubr.f32.mxu0 %v145_v31  ;;  %1710 = vmatprep.mubr.msk.f32.mxu1 %vm253_vm0, %v176_v32 }
  0xeb   :  { %721 = vmatmul.mubr.f32.gmra.mrb[84].mxu0 %v144_v33  ;;  %1711 = vmatmul.mubr.msk.f32.gmra.mrb[84].mxu1 %vm253_vm0, %v179_v34 }
  0xec   :  { %725 = vmatprep.mubr.f32.mxu0 %v148_v35  ;;  %1713 = vmatprep.mubr.msk.f32.mxu1 %vm253_vm0, %v182_v36 }
  0xef   :  { %726 = vmatmul.mubr.f32.gmra.mrb[86].mxu0 %v147_v37  ;;  %1714 = vmatmul.mubr.msk.f32.gmra.mrb[86].mxu1 %vm253_vm0, %v185_v38 }
  0xf0   :  { %730 = vmatprep.mubr.f32.mxu0 %v151_v39  ;;  %1716 = vmatprep.mubr.msk.f32.mxu1 %vm253_vm0, %v188_v40 }
  0xf3   :  { %731 = vmatmul.mubr.f32.gmra.mrb[88].mxu0 %v150_v41  ;;  %1717 = vmatmul.mubr.msk.f32.gmra.mrb[88].mxu1 %vm253_vm0, %v191_v42 }
  0xf4   :  { %735 = vmatprep.mubr.f32.mxu0 %v154_v43  ;;  %1719 = vmatprep.mubr.msk.f32.mxu1 %vm253_vm0, %v194_v44 }
  0xf7   :  { %736 = vmatmul.mubr.f32.gmra.mrb[90].mxu0 %v153_v45  ;;  %1720 = vmatmul.mubr.msk.f32.gmra.mrb[90].mxu1 %vm253_vm0, %v197_v46 }
  0xf8   :  { %740 = vmatprep.mubr.f32.mxu0 %v157_v47  ;;  %1722 = vmatprep.mubr.msk.f32.mxu1 %vm253_vm0, %v200_v48 }
  0xfb   :  { %741 = vmatmul.mubr.f32.gmra.mrb[92].mxu0 %v156_v49  ;;  %1723 = vmatmul.mubr.msk.f32.gmra.mrb[92].mxu1 %vm253_vm0, %v203_v50 }
  0xfc   :  { %745 = vmatprep.mubr.f32.mxu0 %v160_v51  ;;  %1725 = vmatprep.mubr.msk.f32.mxu1 %vm253_vm0, %v206_v52  ;;  %v1280_v51 = vlaneseq }
  0xff   :  { %746 = vmatmul.mubr.f32.gmra.mrb[94].mxu0 %v159_v53  ;;  %1726 = vmatmul.mubr.msk.f32.gmra.mrb[94].mxu1 %vm253_vm0, %v209_v54  ;;  %v2720_v54 = vld [vmem:[%s3197_s2] ss:$0 sm:$0xff] }
 0x116   :  { %v2653_v55 = vpop.f32.mrb[0].mxu0  ;;  %v2655_v56 = vpop.f32.mrb[0].mxu1 }
 0x117   :  { %v514_v57 = vpop.f32.mrb[1].mxu0  ;;  %v754_v58 = vpop.f32.mrb[1].mxu1 }
 0x11a   :  { %v2657_v59 = vpop.f32.mrb[2].mxu0  ;;  %v2659_v60 = vpop.f32.mrb[2].mxu1 }
 0x11b   :  { %v519_v61 = vpop.f32.mrb[3].mxu0  ;;  %v759_v62 = vpop.f32.mrb[3].mxu1 }
 0x11c   :  { %v2722_v61 = vand.u32 127, %v1280_v51  ;;  %v518_v62 = vadd.f32 %v2720_v54, %v2657_v59 }
 0x11e   :  { %v2661_v63 = vpop.f32.mrb[4].mxu0  ;;  %v2663_v0 = vpop.f32.mrb[4].mxu1  ;;  %vm1282_vm1 = vcmp.lt.s32.totalorder %v2722_v61, 96 }
 0x11f   :  { %v524_v1 = vpop.f32.mrb[5].mxu0  ;;  %v764_v2 = vpop.f32.mrb[5].mxu1 }
 0x120   :  { %v513_v1 = vadd.f32 %v2720_v54, %v2653_v55  ;;  %v1283_v55 = vld [vmem:[%s3198_s3] sm:$0xff] }
 0x122   :  { %v2665_v3 = vpop.f32.mrb[6].mxu0  ;;  %v2667_v4 = vpop.f32.mrb[6].mxu1 }
 0x123   :  { %v529_v5 = vpop.f32.mrb[7].mxu0  ;;  %v769_v6 = vpop.f32.mrb[7].mxu1 }
 0x126   :  { %v2669_v7 = vpop.f32.mrb[8].mxu0  ;;  %v2671_v8 = vpop.f32.mrb[8].mxu1 }
 0x127   :  { %v534_v9 = vpop.f32.mrb[9].mxu0  ;;  %v774_v10 = vpop.f32.mrb[9].mxu1 }
 0x12a   :  { %v2673_v11 = vpop.f32.mrb[10].mxu0  ;;  %v2675_v12 = vpop.f32.mrb[10].mxu1 }
 0x12b   :  { %v539_v13 = vpop.f32.mrb[11].mxu0  ;;  %v779_v14 = vpop.f32.mrb[11].mxu1 }
 0x12c   :  { %v1284_v13 = vld [vmem:[%s3198_s3 + $0x8] sm:$0xff] }
 0x12e   :  { %v2677_v15 = vpop.f32.mrb[12].mxu0  ;;  %v2679_v16 = vpop.f32.mrb[12].mxu1 }
 0x12f   :  { %v544_v17 = vpop.f32.mrb[13].mxu0  ;;  %v784_v18 = vpop.f32.mrb[13].mxu1 }
 0x130   :  { %v528_v17 = vadd.f32 %v2720_v54, %v2665_v3  ;;  %v523_v18 = vadd.f32 %v2720_v54, %v2661_v63  ;;  %v538_v63 = vadd.f32 %v2720_v54, %v2673_v11 }
 0x132   :  { %v2681_v19 = vpop.f32.mrb[14].mxu0  ;;  %v2683_v20 = vpop.f32.mrb[14].mxu1 }
 0x133   :  { %v549_v21 = vpop.f32.mrb[15].mxu0  ;;  %v789_v22 = vpop.f32.mrb[15].mxu1 }
 0x136   :  { %v2685_v23 = vpop.f32.mrb[16].mxu0  ;;  %v2687_v24 = vpop.f32.mrb[16].mxu1 }
 0x137   :  { %v554_v25 = vpop.f32.mrb[17].mxu0  ;;  %v794_v26 = vpop.f32.mrb[17].mxu1 }
 0x13a   :  { %v2689_v27 = vpop.f32.mrb[18].mxu0  ;;  %v2691_v28 = vpop.f32.mrb[18].mxu1 }
 0x13b   :  { %v559_v29 = vpop.f32.mrb[19].mxu0  ;;  %v799_v30 = vpop.f32.mrb[19].mxu1 }
 0x13e   :  { %v2693_v31 = vpop.f32.mrb[20].mxu0  ;;  %v2695_v32 = vpop.f32.mrb[20].mxu1 }
 0x13f   :  { %v564_v33 = vpop.f32.mrb[21].mxu0  ;;  %v804_v34 = vpop.f32.mrb[21].mxu1 }
 0x140   :  { %v1286_v34 = vld [vmem:[%s3198_s3 + $0x18] sm:$0xff] }
 0x142   :  { %v2697_v35 = vpop.f32.mrb[22].mxu0  ;;  %v2699_v36 = vpop.f32.mrb[22].mxu1 }
 0x143   :  { %v569_v37 = vpop.f32.mrb[23].mxu0  ;;  %v809_v38 = vpop.f32.mrb[23].mxu1 }
 0x146   :  { %v2701_v39 = vpop.f32.mrb[24].mxu0  ;;  %v2703_v40 = vpop.f32.mrb[24].mxu1 }
 0x147   :  { %v574_v41 = vpop.f32.mrb[25].mxu0  ;;  %v814_v42 = vpop.f32.mrb[25].mxu1 }
 0x148   :  { %v1285_v41 = vld [vmem:[%s3198_s3 + $0x10] sm:$0xff]  ;;  %v533_v42 = vadd.f32 %v2720_v54, %v2669_v7  ;;  %v548_v7 = vadd.f32 %v2720_v54, %v2681_v19 }
 0x14a   :  { %v2705_v43 = vpop.f32.mrb[26].mxu0  ;;  %v2707_v44 = vpop.f32.mrb[26].mxu1 }
 0x14b   :  { %v579_v45 = vpop.f32.mrb[27].mxu0  ;;  %v819_v46 = vpop.f32.mrb[27].mxu1 }
 0x14e   :  { %v2709_v47 = vpop.f32.mrb[28].mxu0  ;;  %v2711_v48 = vpop.f32.mrb[28].mxu1 }
 0x14f   :  { %v584_v49 = vpop.f32.mrb[29].mxu0  ;;  %v824_v50 = vpop.f32.mrb[29].mxu1 }
 0x152   :  { %v2713_v52 = vpop.f32.mrb[30].mxu0  ;;  %v2715_v53 = vpop.f32.mrb[30].mxu1 }
 0x153   :  { %v589_v57 = vpop.f32.mrb[31].mxu0  ;;  %v829_v58 = vpop.f32.mrb[31].mxu1 }
 0x156   :  { %v2728_v2 = vpop.f32.mrb[32].mxu0  ;;  %v1634_v5 = vpop.f32.mrb[32].mxu1 }
 0x157   :  { %v903_v6 = vadd.f32 %v1634_v5, %v518_v62  ;;  %v594_v9 = vpop.f32.mrb[33].mxu0  ;;  %v897_v10 = vpop.f32.mrb[33].mxu1  ;;  %v1288_v62 = vld [vmem:[%s3198_s3 + $0x28] sm:$0xff] }
 0x158   :  { %v898_v14 = vadd.f32 %v897_v10, %v513_v1  ;;  %v543_v9 = vadd.f32 %v2720_v54, %v2677_v15  ;;  %v558_v15 = vadd.f32 %v2720_v54, %v2689_v27 }
 0x159   :  { %v1217_v59 = vmax.f32 %v903_v6, 0.0  ;;  %v1287_v6 = vld [vmem:[%s3198_s3 + $0x20] sm:$0xff] }
 0x15a   :  { %v1216_v21 = vmax.f32 %v898_v14, 0.0  ;;  %v2741_v22 = vpop.f32.mrb[34].mxu0  ;;  %v1637_v25 = vpop.f32.mrb[34].mxu1 }
 0x15b   :  { %v1348_v26 = vsel %vm1282_vm1, %v1284_v13, %v1217_v59  ;;  %v913_v29 = vadd.f32 %v1637_v25, %v528_v17  ;;  %v599_v30 = vpop.f32.mrb[35].mxu0  ;;  %v907_v33 = vpop.f32.mrb[35].mxu1 }
 0x15c   :  { %1412 = vst [vmem:[#allocation2 + $0x8] sm:$0xff] %v1348_v26  ;;  %v1347_v3 = vsel %vm1282_vm1, %v1283_v55, %v1216_v21  ;;  %v908_v37 = vadd.f32 %v907_v33, %v523_v18  ;;  %v1290_v21 = vld [vmem:[%s3198_s3 + $0x38] sm:$0xff]  ;;  %v553_v30 = vadd.f32 %v2720_v54, %v2685_v23  ;;  %v568_v23 = vadd.f32 %v2720_v54, %v2697_v35 }
 0x15d   :  { %1411 = vst [vmem:[#allocation2] sm:$0xff] %v1347_v3  ;;  %v1219_v38 = vmax.f32 %v913_v29, 0.0  ;;  %v1289_v29 = vld [vmem:[%s3198_s3 + $0x30] sm:$0xff] }
 0x15e   :  { %v1218_v45 = vmax.f32 %v908_v37, 0.0  ;;  %v2757_v46 = vpop.f32.mrb[36].mxu0  ;;  %v1640_v49 = vpop.f32.mrb[36].mxu1 }
 0x15f   :  { %v1350_v50 = vsel %vm1282_vm1, %v1286_v34, %v1219_v38  ;;  %v923_v51 = vadd.f32 %v1640_v49, %v538_v63  ;;  %v604_v57 = vpop.f32.mrb[37].mxu0  ;;  %v917_v58 = vpop.f32.mrb[37].mxu1 }
 0x160   :  { %1414 = vst [vmem:[#allocation2 + $0x18] sm:$0xff] %v1350_v50  ;;  %v1349_v11 = vsel %vm1282_vm1, %v1285_v41, %v1218_v45  ;;  %v918_v1 = vadd.f32 %v917_v58, %v533_v42  ;;  %v1292_v42 = vld [vmem:[%s3198_s3 + $0x48] sm:$0xff]  ;;  %v1291_v50 = vld [vmem:[%s3198_s3 + $0x40] sm:$0xff] }
 0x161   :  { %1413 = vst [vmem:[#allocation2 + $0x10] sm:$0xff] %v1349_v11  ;;  %v1221_v5 = vmax.f32 %v923_v51, 0.0  ;;  %v563_v51 = vadd.f32 %v2720_v54, %v2693_v31  ;;  %v578_v31 = vadd.f32 %v2720_v54, %v2705_v43 }
 0x162   :  { %v1220_v10 = vmax.f32 %v918_v1, 0.0  ;;  %v2773_v13 = vpop.f32.mrb[38].mxu0  ;;  %v1643_v14 = vpop.f32.mrb[38].mxu1 }
 0x163   :  { %v1352_v17 = vsel %vm1282_vm1, %v1288_v62, %v1221_v5  ;;  %v933_v59 = vadd.f32 %v1643_v14, %v548_v7  ;;  %v609_v55 = vpop.f32.mrb[39].mxu0  ;;  %v927_v18 = vpop.f32.mrb[39].mxu1  ;;  %v1293_v14 = vld [vmem:[%s3198_s3 + $0x50] sm:$0xff] }
 0x164   :  { %1416 = vst [vmem:[#allocation2 + $0x28] sm:$0xff] %v1352_v17  ;;  %v1351_v19 = vsel %vm1282_vm1, %v1287_v6, %v1220_v10  ;;  %v928_v25 = vadd.f32 %v927_v18, %v543_v9  ;;  %v1294_v6 = vld [vmem:[%s3198_s3 + $0x58] sm:$0xff]  ;;  %v573_v17 = vadd.f32 %v2720_v54, %v2701_v39  ;;  %v588_v39 = vadd.f32 %v2720_v54, %v2713_v52 }
 0x165   :  { %1415 = vst [vmem:[#allocation2 + $0x20] sm:$0xff] %v1351_v19  ;;  %v1223_v26 = vmax.f32 %v933_v59, 0.0 }
 0x166   :  { %v1222_v33 = vmax.f32 %v928_v25, 0.0  ;;  %v2789_v3 = vpop.f32.mrb[40].mxu0  ;;  %v1646_v34 = vpop.f32.mrb[40].mxu1 }
 0x167   :  { %v1354_v37 = vsel %vm1282_vm1, %v1290_v21, %v1223_v26  ;;  %v943_v63 = vadd.f32 %v1646_v34, %v558_v15  ;;  %v614_v38 = vpop.f32.mrb[41].mxu0  ;;  %v937_v41 = vpop.f32.mrb[41].mxu1  ;;  %v1296_v26 = vld [vmem:[%s3198_s3 + $0x68] sm:$0xff]  ;;  %v583_v34 = vadd.f32 %v2720_v54, %v2709_v47  ;;  %v598_v47 = vadd.f32 %v2720_v54, %v2741_v22 }
 0x168   :  { %1418 = vst [vmem:[#allocation2 + $0x38] sm:$0xff] %v1354_v37  ;;  %v1353_v27 = vsel %vm1282_vm1, %v1289_v29, %v1222_v33  ;;  %v938_v45 = vadd.f32 %v937_v41, %v553_v30  ;;  %v1295_v33 = vld [vmem:[%s3198_s3 + $0x60] sm:$0xff] }
 0x169   :  { %1417 = vst [vmem:[#allocation2 + $0x30] sm:$0xff] %v1353_v27  ;;  %v1225_v49 = vmax.f32 %v943_v63, 0.0 }
 0x16a   :  { %v1224_v57 = vmax.f32 %v938_v45, 0.0  ;;  %v2805_v58 = vpop.f32.mrb[42].mxu0  ;;  %v1649_v11 = vpop.f32.mrb[42].mxu1 }
 0x16b   :  { %v1356_v62 = vsel %vm1282_vm1, %v1292_v42, %v1225_v49  ;;  %v953_v1 = vadd.f32 %v1649_v11, %v568_v23  ;;  %v619_v7 = vpop.f32.mrb[43].mxu0  ;;  %v947_v5 = vpop.f32.mrb[43].mxu1  ;;  %v1298_v23 = vld [vmem:[%s3198_s3 + $0x78] sm:$0xff] }
 0x16c   :  { %1420 = vst [vmem:[#allocation2 + $0x48] sm:$0xff] %v1356_v62  ;;  %v1355_v35 = vsel %vm1282_vm1, %v1291_v50, %v1224_v57  ;;  %v948_v9 = vadd.f32 %v947_v5, %v563_v51  ;;  %v1297_v51 = vld [vmem:[%s3198_s3 + $0x70] sm:$0xff]  ;;  %v593_v57 = vadd.f32 %v2720_v54, %v2728_v2  ;;  %v608_v2 = vadd.f32 %v2720_v54, %v2773_v13 }
 0x16d   :  { %1419 = vst [vmem:[#allocation2 + $0x40] sm:$0xff] %v1355_v35  ;;  %v1227_v10 = vmax.f32 %v953_v1, 0.0 }
 0x16e   :  { %v1226_v59 = vmax.f32 %v948_v9, 0.0  ;;  %v2821_v55 = vpop.f32.mrb[44].mxu0  ;;  %v1652_v18 = vpop.f32.mrb[44].mxu1  ;;  %v1300_v9 = vld [vmem:[%s3198_s3 + $0x88] sm:$0xff] }
 0x16f   :  { %v1358_v19 = vsel %vm1282_vm1, %v1294_v6, %v1227_v10  ;;  %v963_v21 = vadd.f32 %v1652_v18, %v578_v31  ;;  %v624_v25 = vpop.f32.mrb[45].mxu0  ;;  %v957_v15 = vpop.f32.mrb[45].mxu1 }
 0x170   :  { %1422 = vst [vmem:[#allocation2 + $0x58] sm:$0xff] %v1358_v19  ;;  %v1357_v43 = vsel %vm1282_vm1, %v1293_v14, %v1226_v59  ;;  %v958_v29 = vadd.f32 %v957_v15, %v573_v17  ;;  %v1299_v14 = vld [vmem:[%s3198_s3 + $0x80] sm:$0xff]  ;;  %v603_v17 = vadd.f32 %v2720_v54, %v2757_v46  ;;  %v618_v46 = vadd.f32 %v2720_v54, %v2805_v58 }
 0x171   :  { %1421 = vst [vmem:[#allocation2 + $0x50] sm:$0xff] %v1357_v43  ;;  %v1229_v30 = vmax.f32 %v963_v21, 0.0 }
 0x172   :  { %v1228_v37 = vmax.f32 %v958_v29, 0.0  ;;  %v627_v63 = vpop.f32.mrb[46].mxu0  ;;  %v1655_v38 = vpop.f32.mrb[46].mxu1 }
 0x173   :  { %v1360_v41 = vsel %vm1282_vm1, %v1296_v26, %v1229_v30  ;;  %v973_v27 = vadd.f32 %v1655_v38, %v588_v39  ;;  %v629_v42 = vpop.f32.mrb[47].mxu0  ;;  %v967_v45 = vpop.f32.mrb[47].mxu1  ;;  %v1302_v26 = vld [vmem:[%s3198_s3 + $0x98] sm:$0xff]  ;;  %v1301_v30 = vld [vmem:[%s3198_s3 + $0x90] sm:$0xff] }
 0x174   :  { %1424 = vst [vmem:[#allocation2 + $0x68] sm:$0xff] %v1360_v41  ;;  %v1359_v52 = vsel %vm1282_vm1, %v1295_v33, %v1228_v37  ;;  %v968_v49 = vadd.f32 %v967_v45, %v583_v34  ;;  %v613_v33 = vadd.f32 %v2720_v54, %v2789_v3  ;;  %v628_v3 = vadd.f32 %v2720_v54, %v627_v63 }
 0x175   :  { %1423 = vst [vmem:[#allocation2 + $0x60] sm:$0xff] %v1359_v52  ;;  %v1231_v50 = vmax.f32 %v973_v27, 0.0  ;;  %v1304_v52 = vld [vmem:[%s3198_s3 + $0xa8] sm:$0xff] }
 0x176   :  { %v1230_v11 = vmax.f32 %v968_v49, 0.0  ;;  %v632_v62 = vpop.f32.mrb[48].mxu0  ;;  %v1658_v1 = vpop.f32.mrb[48].mxu1 }
 0x177   :  { %v1362_v7 = vsel %vm1282_vm1, %v1298_v23, %v1231_v50  ;;  %v983_v5 = vadd.f32 %v1658_v1, %v598_v47  ;;  %v634_v35 = vpop.f32.mrb[49].mxu0  ;;  %v977_v6 = vpop.f32.mrb[49].mxu1  ;;  %v1303_v47 = vld [vmem:[%s3198_s3 + $0xa0] sm:$0xff]  ;;  %v623_v50 = vadd.f32 %v2720_v54, %v2821_v55 }
 0x178   :  { %1426 = vst [vmem:[#allocation2 + $0x78] sm:$0xff] %v1362_v7  ;;  %v1361_v22 = vsel %vm1282_vm1, %v1297_v51, %v1230_v11  ;;  %v978_v31 = vadd.f32 %v977_v6, %v593_v57  ;;  %v1306_v6 = vld [vmem:[%s3198_s3 + $0xb8] sm:$0xff] }
 0x179   :  { %1425 = vst [vmem:[#allocation2 + $0x70] sm:$0xff] %v1361_v22  ;;  %v1233_v10 = vmax.f32 %v983_v5, 0.0 }
 0x17a   :  { %v1232_v59 = vmax.f32 %v978_v31, 0.0  ;;  %v637_v18 = vpop.f32.mrb[50].mxu0  ;;  %v1661_v19 = vpop.f32.mrb[50].mxu1  ;;  %v1305_v31 = vld [vmem:[%s3198_s3 + $0xb0] sm:$0xff] }
 0x17b   :  { %v1364_v21 = vsel %vm1282_vm1, %v1300_v9, %v1233_v10  ;;  %v993_v25 = vadd.f32 %v1661_v19, %v608_v2  ;;  %v639_v15 = vpop.f32.mrb[51].mxu0  ;;  %v987_v43 = vpop.f32.mrb[51].mxu1  ;;  %v638_v55 = vadd.f32 %v2720_v54, %v637_v18  ;;  %v633_v2 = vadd.f32 %v2720_v54, %v632_v62 }
 0x17c   :  { %1428 = vst [vmem:[#allocation2 + $0x88] sm:$0xff] %v1364_v21  ;;  %v1363_v13 = vsel %vm1282_vm1, %v1299_v14, %v1232_v59  ;;  %v988_v29 = vadd.f32 %v987_v43, %v603_v17  ;;  %v1308_v15 = vld [vmem:[%s3198_s3 + $0xc8] sm:$0xff] }
 0x17d   :  { %1427 = vst [vmem:[#allocation2 + $0x80] sm:$0xff] %v1363_v13  ;;  %v1235_v39 = vmax.f32 %v993_v25, 0.0 }
 0x17e   :  { %v1234_v34 = vmax.f32 %v988_v29, 0.0  ;;  %v642_v37 = vpop.f32.mrb[52].mxu0  ;;  %v1664_v38 = vpop.f32.mrb[52].mxu1 }
 0x17f   :  { %v1366_v41 = vsel %vm1282_vm1, %v1302_v26, %v1235_v39  ;;  %v1003_v27 = vadd.f32 %v1664_v38, %v618_v46  ;;  %v644_v42 = vpop.f32.mrb[53].mxu0  ;;  %v997_v45 = vpop.f32.mrb[53].mxu1  ;;  %v1307_v26 = vld [vmem:[%s3198_s3 + $0xc0] sm:$0xff]  ;;  %v643_v29 = vadd.f32 %v2720_v54, %v642_v37 }
 0x180   :  { %1430 = vst [vmem:[#allocation2 + $0x98] sm:$0xff] %v1366_v41  ;;  %v1365_v58 = vsel %vm1282_vm1, %v1301_v30, %v1234_v34  ;;  %v998_v23 = vadd.f32 %v997_v45, %v613_v33  ;;  %v1310_v42 = vld [vmem:[%s3198_s3 + $0xd8] sm:$0xff] }
 0x181   :  { %1429 = vst [vmem:[#allocation2 + $0x90] sm:$0xff] %v1365_v58  ;;  %v1237_v49 = vmax.f32 %v1003_v27, 0.0 }
 0x182   :  { %v1236_v51 = vmax.f32 %v998_v23, 0.0  ;;  %v647_v57 = vpop.f32.mrb[54].mxu0  ;;  %v1667_v11 = vpop.f32.mrb[54].mxu1 }
 0x183   :  { %v1368_v1 = vsel %vm1282_vm1, %v1304_v52, %v1237_v49  ;;  %v1013_v7 = vadd.f32 %v1667_v11, %v628_v3  ;;  %v649_v5 = vpop.f32.mrb[55].mxu0  ;;  %v1007_v35 = vpop.f32.mrb[55].mxu1  ;;  %v648_v62 = vadd.f32 %v2720_v54, %v647_v57  ;;  %v1309_v52 = vld [vmem:[%s3198_s3 + $0xd0] sm:$0xff] }
 0x184   :  { %1432 = vst [vmem:[#allocation2 + $0xa8] sm:$0xff] %v1368_v1  ;;  %v1367_v63 = vsel %vm1282_vm1, %v1303_v47, %v1236_v51  ;;  %v1008_v22 = vadd.f32 %v1007_v35, %v623_v50 }
 0x185   :  { %1431 = vst [vmem:[#allocation2 + $0xa0] sm:$0xff] %v1367_v63  ;;  %v1239_v9 = vmax.f32 %v1013_v7, 0.0  ;;  %v1312_v7 = vld [vmem:[%s3198_s3 + $0xe8] sm:$0xff]  ;;  %v1311_v63 = vld [vmem:[%s3198_s3 + $0xe0] sm:$0xff] }
 0x186   :  { %v1238_v10 = vmax.f32 %v1008_v22, 0.0  ;;  %v652_v14 = vpop.f32.mrb[56].mxu0  ;;  %v1670_v17 = vpop.f32.mrb[56].mxu1 }
 0x187   :  { %v1370_v59 = vsel %vm1282_vm1, %v1306_v6, %v1239_v9  ;;  %v1023_v19 = vadd.f32 %v1670_v17, %v638_v55  ;;  %v654_v21 = vpop.f32.mrb[57].mxu0  ;;  %v1017_v25 = vpop.f32.mrb[57].mxu1  ;;  %v653_v23 = vadd.f32 %v2720_v54, %v652_v14 }
 0x188   :  { %1434 = vst [vmem:[#allocation2 + $0xb8] sm:$0xff] %v1370_v59  ;;  %v1369_v18 = vsel %vm1282_vm1, %v1305_v31, %v1238_v10  ;;  %v1018_v43 = vadd.f32 %v1017_v25, %v633_v2  ;;  %v1313_v21 = vld [vmem:[%s3198_s3 + $0xf0] sm:$0xff]  ;;  %v1314_v25 = vld [vmem:[%s3198_s3 + $0xf8] sm:$0xff] }
 0x189   :  { %1433 = vst [vmem:[#allocation2 + $0xb0] sm:$0xff] %v1369_v18  ;;  %v1241_v13 = vmax.f32 %v1023_v19, 0.0 }
 0x18a   :  { %v1240_v46 = vmax.f32 %v1018_v43, 0.0  ;;  %v657_v39 = vpop.f32.mrb[58].mxu0  ;;  %v1673_v30 = vpop.f32.mrb[58].mxu1 }
 0x18b   :  { %v1372_v33 = vsel %vm1282_vm1, %v1308_v15, %v1241_v13  ;;  %v1033_v34 = vadd.f32 %v1673_v30, %v648_v62  ;;  %v659_v38 = vpop.f32.mrb[59].mxu0  ;;  %v1027_v41 = vpop.f32.mrb[59].mxu1  ;;  %v658_v37 = vadd.f32 %v2720_v54, %v657_v39 }
 0x18c   :  { %1436 = vst [vmem:[#allocation2 + $0xc8] sm:$0xff] %v1372_v33  ;;  %v1371_v27 = vsel %vm1282_vm1, %v1307_v26, %v1240_v46  ;;  %v1028_v45 = vadd.f32 %v1027_v41, %v643_v29  ;;  %v1315_v33 = vld [vmem:[%s3198_s3 + $0x100] sm:$0xff] }
 0x18d   :  { %1435 = vst [vmem:[#allocation2 + $0xc0] sm:$0xff] %v1371_v27  ;;  %v1243_v58 = vmax.f32 %v1033_v34, 0.0 }
 0x18e   :  { %v1242_v3 = vmax.f32 %v1028_v45, 0.0  ;;  %v662_v49 = vpop.f32.mrb[60].mxu0  ;;  %v1676_v47 = vpop.f32.mrb[60].mxu1 }
 0x18f   :  { %v1374_v50 = vsel %vm1282_vm1, %v1310_v42, %v1243_v58  ;;  %v1043_v51 = vadd.f32 %v1676_v47, %v658_v37  ;;  %v664_v57 = vpop.f32.mrb[61].mxu0  ;;  %v1037_v11 = vpop.f32.mrb[61].mxu1  ;;  %v663_v6 = vadd.f32 %v2720_v54, %v662_v49 }
 0x190   :  { %1438 = vst [vmem:[#allocation2 + $0xd8] sm:$0xff] %v1374_v50  ;;  %v1373_v1 = vsel %vm1282_vm1, %v1309_v52, %v1242_v3  ;;  %v1038_v5 = vadd.f32 %v1037_v11, %v653_v23  ;;  %v1316_v52 = vld [vmem:[%s3198_s3 + $0x108] sm:$0xff] }
 0x191   :  { %1437 = vst [vmem:[#allocation2 + $0xd0] sm:$0xff] %v1373_v1  ;;  %v1245_v35 = vmax.f32 %v1043_v51, 0.0  ;;  %v1317_v1 = vld [vmem:[%s3198_s3 + $0x110] sm:$0xff] }
 0x192   :  { %v1244_v22 = vmax.f32 %v1038_v5, 0.0  ;;  %v667_v55 = vpop.f32.mrb[62].mxu0  ;;  %v1679_v9 = vpop.f32.mrb[62].mxu1 }
 0x193   :  { %v1376_v31 = vsel %vm1282_vm1, %v1312_v7, %v1245_v35  ;;  %v668_v2 = vadd.f32 %v2720_v54, %v667_v55  ;;  %v669_v10 = vpop.f32.mrb[63].mxu0  ;;  %v1047_v14 = vpop.f32.mrb[63].mxu1 }
 0x194   :  { %1440 = vst [vmem:[#allocation2 + $0xe8] sm:$0xff] %v1376_v31  ;;  %v1375_v17 = vsel %vm1282_vm1, %v1311_v63, %v1244_v22  ;;  %v1048_v59 = vadd.f32 %v1047_v14, %v663_v6  ;;  %v1318_v31 = vld [vmem:[%s3198_s3 + $0x118] sm:$0xff] }
 0x195   :  { %1439 = vst [vmem:[#allocation2 + $0xe0] sm:$0xff] %v1375_v17  ;;  %v1053_v19 = vadd.f32 %v1679_v9, %v668_v2 }
 0x196   :  { %v1246_v18 = vmax.f32 %v1048_v59, 0.0  ;;  %v672_v15 = vpop.f32.mrb[64].mxu0  ;;  %v1682_v43 = vpop.f32.mrb[64].mxu1 }
 0x197   :  { %v1247_v62 = vmax.f32 %v1053_v19, 0.0  ;;  %v673_v13 = vadd.f32 %v2720_v54, %v672_v15  ;;  %v674_v26 = vpop.f32.mrb[65].mxu0  ;;  %v1057_v29 = vpop.f32.mrb[65].mxu1 }
 0x198   :  { %v1377_v46 = vsel %vm1282_vm1, %v1313_v21, %v1246_v18  ;;  %v1319_v18 = vld [vmem:[%s3198_s3 + $0x120] sm:$0xff] }
 0x199   :  { %v1378_v39 = vsel %vm1282_vm1, %v1314_v25, %v1247_v62  ;;  %1441 = vst [vmem:[#allocation2 + $0xf0] sm:$0xff] %v1377_v46  ;;  %v1058_v30 = vadd.f32 %v1057_v29, %v673_v13 }
 0x19a   :  { %1442 = vst [vmem:[#allocation2 + $0xf8] sm:$0xff] %v1378_v39  ;;  %v677_v34 = vpop.f32.mrb[66].mxu0  ;;  %v1685_v38 = vpop.f32.mrb[66].mxu1 }
 0x19b   :  { %v1248_v41 = vmax.f32 %v1058_v30, 0.0  ;;  %v678_v27 = vadd.f32 %v2720_v54, %v677_v34  ;;  %v679_v42 = vpop.f32.mrb[67].mxu0  ;;  %v1067_v45 = vpop.f32.mrb[67].mxu1  ;;  %v1320_v30 = vld [vmem:[%s3198_s3 + $0x128] sm:$0xff] }
 0x19d   :  { %v1379_v37 = vsel %vm1282_vm1, %v1315_v33, %v1248_v41  ;;  %v1063_v58 = vadd.f32 %v1682_v43, %v678_v27 }
 0x19e   :  { %1443 = vst [vmem:[#allocation2 + $0x100] sm:$0xff] %v1379_v37  ;;  %v682_v23 = vpop.f32.mrb[68].mxu0  ;;  %v1688_v3 = vpop.f32.mrb[68].mxu1 }
 0x19f   :  { %v1249_v49 = vmax.f32 %v1063_v58, 0.0  ;;  %v683_v47 = vadd.f32 %v2720_v54, %v682_v23  ;;  %v684_v50 = vpop.f32.mrb[69].mxu0  ;;  %v1077_v51 = vpop.f32.mrb[69].mxu1  ;;  %v1321_v58 = vld [vmem:[%s3198_s3 + $0x130] sm:$0xff] }
 0x1a1   :  { %v1380_v57 = vsel %vm1282_vm1, %v1316_v52, %v1249_v49  ;;  %v1068_v11 = vadd.f32 %v1067_v45, %v683_v47 }
 0x1a2   :  { %1444 = vst [vmem:[#allocation2 + $0x108] sm:$0xff] %v1380_v57  ;;  %v687_v7 = vpop.f32.mrb[70].mxu0  ;;  %v1691_v5 = vpop.f32.mrb[70].mxu1 }
 0x1a3   :  { %v1250_v35 = vmax.f32 %v1068_v11, 0.0  ;;  %v688_v63 = vadd.f32 %v2720_v54, %v687_v7  ;;  %v689_v6 = vpop.f32.mrb[71].mxu0  ;;  %v1087_v22 = vpop.f32.mrb[71].mxu1  ;;  %v1322_v7 = vld [vmem:[%s3198_s3 + $0x138] sm:$0xff] }
 0x1a5   :  { %v1381_v55 = vsel %vm1282_vm1, %v1317_v1, %v1250_v35  ;;  %v1073_v9 = vadd.f32 %v1685_v38, %v688_v63  ;;  %v753_v1 = vadd.f32 %v2720_v54, %v2655_v56  ;;  %v768_v56 = vadd.f32 %v2720_v54, %v2667_v4 }
 0x1a6   :  { %1445 = vst [vmem:[#allocation2 + $0x110] sm:$0xff] %v1381_v55  ;;  %v692_v2 = vpop.f32.mrb[72].mxu0  ;;  %v2976_v10 = vpop.f32.mrb[72].mxu1 }
 0x1a7   :  { %v1251_v14 = vmax.f32 %v1073_v9, 0.0  ;;  %v693_v17 = vadd.f32 %v2720_v54, %v692_v2  ;;  %v694_v59 = vpop.f32.mrb[73].mxu0  ;;  %v1097_v19 = vpop.f32.mrb[73].mxu1 }
 0x1a8   :  { %v1331_v59 = vld [vmem:[%s3198_s3 + $0x180] sm:$0xff] }
 0x1a9   :  { %v1382_v21 = vsel %vm1282_vm1, %v1318_v31, %v1251_v14  ;;  %v1078_v25 = vadd.f32 %v1077_v51, %v693_v17  ;;  %v758_v51 = vadd.f32 %v2720_v54, %v2659_v60 }
 0x1aa   :  { %1446 = vst [vmem:[#allocation2 + $0x118] sm:$0xff] %v1382_v21  ;;  %v697_v15 = vpop.f32.mrb[74].mxu0  ;;  %v2984_v43 = vpop.f32.mrb[74].mxu1  ;;  %v763_v21 = vadd.f32 %v2720_v54, %v2663_v0 }
 0x1ab   :  { %v1252_v62 = vmax.f32 %v1078_v25, 0.0  ;;  %v698_v13 = vadd.f32 %v2720_v54, %v697_v15  ;;  %v699_v26 = vpop.f32.mrb[75].mxu0  ;;  %v2987_v29 = vpop.f32.mrb[75].mxu1  ;;  %v1323_v25 = vld [vmem:[%s3198_s3 + $0x140] sm:$0xff] }
 0x1ad   :  { %v1383_v46 = vsel %vm1282_vm1, %v1319_v18, %v1252_v62  ;;  %v1083_v39 = vadd.f32 %v1688_v3, %v698_v13 }
 0x1ae   :  { %1447 = vst [vmem:[#allocation2 + $0x120] sm:$0xff] %v1383_v46  ;;  %v702_v33 = vpop.f32.mrb[76].mxu0  ;;  %v2994_v34 = vpop.f32.mrb[76].mxu1 }
 0x1af   :  { %v1253_v38 = vmax.f32 %v1083_v39, 0.0  ;;  %v703_v41 = vadd.f32 %v2720_v54, %v702_v33  ;;  %v704_v27 = vpop.f32.mrb[77].mxu0  ;;  %v2997_v42 = vpop.f32.mrb[77].mxu1 }
 0x1b1   :  { %v1384_v45 = vsel %vm1282_vm1, %v1320_v30, %v1253_v38  ;;  %v1088_v37 = vadd.f32 %v1087_v22, %v703_v41  ;;  %v1334_v30 = vld [vmem:[%s3198_s3 + $0x198] sm:$0xff]  ;;  %v778_v38 = vadd.f32 %v2720_v54, %v2675_v12 }
 0x1b2   :  { %1448 = vst [vmem:[#allocation2 + $0x128] sm:$0xff] %v1384_v45  ;;  %v707_v52 = vpop.f32.mrb[78].mxu0  ;;  %v3004_v23 = vpop.f32.mrb[78].mxu1 }
 0x1b3   :  { %v1254_v3 = vmax.f32 %v1088_v37, 0.0  ;;  %v708_v49 = vadd.f32 %v2720_v54, %v707_v52  ;;  %v709_v47 = vpop.f32.mrb[79].mxu0  ;;  %v3007_v50 = vpop.f32.mrb[79].mxu1  ;;  %v1333_v37 = vld [vmem:[%s3198_s3 + $0x190] sm:$0xff]  ;;  %v1324_v52 = vld [vmem:[%s3198_s3 + $0x148] sm:$0xff] }
 0x1b5   :  { %v1385_v57 = vsel %vm1282_vm1, %v1321_v58, %v1254_v3  ;;  %v1093_v11 = vadd.f32 %v1691_v5, %v708_v49  ;;  %v1332_v5 = vld [vmem:[%s3198_s3 + $0x188] sm:$0xff]  ;;  %v773_v58 = vadd.f32 %v2720_v54, %v2671_v8 }
 0x1b6   :  { %1449 = vst [vmem:[#allocation2 + $0x130] sm:$0xff] %v1385_v57  ;;  %v712_v35 = vpop.f32.mrb[80].mxu0  ;;  %v1706_v63 = vpop.f32.mrb[80].mxu1 }
 0x1b7   :  { %v1255_v6 = vmax.f32 %v1093_v11, 0.0  ;;  %v713_v22 = vadd.f32 %v2720_v54, %v712_v35  ;;  %v1143_v55 = vadd.f32 %v1706_v63, %v758_v51  ;;  %v714_v9 = vpop.f32.mrb[81].mxu0  ;;  %v1137_v60 = vpop.f32.mrb[81].mxu1  ;;  %v788_v63 = vadd.f32 %v2720_v54, %v2683_v20 }
 0x1b8   :  { %v1138_v31 = vadd.f32 %v1137_v60, %v753_v1  ;;  %v1335_v9 = vld [vmem:[%s3198_s3 + $0x1a0] sm:$0xff]  ;;  %v783_v60 = vadd.f32 %v2720_v54, %v2679_v16 }
 0x1b9   :  { %v1386_v2 = vsel %vm1282_vm1, %v1322_v7, %v1255_v6  ;;  %v1098_v14 = vadd.f32 %v1097_v19, %v713_v22  ;;  %v1265_v17 = vmax.f32 %v1143_v55, 0.0  ;;  %v1336_v7 = vld [vmem:[%s3198_s3 + $0x1a8] sm:$0xff] }
 0x1ba   :  { %1450 = vst [vmem:[#allocation2 + $0x138] sm:$0xff] %v1386_v2  ;;  %v1264_v18 = vmax.f32 %v1138_v31, 0.0  ;;  %v717_v15 = vpop.f32.mrb[82].mxu0  ;;  %v1709_v4 = vpop.f32.mrb[82].mxu1 }
 0x1bb   :  { %v1256_v62 = vmax.f32 %v1098_v14, 0.0  ;;  %v1396_v19 = vsel %vm1282_vm1, %v1332_v5, %v1265_v17  ;;  %v718_v13 = vadd.f32 %v2720_v54, %v717_v15  ;;  %v1153_v26 = vadd.f32 %v1709_v4, %v768_v56  ;;  %v719_v46 = vpop.f32.mrb[83].mxu0  ;;  %v1147_v39 = vpop.f32.mrb[83].mxu1  ;;  %v1325_v5 = vld [vmem:[%s3198_s3 + $0x150] sm:$0xff] }
 0x1bc   :  { %1460 = vst [vmem:[#allocation2 + $0x188] sm:$0xff] %v1396_v19  ;;  %v1395_v0 = vsel %vm1282_vm1, %v1331_v59, %v1264_v18  ;;  %v1148_v33 = vadd.f32 %v1147_v39, %v763_v21  ;;  %v798_v15 = vadd.f32 %v2720_v54, %v2691_v28  ;;  %v1326_v46 = vld [vmem:[%s3198_s3 + $0x158] sm:$0xff] }
 0x1bd   :  { %v1387_v41 = vsel %vm1282_vm1, %v1323_v25, %v1256_v62  ;;  %1459 = vst [vmem:[#allocation2 + $0x180] sm:$0xff] %v1395_v0  ;;  %v1103_v27 = vadd.f32 %v2976_v10, %v718_v13  ;;  %v1267_v45 = vmax.f32 %v1153_v26, 0.0  ;;  %v1338_v25 = vld [vmem:[%s3198_s3 + $0x1b8] sm:$0xff]  ;;  %v1337_v13 = vld [vmem:[%s3198_s3 + $0x1b0] sm:$0xff]  ;;  %v793_v26 = vadd.f32 %v2720_v54, %v2687_v24 }
 0x1be   :  { %1451 = vst [vmem:[#allocation2 + $0x140] sm:$0xff] %v1387_v41  ;;  %v1266_v12 = vmax.f32 %v1148_v33, 0.0  ;;  %v722_v3 = vpop.f32.mrb[84].mxu0  ;;  %v1712_v49 = vpop.f32.mrb[84].mxu1 }
 0x1bf   :  { %v1257_v47 = vmax.f32 %v1103_v27, 0.0  ;;  %v1398_v10 = vsel %vm1282_vm1, %v1334_v30, %v1267_v45  ;;  %v723_v51 = vadd.f32 %v2720_v54, %v722_v3  ;;  %v1163_v57 = vadd.f32 %v1712_v49, %v778_v38  ;;  %v724_v11 = vpop.f32.mrb[85].mxu0  ;;  %v1157_v1 = vpop.f32.mrb[85].mxu1  ;;  %v1340_v45 = vld [vmem:[%s3198_s3 + $0x1c8] sm:$0xff]  ;;  %v1339_v49 = vld [vmem:[%s3198_s3 + $0x1c0] sm:$0xff] }
 0x1c0   :  { %1462 = vst [vmem:[#allocation2 + $0x198] sm:$0xff] %v1398_v10  ;;  %v1397_v8 = vsel %vm1282_vm1, %v1333_v37, %v1266_v12  ;;  %v1158_v35 = vadd.f32 %v1157_v1, %v773_v58  ;;  %v808_v58 = vadd.f32 %v2720_v54, %v2699_v36  ;;  %v1327_v10 = vld [vmem:[%s3198_s3 + $0x160] sm:$0xff] }
 0x1c1   :  { %v1388_v6 = vsel %vm1282_vm1, %v1324_v52, %v1257_v47  ;;  %1461 = vst [vmem:[#allocation2 + $0x190] sm:$0xff] %v1397_v8  ;;  %v1108_v22 = vadd.f32 %v2987_v29, %v723_v51  ;;  %v1269_v55 = vmax.f32 %v1163_v57, 0.0  ;;  %v803_v47 = vadd.f32 %v2720_v54, %v2695_v32 }
 0x1c2   :  { %1452 = vst [vmem:[#allocation2 + $0x148] sm:$0xff] %v1388_v6  ;;  %v1268_v20 = vmax.f32 %v1158_v35, 0.0  ;;  %v727_v31 = vpop.f32.mrb[86].mxu0  ;;  %v1715_v56 = vpop.f32.mrb[86].mxu1 }
 0x1c3   :  { %v1258_v2 = vmax.f32 %v1108_v22, 0.0  ;;  %v1400_v29 = vsel %vm1282_vm1, %v1336_v7, %v1269_v55  ;;  %v728_v14 = vadd.f32 %v2720_v54, %v727_v31  ;;  %v1173_v17 = vadd.f32 %v1715_v56, %v788_v63  ;;  %v729_v59 = vpop.f32.mrb[87].mxu0  ;;  %v1167_v21 = vpop.f32.mrb[87].mxu1  ;;  %v1342_v63 = vld [vmem:[%s3198_s3 + $0x1d8] sm:$0xff]  ;;  %v1328_v31 = vld [vmem:[%s3198_s3 + $0x168] sm:$0xff] }
 0x1c4   :  { %1464 = vst [vmem:[#allocation2 + $0x1a8] sm:$0xff] %v1400_v29  ;;  %v1399_v16 = vsel %vm1282_vm1, %v1335_v9, %v1268_v20  ;;  %v1168_v18 = vadd.f32 %v1167_v21, %v783_v60  ;;  %v818_v22 = vadd.f32 %v2720_v54, %v2707_v44  ;;  %v813_v20 = vadd.f32 %v2720_v54, %v2703_v40 }
 0x1c5   :  { %v1389_v4 = vsel %vm1282_vm1, %v1325_v5, %v1258_v2  ;;  %1463 = vst [vmem:[#allocation2 + $0x1a0] sm:$0xff] %v1399_v16  ;;  %v1113_v62 = vadd.f32 %v2984_v43, %v728_v14  ;;  %v1271_v19 = vmax.f32 %v1173_v17, 0.0  ;;  %v1341_v5 = vld [vmem:[%s3198_s3 + $0x1d0] sm:$0xff]  ;;  %v1344_v16 = vld [vmem:[%s3198_s3 + $0x1e8] sm:$0xff] }
 0x1c6   :  { %1453 = vst [vmem:[#allocation2 + $0x150] sm:$0xff] %v1389_v4  ;;  %v1270_v28 = vmax.f32 %v1168_v18, 0.0  ;;  %v732_v39 = vpop.f32.mrb[88].mxu0  ;;  %v1718_v0 = vpop.f32.mrb[88].mxu1  ;;  %v828_v18 = vadd.f32 %v2720_v54, %v2715_v53 }
 0x1c7   :  { %v1259_v30 = vmax.f32 %v1113_v62, 0.0  ;;  %v1402_v43 = vsel %vm1282_vm1, %v1338_v25, %v1271_v19  ;;  %v733_v33 = vadd.f32 %v2720_v54, %v732_v39  ;;  %v1183_v38 = vadd.f32 %v1718_v0, %v798_v15  ;;  %v734_v41 = vpop.f32.mrb[89].mxu0  ;;  %v1177_v27 = vpop.f32.mrb[89].mxu1  ;;  %v1343_v19 = vld [vmem:[%s3198_s3 + $0x1e0] sm:$0xff] }
 0x1c8   :  { %1466 = vst [vmem:[#allocation2 + $0x1b8] sm:$0xff] %v1402_v43  ;;  %v1401_v24 = vsel %vm1282_vm1, %v1337_v13, %v1270_v28  ;;  %v1178_v37 = vadd.f32 %v1177_v27, %v793_v26  ;;  %v823_v13 = vadd.f32 %v2720_v54, %v2711_v48  ;;  %v1329_v26 = vld [vmem:[%s3198_s3 + $0x170] sm:$0xff] }
 0x1c9   :  { %v1390_v52 = vsel %vm1282_vm1, %v1326_v46, %v1259_v30  ;;  %1465 = vst [vmem:[#allocation2 + $0x1b0] sm:$0xff] %v1401_v24  ;;  %v1118_v12 = vadd.f32 %v2997_v42, %v733_v33  ;;  %v1273_v3 = vmax.f32 %v1183_v38, 0.0  ;;  %v1346_v38 = vld [vmem:[%s3198_s3 + $0x1f8] sm:$0xff] }
 0x1ca   :  { %1454 = vst [vmem:[#allocation2 + $0x158] sm:$0xff] %v1390_v52  ;;  %v1272_v36 = vmax.f32 %v1178_v37, 0.0  ;;  %v737_v51 = vpop.f32.mrb[90].mxu0  ;;  %v1721_v57 = vpop.f32.mrb[90].mxu1  ;;  %v1330_v37 = vld [vmem:[%s3198_s3 + $0x178] sm:$0xff] }
 0x1cb   :  { %v1260_v11 = vmax.f32 %v1118_v12, 0.0  ;;  %v1404_v42 = vsel %vm1282_vm1, %v1340_v45, %v1273_v3  ;;  %v738_v1 = vadd.f32 %v2720_v54, %v737_v51  ;;  %v1193_v8 = vadd.f32 %v1721_v57, %v808_v58  ;;  %v739_v7 = vpop.f32.mrb[91].mxu0  ;;  %v1187_v35 = vpop.f32.mrb[91].mxu1  ;;  %v1345_v45 = vld [vmem:[%s3198_s3 + $0x1f0] sm:$0xff] }
 0x1cc   :  { %1468 = vst [vmem:[#allocation2 + $0x1c8] sm:$0xff] %v1404_v42  ;;  %v1403_v32 = vsel %vm1282_vm1, %v1339_v49, %v1272_v36  ;;  %v1188_v6 = vadd.f32 %v1187_v35, %v803_v47 }
 0x1cd   :  { %v1391_v55 = vsel %vm1282_vm1, %v1327_v10, %v1260_v11  ;;  %1467 = vst [vmem:[#allocation2 + $0x1c0] sm:$0xff] %v1403_v32  ;;  %v1123_v9 = vadd.f32 %v2994_v34, %v738_v1  ;;  %v1275_v60 = vmax.f32 %v1193_v8, 0.0 }
 0x1ce   :  { %1455 = vst [vmem:[#allocation2 + $0x160] sm:$0xff] %v1391_v55  ;;  %v1274_v44 = vmax.f32 %v1188_v6, 0.0  ;;  %v742_v56 = vpop.f32.mrb[92].mxu0  ;;  %v1724_v2 = vpop.f32.mrb[92].mxu1 }
 0x1cf   :  { %v1261_v29 = vmax.f32 %v1123_v9, 0.0  ;;  %v1406_v34 = vsel %vm1282_vm1, %v1342_v63, %v1275_v60  ;;  %v743_v14 = vadd.f32 %v2720_v54, %v742_v56  ;;  %v1203_v17 = vadd.f32 %v1724_v2, %v818_v22  ;;  %v744_v59 = vpop.f32.mrb[93].mxu0  ;;  %v1197_v21 = vpop.f32.mrb[93].mxu1 }
 0x1d0   :  { %1470 = vst [vmem:[#allocation2 + $0x1d8] sm:$0xff] %v1406_v34  ;;  %v1405_v40 = vsel %vm1282_vm1, %v1341_v5, %v1274_v44  ;;  %v1198_v25 = vadd.f32 %v1197_v21, %v813_v20 }
 0x1d1   :  { %v1392_v15 = vsel %vm1282_vm1, %v1328_v31, %v1261_v29  ;;  %1469 = vst [vmem:[#allocation2 + $0x1d0] sm:$0xff] %v1405_v40  ;;  %v1128_v4 = vadd.f32 %v3007_v50, %v743_v14  ;;  %v1277_v62 = vmax.f32 %v1203_v17, 0.0 }
 0x1d2   :  { %1456 = vst [vmem:[#allocation2 + $0x168] sm:$0xff] %v1392_v15  ;;  %v1276_v53 = vmax.f32 %v1198_v25, 0.0  ;;  %v747_v46 = vpop.f32.mrb[94].mxu0  ;;  %v1727_v28 = vpop.f32.mrb[94].mxu1 }
 0x1d3   :  { %v1262_v39 = vmax.f32 %v1128_v4, 0.0  ;;  %v1408_v50 = vsel %vm1282_vm1, %v1344_v16, %v1277_v62  ;;  %v748_v0 = vadd.f32 %v2720_v54, %v747_v46  ;;  %v1213_v30 = vadd.f32 %v1727_v28, %v828_v18  ;;  %v749_v43 = vpop.f32.mrb[95].mxu0  ;;  %v1207_v33 = vpop.f32.mrb[95].mxu1 }
 0x1d4   :  { %1472 = vst [vmem:[#allocation2 + $0x1e8] sm:$0xff] %v1408_v50  ;;  %v1407_v48 = vsel %vm1282_vm1, %v1343_v19, %v1276_v53  ;;  %v1208_v41 = vadd.f32 %v1207_v33, %v823_v13 }
 0x1d5   :  { %v1393_v27 = vsel %vm1282_vm1, %v1329_v26, %v1262_v39  ;;  %1471 = vst [vmem:[#allocation2 + $0x1e0] sm:$0xff] %v1407_v48  ;;  %v1133_v54 = vadd.f32 %v3004_v23, %v748_v0  ;;  %v1279_v24 = vmax.f32 %v1213_v30, 0.0 }
 0x1d6   :  { %1457 = vst [vmem:[#allocation2 + $0x170] sm:$0xff] %v1393_v27  ;;  %v1278_v58 = vmax.f32 %v1208_v41, 0.0 }
 0x1d7   :  { %v1263_v52 = vmax.f32 %v1133_v54, 0.0  ;;  %v1410_v12 = vsel %vm1282_vm1, %v1346_v38, %v1279_v24 }
 0x1d8   :  { %1474 = vst [vmem:[#allocation2 + $0x1f8] sm:$0xff] %v1410_v12  ;;  %v1409_v23 = vsel %vm1282_vm1, %v1345_v45, %v1278_v58 }
 0x1d9   :  { %v1394_v3 = vsel %vm1282_vm1, %v1330_v37, %v1263_v52  ;;  %1473 = vst [vmem:[#allocation2 + $0x1f0] sm:$0xff] %v1409_v23 }
 0x1da   :  { %1458 = vst [vmem:[#allocation2 + $0x178] sm:$0xff] %v1394_v3 }
 0x1db   :  { %1831 = shalt.err (!%p1828_p4)
}
 0x1dc   :  { %s1832_s30 = scalar_lea.hbm %s3199_s4, 8192 }
 0x1dd   :  { %p1833_p5 = scmp.ne.s32.totalorder %s3199_s4, %s1832_s30  ;;  %p1836_p6 = scmp.lt.u32.totalorder %s1832_s30, %s3199_s4 }
 0x1df   :  { %p1838_p7 = pnand %p1836_p6, %p1833_p5 }
 0x1e1   :  { %1841 = shalt.err (!%p1838_p7)
}
 0x1e2   :  { %s1846_s9 = smov 128   ;;  %s1847_s10 = smov 8  }
 0x1e3   :  { %1486 = dma.vmem_to_hbm [thread:$0]  %s1481_s23, 8192, %s3199_s4, [#allocation3], %s1846_s9, %s1846_s9, %s1847_s10  }
 0x1e4   :  { %1842 = dma.done.wait [#allocation3], 8192  }
 0x1e5   :  { %1843 = vsyncadd [#allocation3], 4294959104 }
 0x1e6   :  { %1490 = vsyncpa [#allocation3], 1 }

</bundles_post_ra>
